<compile_context>
chip_gen: v7x
topology: tpu7x:2x2x1
jax: 0.10.0
libtpu: 0.0.40
codegen_flags: <defaults>
</compile_context>

<pallas_src>
import functools
import math

import jax
import jax.numpy as jnp
from jax.experimental import pallas as pl
from jax.experimental.pallas import tpu as pltpu


# ------------------------------ in-kernel math ------------------------------ #

def _erf(v):
    # TODO(synk): exact lax.erf lowering is not guaranteed inside Mosaic; use
    # Abramowitz & Stegun 7.1.26 (|error| < 1.5e-7), well inside the 1e-4 check.
    a1, a2, a3, a4, a5 = (0.254829592, -0.284496736, 1.421413741,
                          -1.453152027, 1.061405429)
    pp = 0.3275911
    sgn = jnp.where(v >= 0.0, 1.0, -1.0)
    av = jnp.abs(v)
    t = 1.0 / (1.0 + pp * av)
    poly = ((((a5 * t + a4) * t + a3) * t + a2) * t + a1) * t
    return sgn * (1.0 - poly * jnp.exp(-av * av))


def _gelu_exact(v):
    # nn.GELU() default == exact erf-based GELU.
    return 0.5 * v * (1.0 + _erf(v * (1.0 / math.sqrt(2.0))))


# -------------------------------- the kernel -------------------------------- #

def _skm_kernel(x_ref, em_ref, wa_ref, wb_ref, o_ref, *, W, C, Cr, Cf):
    """One block of `bt` images.  Shapes inside the kernel:

    x_ref  : (bt, C, H*W)      lane-dense input images
    em_ref : (9, H*W)          per-tap combined boundary masks (tap k = 3*(dh+1)+(dw+1))
    wa_ref : (C, 19+8*Cr+Cf)   packed per-channel weight columns:
                               [w1 taps | w3 taps | wpw | ca1_w1 | ca1_w2^T |
                                sa1_w1 | sa1_w2^T | ca3_w1 | ca3_w2^T |
                                sa3_w1 | sa3_w2^T | mw1]
    wb_ref : (2C+1, Cf+1)      rows 0..2C-1 = [mw2^T | mb2], row 2C = [mb1 | 0]
    o_ref  : (bt, C, H*W)      output
    """
    Bt = x_ref.shape[0]
    HW = x_ref.shape[2]
    BC = Bt * C

    x = x_ref[...].reshape(BC, HW)                       # flatten (bt,C) -> sublanes

    # ---- unpack the lane-packed weights (static slices, tiny) ----
    wa = wa_ref[...]
    w1 = wa[:, 0:9]
    w3 = wa[:, 9:18]
    wpw = wa[:, 18:19]
    base = 19
    ca1_w1 = wa[:, base + 0 * Cr:base + 1 * Cr]
    ca1_w2t = wa[:, base + 1 * Cr:base + 2 * Cr]
    sa1_w1 = wa[:, base + 2 * Cr:base + 3 * Cr]
    sa1_w2t = wa[:, base + 3 * Cr:base + 4 * Cr]
    ca3_w1 = wa[:, base + 4 * Cr:base + 5 * Cr]
    ca3_w2t = wa[:, base + 5 * Cr:base + 6 * Cr]
    sa3_w1 = wa[:, base + 6 * Cr:base + 7 * Cr]
    sa3_w2t = wa[:, base + 7 * Cr:base + 8 * Cr]
    mw1 = wa[:, base + 8 * Cr:base + 8 * Cr + Cf]
    wb = wb_ref[...]
    mw2t = wb[0:2 * C, 0:Cf]
    mb2 = wb[0:2 * C, Cf:Cf + 1]
    mb1 = wb[2 * C:2 * C + 1, 0:Cf]

    # path2 statistic: mean over H*W of the 1x1 depthwise conv == wpw * mean(x)
    avg2 = wpw[None] * jnp.mean(x, axis=1, keepdims=True).reshape(Bt, C, 1)  # (bt,C,1)

    # Tap weights replicated across the bt images riding the sublane axis
    # (hoisted once; tiny).
    w1b = jnp.broadcast_to(w1[None], (Bt, C, 9)).reshape(BC, 9)
    w3b = jnp.broadcast_to(w3[None], (Bt, C, 9)).reshape(BC, 9)

    # One shared 9-tap loop for BOTH depthwise 3x3 convolutions.
    # Each tap (dh,dw):  out[p] = x[p + dh*W + dw]  with zeros outside the
    # image; implemented as a lane rotation (jnp.roll semantics) + one
    # precomputed combined (top/bottom x left/right) boundary mask.
    em = em_ref[...]
    acc1 = jnp.zeros((BC, HW), jnp.float32)
    acc3 = jnp.zeros((BC, HW), jnp.float32)
    for dh in (-1, 0, 1):
        for dw in (-1, 0, 1):
            k = (dh + 1) * 3 + (dw + 1)
            off = dh * W + dw
            if off == 0:
                t = x
            else:
                t = pltpu.roll(x, shift=(-off) % HW, axis=1) * em[k:k + 1, :]
            acc1 = acc1 + t * w1b[:, k:k + 1]
            acc3 = acc3 + t * w3b[:, k:k + 1]

    # Pooled statistics (reductions along the lane axis), viewed per-image.
    def pool(y):
        mean = jnp.mean(y, axis=1, keepdims=True).reshape(Bt, C, 1)
        mx = jnp.max(y, axis=1, keepdims=True).reshape(Bt, C, 1)
        return mean, mx

    mean1, max1 = pool(acc1)
    mean3, max3 = pool(acc3)

    def mlp(col, wi, wot):
        # Linear(C->Cr, no bias) -> GELU(exact) -> Linear(Cr->C, no bias),
        # as VPU broadcast + sublane/lane reduce (no MXU; fine at small C).
        h = _gelu_exact(jnp.sum(col * wi[None], axis=1, keepdims=True))   # (bt,1,Cr)
        return jnp.sum(wot[None] * h, axis=2, keepdims=True)              # (bt,C,1)

    # ChannelAttention (sigmoid, > 0) and SpatialAttention (no sigmoid in the
    # reference).  max(ca * y) == ca * max(y) because ca > 0.
    ca1 = jax.nn.sigmoid(mlp(mean1, ca1_w1, ca1_w2t) + mlp(max1, ca1_w1, ca1_w2t))
    s1 = ca1 * mlp(ca1 * max1, sa1_w1, sa1_w2t)
    ca3 = jax.nn.sigmoid(mlp(mean3, ca3_w1, ca3_w2t) + mlp(max3, ca3_w1, ca3_w2t))
    s3 = ca3 * mlp(ca3 * max3, sa3_w1, sa3_w2t)

    # SKM selection MLP: Linear+bias -> ReLU -> Linear+bias -> Sigmoid.
    h = jnp.maximum(jnp.sum(avg2 * mw1[None], axis=1, keepdims=True)
                    + mb1[None], 0.0)                                      # (bt,1,Cf)
    g = jax.nn.sigmoid(jnp.sum(mw2t[None] * h, axis=2, keepdims=True)
                       + mb2[None])                                        # (bt,2C,1)

    a1 = (s1 * g[:, :C, :]).reshape(BC, 1)
    a3 = (s3 * g[:, C:, :]).reshape(BC, 1)
    o_ref[...] = (acc1 * a1 + acc3 * a3).reshape(Bt, C, HW)


# --------------------------------- wrapper ---------------------------------- #

def skm_forward(x, p, *, bt=None):
    B, C, H, W = x.shape
    HW = H * W
    Cr = p["ca1_w1"].shape[1]
    Cf = p["mw1"].shape[1]

    # Batch blocking: amortise per-step overhead, but keep the grid length at 2
    # when B >= 2 so both v7x TensorCores get work (v5e/v6e: single TC, any
    # value works; bigger bt just means fewer steps).
    if bt is None:
        bt = max(1, B // 2)
    bt = min(bt, B)
    while B % bt:
        bt -= 1
    grid_b = B // bt

    x_f = x.reshape(B, C, HW).astype(jnp.float32)

    # Per-tap combined boundary masks (top/bottom x left/right), shape (9, HW).
    hh = jnp.arange(HW, dtype=jnp.int32) // W
    ww = jnp.arange(HW, dtype=jnp.int32) % W
    ones = jnp.ones((HW,), dtype=bool)
    vmask = {-1: hh != 0, 0: ones, 1: hh != H - 1}
    hmask = {-1: ww != 0, 0: ones, 1: ww != W - 1}
    em = jnp.stack([(vmask[dh] & hmask[dw]).astype(jnp.float32)
                    for dh in (-1, 0, 1) for dw in (-1, 0, 1)])            # (9, HW)

    # Pack all per-channel weight columns into ONE lane-dense (C, K) array and
    # the selection layer-2 (+ both biases) into ONE (2C+1, Cf+1) array, so the
    # kernel sees 4 inputs instead of 17 tiny padded DMAs.
    wa = jnp.concatenate([
        p["w1_conv"].reshape(C, 9), p["w3_conv"].reshape(C, 9),
        p["wpw"].reshape(C, 1),
        p["ca1_w1"], p["ca1_w2"].T, p["sa1_w1"], p["sa1_w2"].T,
        p["ca3_w1"], p["ca3_w2"].T, p["sa3_w1"], p["sa3_w2"].T,
        p["mw1"]], axis=1).astype(jnp.float32)                             # (C, 19+8Cr+Cf)
    wb_top = jnp.concatenate([p["mw2"].T, p["mb2"].reshape(-1, 1)], axis=1)
    wb_bot = jnp.concatenate([p["mb1"].reshape(1, Cf),
                              jnp.zeros((1, 1), jnp.float32)], axis=1)
    wb = jnp.concatenate([wb_top, wb_bot], axis=0).astype(jnp.float32)     # (2C+1, Cf+1)

    kernel = functools.partial(_skm_kernel, W=W, C=C, Cr=Cr, Cf=Cf)
    out = pl.pallas_call(
        kernel,
        out_shape=jax.ShapeDtypeStruct((B, C, HW), jnp.float32),
        grid=(grid_b,),
        in_specs=[pl.BlockSpec((bt, C, HW), lambda i: (i, 0, 0)),
                  pl.BlockSpec(em.shape, lambda i: (0, 0)),
                  pl.BlockSpec(wa.shape, lambda i: (0, 0)),
                  pl.BlockSpec(wb.shape, lambda i: (0, 0))],
        out_specs=pl.BlockSpec((bt, C, HW), lambda i: (i, 0, 0)),
        compiler_params=pltpu.CompilerParams(dimension_semantics=("parallel",)),
    )(x_f, em, wa, wb)
    return out.reshape(B, C, H, W)


# -------------------------- parameters & reference -------------------------- #

def init_params(key, C, reduction_rate=16, chanfactor=4):
    Cr = C // reduction_rate
    Cf = C // chanfactor
    ks = jax.random.split(key, 16)

    def n(k, shape, scale):
        return jax.random.normal(k, shape, jnp.float32) * scale

    return dict(
        w1_conv=n(ks[0], (C, 3, 3), 0.3),    # path1 depthwise 3x3 (torch (C,1,3,3))
        w3_conv=n(ks[1], (C, 3, 3), 0.3),    # path3 depthwise 3x3
        wpw=n(ks[2], (C,), 0.5),             # path2 depthwise 1x1 (torch (C,1,1,1))
        # attention MLP weights stored (in, out) for feat @ W
        ca1_w1=n(ks[3], (C, Cr), 0.3), ca1_w2=n(ks[4], (Cr, C), 0.3),
        sa1_w1=n(ks[5], (C, Cr), 0.3), sa1_w2=n(ks[6], (Cr, C), 0.3),
        ca3_w1=n(ks[7], (C, Cr), 0.3), ca3_w2=n(ks[8], (Cr, C), 0.3),
        sa3_w1=n(ks[9], (C, Cr), 0.3), sa3_w2=n(ks[10], (Cr, C), 0.3),
        mw1=n(ks[11], (C, Cf), 0.3), mb1=n(ks[12], (Cf,), 0.1),
        mw2=n(ks[13], (Cf, 2 * C), 0.3), mb2=n(ks[14], (2 * C,), 0.1),
    )


def ref_forward(x, p):
    """Pure-JAX reference that mirrors the PyTorch SKM forward op-by-op."""
    B, C, H, W = x.shape

    def dwconv3x3(inp, w):
        return jax.lax.conv_general_dilated(
            inp, w[:, None, :, :], window_strides=(1, 1),
            padding=((1, 1), (1, 1)),
            dimension_numbers=("NCHW", "OIHW", "NCHW"),
            feature_group_count=C)

    def two_layer(f, w1t, w2t):
        return jax.nn.gelu(f @ w1t, approximate=False) @ w2t

    def channel_att(y, w1t, w2t):
        avg = jnp.mean(y, axis=(2, 3))
        mx = jnp.max(y, axis=(2, 3))
        att = jax.nn.sigmoid(two_layer(avg, w1t, w2t) + two_layer(mx, w1t, w2t))
        return att[:, :, None, None] * y

    def spatial_att(y, w1t, w2t):
        mx = jnp.max(y, axis=(2, 3))
        att = two_layer(mx, w1t, w2t)          # no sigmoid (matches reference)
        return y * att[:, :, None, None]

    p1 = spatial_att(channel_att(dwconv3x3(x, p["w1_conv"]),
                                 p["ca1_w1"], p["ca1_w2"]),
                     p["sa1_w1"], p["sa1_w2"])
    p3 = spatial_att(channel_att(dwconv3x3(x, p["w3_conv"]),
                                 p["ca3_w1"], p["ca3_w2"]),
                     p["sa3_w1"], p["sa3_w2"])
    p2 = jnp.mean(x * p["wpw"][None, :, None, None], axis=(2, 3))
    h = jax.nn.relu(p2 @ p["mw1"] + p["mb1"])
    g = jax.nn.sigmoid(h @ p["mw2"] + p["mb2"])
    g1, g3 = g[:, :C], g[:, C:]
    return p1 * g1[:, :, None, None] + p3 * g3[:, :, None, None]


# ----------------------------------- main ------------------------------------ #

if __name__ == "__main__":
    B, C, H, W = 2, 32, 16, 16            # channels=32, chanfactor=4, depthwise
    key = jax.random.PRNGKey(0)
    kx, kp = jax.random.split(key)
    x = jax.random.normal(kx, (B, C, H, W), jnp.float32)
    params = init_params(kp, C)

    out = jax.jit(skm_forward)(x, params)
    out = jax.block_until_ready(out)

    ref = ref_forward(x, params)
    err = float(jnp.max(jnp.abs(out - ref)))
    assert out.shape == (B, C, H, W)
    assert err < 1e-4, f"max abs error vs reference: {err}"
    print("KERNEL_OK")
</pallas_src>

<mosaic_0001>
module attributes {stable_mosaic.version = 11 : i64} {
  func.func @_skm_kernel(%arg0: i32, %arg1: memref<1x32x256xf32, #tpu.memory_space<vmem>>, %arg2: memref<9x256xf32, #tpu.memory_space<vmem>>, %arg3: memref<32x43xf32, #tpu.memory_space<vmem>>, %arg4: memref<65x9xf32, #tpu.memory_space<vmem>>, %arg5: memref<1x32x256xf32, #tpu.memory_space<vmem>>) attributes {dimension_semantics = [#tpu.dimension_semantics<parallel>], iteration_bounds = array<i64: 2>, scalar_prefetch = 0 : i64, scratch_operands = 0 : i64, tpu.core_type = #tpu.core_type<tc>, window_params = [{transform_indices = @transform_0, window_bounds = array<i64: 1, 32, 256>}, {pipeline_mode = #tpu.pipeline_mode<synchronous>, transform_indices = @transform_1, window_bounds = array<i64: 9, 256>}, {pipeline_mode = #tpu.pipeline_mode<synchronous>, transform_indices = @transform_2, window_bounds = array<i64: 32, 43>}, {pipeline_mode = #tpu.pipeline_mode<synchronous>, transform_indices = @transform_3, window_bounds = array<i64: 65, 9>}, {transform_indices = @transform_4, window_bounds = array<i64: 1, 32, 256>}]} {
    %c0 = arith.constant 0 : index
    %c0_0 = arith.constant 0 : index
    %c0_1 = arith.constant 0 : index
    %0 = vector.load %arg1[%c0, %c0_0, %c0_1] : memref<1x32x256xf32, #tpu.memory_space<vmem>>, vector<1x32x256xf32>
    %1 = vector.shape_cast %0 : vector<1x32x256xf32> to vector<32x256xf32>
    %c0_2 = arith.constant 0 : index
    %c0_3 = arith.constant 0 : index
    %2 = vector.load %arg3[%c0_2, %c0_3] : memref<32x43xf32, #tpu.memory_space<vmem>>, vector<32x43xf32>
    %3 = vector.extract_strided_slice %2 {offsets = [0, 0], sizes = [32, 9], strides = [1, 1]} : vector<32x43xf32> to vector<32x9xf32>
    %4 = vector.extract_strided_slice %2 {offsets = [0, 9], sizes = [32, 9], strides = [1, 1]} : vector<32x43xf32> to vector<32x9xf32>
    %5 = vector.extract_strided_slice %2 {offsets = [0, 18], sizes = [32, 1], strides = [1, 1]} : vector<32x43xf32> to vector<32x1xf32>
    %6 = vector.extract_strided_slice %2 {offsets = [0, 19], sizes = [32, 2], strides = [1, 1]} : vector<32x43xf32> to vector<32x2xf32>
    %7 = vector.extract_strided_slice %2 {offsets = [0, 21], sizes = [32, 2], strides = [1, 1]} : vector<32x43xf32> to vector<32x2xf32>
    %8 = vector.extract_strided_slice %2 {offsets = [0, 23], sizes = [32, 2], strides = [1, 1]} : vector<32x43xf32> to vector<32x2xf32>
    %9 = vector.extract_strided_slice %2 {offsets = [0, 25], sizes = [32, 2], strides = [1, 1]} : vector<32x43xf32> to vector<32x2xf32>
    %10 = vector.extract_strided_slice %2 {offsets = [0, 27], sizes = [32, 2], strides = [1, 1]} : vector<32x43xf32> to vector<32x2xf32>
    %11 = vector.extract_strided_slice %2 {offsets = [0, 29], sizes = [32, 2], strides = [1, 1]} : vector<32x43xf32> to vector<32x2xf32>
    %12 = vector.extract_strided_slice %2 {offsets = [0, 31], sizes = [32, 2], strides = [1, 1]} : vector<32x43xf32> to vector<32x2xf32>
    %13 = vector.extract_strided_slice %2 {offsets = [0, 33], sizes = [32, 2], strides = [1, 1]} : vector<32x43xf32> to vector<32x2xf32>
    %14 = vector.extract_strided_slice %2 {offsets = [0, 35], sizes = [32, 8], strides = [1, 1]} : vector<32x43xf32> to vector<32x8xf32>
    %c0_4 = arith.constant 0 : index
    %c0_5 = arith.constant 0 : index
    %15 = vector.load %arg4[%c0_4, %c0_5] : memref<65x9xf32, #tpu.memory_space<vmem>>, vector<65x9xf32>
    %16 = vector.extract_strided_slice %15 {offsets = [0, 0], sizes = [64, 8], strides = [1, 1]} : vector<65x9xf32> to vector<64x8xf32>
    %17 = vector.extract_strided_slice %15 {offsets = [0, 8], sizes = [64, 1], strides = [1, 1]} : vector<65x9xf32> to vector<64x1xf32>
    %18 = vector.extract_strided_slice %15 {offsets = [64, 0], sizes = [1, 8], strides = [1, 1]} : vector<65x9xf32> to vector<1x8xf32>
    %19 = vector.shape_cast %5 : vector<32x1xf32> to vector<1x32x1xf32>
    %cst = arith.constant dense<0.000000e+00> : vector<32xf32>
    %20 = vector.multi_reduction <add>, %1, %cst [1] : vector<32x256xf32> to vector<32xf32>
    %21 = vector.shape_cast %20 : vector<32xf32> to vector<32x1xf32>
    %cst_6 = arith.constant 2.560000e+02 : f32
    %22 = vector.broadcast %cst_6 : f32 to vector<32x1xf32>
    %23 = arith.divf %21, %22 : vector<32x1xf32>
    %24 = vector.shape_cast %23 : vector<32x1xf32> to vector<1x32x1xf32>
    %25 = arith.mulf %19, %24 : vector<1x32x1xf32>
    %26 = vector.shape_cast %3 : vector<32x9xf32> to vector<1x32x9xf32>
    %27 = vector.shape_cast %26 : vector<1x32x9xf32> to vector<32x9xf32>
    %28 = vector.shape_cast %4 : vector<32x9xf32> to vector<1x32x9xf32>
    %29 = vector.shape_cast %28 : vector<1x32x9xf32> to vector<32x9xf32>
    %c0_7 = arith.constant 0 : index
    %c0_8 = arith.constant 0 : index
    %30 = vector.load %arg2[%c0_7, %c0_8] : memref<9x256xf32, #tpu.memory_space<vmem>>, vector<9x256xf32>
    %cst_9 = arith.constant 0.000000e+00 : f32
    %31 = vector.broadcast %cst_9 : f32 to vector<32x256xf32>
    %cst_10 = arith.constant 0.000000e+00 : f32
    %32 = vector.broadcast %cst_10 : f32 to vector<32x256xf32>
    %c17_i32 = arith.constant 17 : i32
    %33 = tpu.dynamic_rotate %1 by %c17_i32 dim 1 : vector<32x256xf32>, i32 -> vector<32x256xf32>
    %34 = vector.extract_strided_slice %30 {offsets = [0, 0], sizes = [1, 256], strides = [1, 1]} : vector<9x256xf32> to vector<1x256xf32>
    %35 = vector.broadcast %34 : vector<1x256xf32> to vector<32x256xf32>
    %36 = arith.mulf %33, %35 : vector<32x256xf32>
    %37 = vector.extract_strided_slice %27 {offsets = [0, 0], sizes = [32, 1], strides = [1, 1]} : vector<32x9xf32> to vector<32x1xf32>
    %38 = vector.broadcast %37 : vector<32x1xf32> to vector<32x256xf32>
    %39 = arith.mulf %36, %38 : vector<32x256xf32>
    %40 = arith.addf %31, %39 : vector<32x256xf32>
    %41 = vector.extract_strided_slice %29 {offsets = [0, 0], sizes = [32, 1], strides = [1, 1]} : vector<32x9xf32> to vector<32x1xf32>
    %42 = vector.broadcast %41 : vector<32x1xf32> to vector<32x256xf32>
    %43 = arith.mulf %36, %42 : vector<32x256xf32>
    %44 = arith.addf %32, %43 : vector<32x256xf32>
    %c16_i32 = arith.constant 16 : i32
    %45 = tpu.dynamic_rotate %1 by %c16_i32 dim 1 : vector<32x256xf32>, i32 -> vector<32x256xf32>
    %46 = vector.extract_strided_slice %30 {offsets = [1, 0], sizes = [1, 256], strides = [1, 1]} : vector<9x256xf32> to vector<1x256xf32>
    %47 = vector.broadcast %46 : vector<1x256xf32> to vector<32x256xf32>
    %48 = arith.mulf %45, %47 : vector<32x256xf32>
    %49 = vector.extract_strided_slice %27 {offsets = [0, 1], sizes = [32, 1], strides = [1, 1]} : vector<32x9xf32> to vector<32x1xf32>
    %50 = vector.broadcast %49 : vector<32x1xf32> to vector<32x256xf32>
    %51 = arith.mulf %48, %50 : vector<32x256xf32>
    %52 = arith.addf %40, %51 : vector<32x256xf32>
    %53 = vector.extract_strided_slice %29 {offsets = [0, 1], sizes = [32, 1], strides = [1, 1]} : vector<32x9xf32> to vector<32x1xf32>
    %54 = vector.broadcast %53 : vector<32x1xf32> to vector<32x256xf32>
    %55 = arith.mulf %48, %54 : vector<32x256xf32>
    %56 = arith.addf %44, %55 : vector<32x256xf32>
    %c15_i32 = arith.constant 15 : i32
    %57 = tpu.dynamic_rotate %1 by %c15_i32 dim 1 : vector<32x256xf32>, i32 -> vector<32x256xf32>
    %58 = vector.extract_strided_slice %30 {offsets = [2, 0], sizes = [1, 256], strides = [1, 1]} : vector<9x256xf32> to vector<1x256xf32>
    %59 = vector.broadcast %58 : vector<1x256xf32> to vector<32x256xf32>
    %60 = arith.mulf %57, %59 : vector<32x256xf32>
    %61 = vector.extract_strided_slice %27 {offsets = [0, 2], sizes = [32, 1], strides = [1, 1]} : vector<32x9xf32> to vector<32x1xf32>
    %62 = vector.broadcast %61 : vector<32x1xf32> to vector<32x256xf32>
    %63 = arith.mulf %60, %62 : vector<32x256xf32>
    %64 = arith.addf %52, %63 : vector<32x256xf32>
    %65 = vector.extract_strided_slice %29 {offsets = [0, 2], sizes = [32, 1], strides = [1, 1]} : vector<32x9xf32> to vector<32x1xf32>
    %66 = vector.broadcast %65 : vector<32x1xf32> to vector<32x256xf32>
    %67 = arith.mulf %60, %66 : vector<32x256xf32>
    %68 = arith.addf %56, %67 : vector<32x256xf32>
    %c1_i32 = arith.constant 1 : i32
    %69 = tpu.dynamic_rotate %1 by %c1_i32 dim 1 : vector<32x256xf32>, i32 -> vector<32x256xf32>
    %70 = vector.extract_strided_slice %30 {offsets = [3, 0], sizes = [1, 256], strides = [1, 1]} : vector<9x256xf32> to vector<1x256xf32>
    %71 = vector.broadcast %70 : vector<1x256xf32> to vector<32x256xf32>
    %72 = arith.mulf %69, %71 : vector<32x256xf32>
    %73 = vector.extract_strided_slice %27 {offsets = [0, 3], sizes = [32, 1], strides = [1, 1]} : vector<32x9xf32> to vector<32x1xf32>
    %74 = vector.broadcast %73 : vector<32x1xf32> to vector<32x256xf32>
    %75 = arith.mulf %72, %74 : vector<32x256xf32>
    %76 = arith.addf %64, %75 : vector<32x256xf32>
    %77 = vector.extract_strided_slice %29 {offsets = [0, 3], sizes = [32, 1], strides = [1, 1]} : vector<32x9xf32> to vector<32x1xf32>
    %78 = vector.broadcast %77 : vector<32x1xf32> to vector<32x256xf32>
    %79 = arith.mulf %72, %78 : vector<32x256xf32>
    %80 = arith.addf %68, %79 : vector<32x256xf32>
    %81 = vector.extract_strided_slice %27 {offsets = [0, 4], sizes = [32, 1], strides = [1, 1]} : vector<32x9xf32> to vector<32x1xf32>
    %82 = vector.broadcast %81 : vector<32x1xf32> to vector<32x256xf32>
    %83 = arith.mulf %1, %82 : vector<32x256xf32>
    %84 = arith.addf %76, %83 : vector<32x256xf32>
    %85 = vector.extract_strided_slice %29 {offsets = [0, 4], sizes = [32, 1], strides = [1, 1]} : vector<32x9xf32> to vector<32x1xf32>
    %86 = vector.broadcast %85 : vector<32x1xf32> to vector<32x256xf32>
    %87 = arith.mulf %1, %86 : vector<32x256xf32>
    %88 = arith.addf %80, %87 : vector<32x256xf32>
    %c255_i32 = arith.constant 255 : i32
    %89 = tpu.dynamic_rotate %1 by %c255_i32 dim 1 : vector<32x256xf32>, i32 -> vector<32x256xf32>
    %90 = vector.extract_strided_slice %30 {offsets = [5, 0], sizes = [1, 256], strides = [1, 1]} : vector<9x256xf32> to vector<1x256xf32>
    %91 = vector.broadcast %90 : vector<1x256xf32> to vector<32x256xf32>
    %92 = arith.mulf %89, %91 : vector<32x256xf32>
    %93 = vector.extract_strided_slice %27 {offsets = [0, 5], sizes = [32, 1], strides = [1, 1]} : vector<32x9xf32> to vector<32x1xf32>
    %94 = vector.broadcast %93 : vector<32x1xf32> to vector<32x256xf32>
    %95 = arith.mulf %92, %94 : vector<32x256xf32>
    %96 = arith.addf %84, %95 : vector<32x256xf32>
    %97 = vector.extract_strided_slice %29 {offsets = [0, 5], sizes = [32, 1], strides = [1, 1]} : vector<32x9xf32> to vector<32x1xf32>
    %98 = vector.broadcast %97 : vector<32x1xf32> to vector<32x256xf32>
    %99 = arith.mulf %92, %98 : vector<32x256xf32>
    %100 = arith.addf %88, %99 : vector<32x256xf32>
    %c241_i32 = arith.constant 241 : i32
    %101 = tpu.dynamic_rotate %1 by %c241_i32 dim 1 : vector<32x256xf32>, i32 -> vector<32x256xf32>
    %102 = vector.extract_strided_slice %30 {offsets = [6, 0], sizes = [1, 256], strides = [1, 1]} : vector<9x256xf32> to vector<1x256xf32>
    %103 = vector.broadcast %102 : vector<1x256xf32> to vector<32x256xf32>
    %104 = arith.mulf %101, %103 : vector<32x256xf32>
    %105 = vector.extract_strided_slice %27 {offsets = [0, 6], sizes = [32, 1], strides = [1, 1]} : vector<32x9xf32> to vector<32x1xf32>
    %106 = vector.broadcast %105 : vector<32x1xf32> to vector<32x256xf32>
    %107 = arith.mulf %104, %106 : vector<32x256xf32>
    %108 = arith.addf %96, %107 : vector<32x256xf32>
    %109 = vector.extract_strided_slice %29 {offsets = [0, 6], sizes = [32, 1], strides = [1, 1]} : vector<32x9xf32> to vector<32x1xf32>
    %110 = vector.broadcast %109 : vector<32x1xf32> to vector<32x256xf32>
    %111 = arith.mulf %104, %110 : vector<32x256xf32>
    %112 = arith.addf %100, %111 : vector<32x256xf32>
    %c240_i32 = arith.constant 240 : i32
    %113 = tpu.dynamic_rotate %1 by %c240_i32 dim 1 : vector<32x256xf32>, i32 -> vector<32x256xf32>
    %114 = vector.extract_strided_slice %30 {offsets = [7, 0], sizes = [1, 256], strides = [1, 1]} : vector<9x256xf32> to vector<1x256xf32>
    %115 = vector.broadcast %114 : vector<1x256xf32> to vector<32x256xf32>
    %116 = arith.mulf %113, %115 : vector<32x256xf32>
    %117 = vector.extract_strided_slice %27 {offsets = [0, 7], sizes = [32, 1], strides = [1, 1]} : vector<32x9xf32> to vector<32x1xf32>
    %118 = vector.broadcast %117 : vector<32x1xf32> to vector<32x256xf32>
    %119 = arith.mulf %116, %118 : vector<32x256xf32>
    %120 = arith.addf %108, %119 : vector<32x256xf32>
    %121 = vector.extract_strided_slice %29 {offsets = [0, 7], sizes = [32, 1], strides = [1, 1]} : vector<32x9xf32> to vector<32x1xf32>
    %122 = vector.broadcast %121 : vector<32x1xf32> to vector<32x256xf32>
    %123 = arith.mulf %116, %122 : vector<32x256xf32>
    %124 = arith.addf %112, %123 : vector<32x256xf32>
    %c239_i32 = arith.constant 239 : i32
    %125 = tpu.dynamic_rotate %1 by %c239_i32 dim 1 : vector<32x256xf32>, i32 -> vector<32x256xf32>
    %126 = vector.extract_strided_slice %30 {offsets = [8, 0], sizes = [1, 256], strides = [1, 1]} : vector<9x256xf32> to vector<1x256xf32>
    %127 = vector.broadcast %126 : vector<1x256xf32> to vector<32x256xf32>
    %128 = arith.mulf %125, %127 : vector<32x256xf32>
    %129 = vector.extract_strided_slice %27 {offsets = [0, 8], sizes = [32, 1], strides = [1, 1]} : vector<32x9xf32> to vector<32x1xf32>
    %130 = vector.broadcast %129 : vector<32x1xf32> to vector<32x256xf32>
    %131 = arith.mulf %128, %130 : vector<32x256xf32>
    %132 = arith.addf %120, %131 : vector<32x256xf32>
    %133 = vector.extract_strided_slice %29 {offsets = [0, 8], sizes = [32, 1], strides = [1, 1]} : vector<32x9xf32> to vector<32x1xf32>
    %134 = vector.broadcast %133 : vector<32x1xf32> to vector<32x256xf32>
    %135 = arith.mulf %128, %134 : vector<32x256xf32>
    %136 = arith.addf %124, %135 : vector<32x256xf32>
    %cst_11 = arith.constant dense<0.000000e+00> : vector<32xf32>
    %137 = vector.multi_reduction <add>, %132, %cst_11 [1] : vector<32x256xf32> to vector<32xf32>
    %138 = vector.shape_cast %137 : vector<32xf32> to vector<32x1xf32>
    %cst_12 = arith.constant 2.560000e+02 : f32
    %139 = vector.broadcast %cst_12 : f32 to vector<32x1xf32>
    %140 = arith.divf %138, %139 : vector<32x1xf32>
    %141 = vector.shape_cast %140 : vector<32x1xf32> to vector<1x32x1xf32>
    %cst_13 = arith.constant dense<0xFF800000> : vector<32xf32>
    %142 = vector.multi_reduction <maximumf>, %132, %cst_13 [1] : vector<32x256xf32> to vector<32xf32>
    %143 = vector.shape_cast %142 : vector<32xf32> to vector<32x1xf32>
    %144 = vector.shape_cast %143 : vector<32x1xf32> to vector<1x32x1xf32>
    %cst_14 = arith.constant dense<0.000000e+00> : vector<32xf32>
    %145 = vector.multi_reduction <add>, %136, %cst_14 [1] : vector<32x256xf32> to vector<32xf32>
    %146 = vector.shape_cast %145 : vector<32xf32> to vector<32x1xf32>
    %cst_15 = arith.constant 2.560000e+02 : f32
    %147 = vector.broadcast %cst_15 : f32 to vector<32x1xf32>
    %148 = arith.divf %146, %147 : vector<32x1xf32>
    %149 = vector.shape_cast %148 : vector<32x1xf32> to vector<1x32x1xf32>
    %cst_16 = arith.constant dense<0xFF800000> : vector<32xf32>
    %150 = vector.multi_reduction <maximumf>, %136, %cst_16 [1] : vector<32x256xf32> to vector<32xf32>
    %151 = vector.shape_cast %150 : vector<32xf32> to vector<32x1xf32>
    %152 = vector.shape_cast %151 : vector<32x1xf32> to vector<1x32x1xf32>
    %153 = vector.shape_cast %6 : vector<32x2xf32> to vector<1x32x2xf32>
    %154 = vector.broadcast %141 : vector<1x32x1xf32> to vector<1x32x2xf32>
    %155 = arith.mulf %154, %153 : vector<1x32x2xf32>
    %cst_17 = arith.constant dense<0.000000e+00> : vector<1x2xf32>
    %156 = vector.multi_reduction <add>, %155, %cst_17 [1] : vector<1x32x2xf32> to vector<1x2xf32>
    %157 = vector.shape_cast %156 : vector<1x2xf32> to vector<1x1x2xf32>
    %cst_18 = arith.constant 5.000000e-01 : f32
    %158 = vector.broadcast %cst_18 : f32 to vector<1x1x2xf32>
    %159 = arith.mulf %158, %157 : vector<1x1x2xf32>
    %cst_19 = arith.constant 0.707106769 : f32
    %160 = vector.broadcast %cst_19 : f32 to vector<1x1x2xf32>
    %161 = arith.mulf %157, %160 : vector<1x1x2xf32>
    %cst_20 = arith.constant 0.000000e+00 : f32
    %162 = vector.broadcast %cst_20 : f32 to vector<1x1x2xf32>
    %163 = arith.cmpf oge, %161, %162 : vector<1x1x2xf32>
    %cst_21 = arith.constant 1.000000e+00 : f32
    %cst_22 = arith.constant -1.000000e+00 : f32
    %164 = vector.broadcast %cst_21 : f32 to vector<1x1x2xf32>
    %165 = vector.broadcast %cst_22 : f32 to vector<1x1x2xf32>
    %166 = arith.select %163, %164, %165 : vector<1x1x2xi1>, vector<1x1x2xf32>
    %167 = math.absf %161 : vector<1x1x2xf32>
    %cst_23 = arith.constant 0.327591091 : f32
    %168 = vector.broadcast %cst_23 : f32 to vector<1x1x2xf32>
    %169 = arith.mulf %168, %167 : vector<1x1x2xf32>
    %cst_24 = arith.constant 1.000000e+00 : f32
    %170 = vector.broadcast %cst_24 : f32 to vector<1x1x2xf32>
    %171 = arith.addf %170, %169 : vector<1x1x2xf32>
    %cst_25 = arith.constant 1.000000e+00 : f32
    %172 = vector.broadcast %cst_25 : f32 to vector<1x1x2xf32>
    %173 = arith.divf %172, %171 : vector<1x1x2xf32>
    %cst_26 = arith.constant 1.06140542 : f32
    %174 = vector.broadcast %cst_26 : f32 to vector<1x1x2xf32>
    %175 = arith.mulf %174, %173 : vector<1x1x2xf32>
    %cst_27 = arith.constant -1.45315206 : f32
    %176 = vector.broadcast %cst_27 : f32 to vector<1x1x2xf32>
    %177 = arith.addf %175, %176 : vector<1x1x2xf32>
    %178 = arith.mulf %177, %173 : vector<1x1x2xf32>
    %cst_28 = arith.constant 1.42141378 : f32
    %179 = vector.broadcast %cst_28 : f32 to vector<1x1x2xf32>
    %180 = arith.addf %178, %179 : vector<1x1x2xf32>
    %181 = arith.mulf %180, %173 : vector<1x1x2xf32>
    %cst_29 = arith.constant -0.284496725 : f32
    %182 = vector.broadcast %cst_29 : f32 to vector<1x1x2xf32>
    %183 = arith.addf %181, %182 : vector<1x1x2xf32>
    %184 = arith.mulf %183, %173 : vector<1x1x2xf32>
    %cst_30 = arith.constant 0.254829586 : f32
    %185 = vector.broadcast %cst_30 : f32 to vector<1x1x2xf32>
    %186 = arith.addf %184, %185 : vector<1x1x2xf32>
    %187 = arith.mulf %186, %173 : vector<1x1x2xf32>
    %cst_31 = arith.constant 0.000000e+00 : f32
    %188 = vector.broadcast %cst_31 : f32 to vector<1x1x2xf32>
    %189 = arith.subf %188, %167 : vector<1x1x2xf32>
    %190 = arith.mulf %189, %167 : vector<1x1x2xf32>
    %191 = math.exp %190 : vector<1x1x2xf32>
    %192 = arith.mulf %187, %191 : vector<1x1x2xf32>
    %cst_32 = arith.constant 1.000000e+00 : f32
    %193 = vector.broadcast %cst_32 : f32 to vector<1x1x2xf32>
    %194 = arith.subf %193, %192 : vector<1x1x2xf32>
    %195 = arith.mulf %166, %194 : vector<1x1x2xf32>
    %cst_33 = arith.constant 1.000000e+00 : f32
    %196 = vector.broadcast %cst_33 : f32 to vector<1x1x2xf32>
    %197 = arith.addf %196, %195 : vector<1x1x2xf32>
    %198 = arith.mulf %159, %197 : vector<1x1x2xf32>
    %199 = vector.shape_cast %7 : vector<32x2xf32> to vector<1x32x2xf32>
    %200 = vector.broadcast %198 : vector<1x1x2xf32> to vector<1x32x2xf32>
    %201 = arith.mulf %199, %200 : vector<1x32x2xf32>
    %cst_34 = arith.constant dense<0.000000e+00> : vector<1x32xf32>
    %202 = vector.multi_reduction <add>, %201, %cst_34 [2] : vector<1x32x2xf32> to vector<1x32xf32>
    %203 = vector.shape_cast %202 : vector<1x32xf32> to vector<1x32x1xf32>
    %204 = vector.shape_cast %6 : vector<32x2xf32> to vector<1x32x2xf32>
    %205 = vector.broadcast %144 : vector<1x32x1xf32> to vector<1x32x2xf32>
    %206 = arith.mulf %205, %204 : vector<1x32x2xf32>
    %cst_35 = arith.constant dense<0.000000e+00> : vector<1x2xf32>
    %207 = vector.multi_reduction <add>, %206, %cst_35 [1] : vector<1x32x2xf32> to vector<1x2xf32>
    %208 = vector.shape_cast %207 : vector<1x2xf32> to vector<1x1x2xf32>
    %cst_36 = arith.constant 5.000000e-01 : f32
    %209 = vector.broadcast %cst_36 : f32 to vector<1x1x2xf32>
    %210 = arith.mulf %209, %208 : vector<1x1x2xf32>
    %cst_37 = arith.constant 0.707106769 : f32
    %211 = vector.broadcast %cst_37 : f32 to vector<1x1x2xf32>
    %212 = arith.mulf %208, %211 : vector<1x1x2xf32>
    %cst_38 = arith.constant 0.000000e+00 : f32
    %213 = vector.broadcast %cst_38 : f32 to vector<1x1x2xf32>
    %214 = arith.cmpf oge, %212, %213 : vector<1x1x2xf32>
    %cst_39 = arith.constant 1.000000e+00 : f32
    %cst_40 = arith.constant -1.000000e+00 : f32
    %215 = vector.broadcast %cst_39 : f32 to vector<1x1x2xf32>
    %216 = vector.broadcast %cst_40 : f32 to vector<1x1x2xf32>
    %217 = arith.select %214, %215, %216 : vector<1x1x2xi1>, vector<1x1x2xf32>
    %218 = math.absf %212 : vector<1x1x2xf32>
    %cst_41 = arith.constant 0.327591091 : f32
    %219 = vector.broadcast %cst_41 : f32 to vector<1x1x2xf32>
    %220 = arith.mulf %219, %218 : vector<1x1x2xf32>
    %cst_42 = arith.constant 1.000000e+00 : f32
    %221 = vector.broadcast %cst_42 : f32 to vector<1x1x2xf32>
    %222 = arith.addf %221, %220 : vector<1x1x2xf32>
    %cst_43 = arith.constant 1.000000e+00 : f32
    %223 = vector.broadcast %cst_43 : f32 to vector<1x1x2xf32>
    %224 = arith.divf %223, %222 : vector<1x1x2xf32>
    %cst_44 = arith.constant 1.06140542 : f32
    %225 = vector.broadcast %cst_44 : f32 to vector<1x1x2xf32>
    %226 = arith.mulf %225, %224 : vector<1x1x2xf32>
    %cst_45 = arith.constant -1.45315206 : f32
    %227 = vector.broadcast %cst_45 : f32 to vector<1x1x2xf32>
    %228 = arith.addf %226, %227 : vector<1x1x2xf32>
    %229 = arith.mulf %228, %224 : vector<1x1x2xf32>
    %cst_46 = arith.constant 1.42141378 : f32
    %230 = vector.broadcast %cst_46 : f32 to vector<1x1x2xf32>
    %231 = arith.addf %229, %230 : vector<1x1x2xf32>
    %232 = arith.mulf %231, %224 : vector<1x1x2xf32>
    %cst_47 = arith.constant -0.284496725 : f32
    %233 = vector.broadcast %cst_47 : f32 to vector<1x1x2xf32>
    %234 = arith.addf %232, %233 : vector<1x1x2xf32>
    %235 = arith.mulf %234, %224 : vector<1x1x2xf32>
    %cst_48 = arith.constant 0.254829586 : f32
    %236 = vector.broadcast %cst_48 : f32 to vector<1x1x2xf32>
    %237 = arith.addf %235, %236 : vector<1x1x2xf32>
    %238 = arith.mulf %237, %224 : vector<1x1x2xf32>
    %cst_49 = arith.constant 0.000000e+00 : f32
    %239 = vector.broadcast %cst_49 : f32 to vector<1x1x2xf32>
    %240 = arith.subf %239, %218 : vector<1x1x2xf32>
    %241 = arith.mulf %240, %218 : vector<1x1x2xf32>
    %242 = math.exp %241 : vector<1x1x2xf32>
    %243 = arith.mulf %238, %242 : vector<1x1x2xf32>
    %cst_50 = arith.constant 1.000000e+00 : f32
    %244 = vector.broadcast %cst_50 : f32 to vector<1x1x2xf32>
    %245 = arith.subf %244, %243 : vector<1x1x2xf32>
    %246 = arith.mulf %217, %245 : vector<1x1x2xf32>
    %cst_51 = arith.constant 1.000000e+00 : f32
    %247 = vector.broadcast %cst_51 : f32 to vector<1x1x2xf32>
    %248 = arith.addf %247, %246 : vector<1x1x2xf32>
    %249 = arith.mulf %210, %248 : vector<1x1x2xf32>
    %250 = vector.shape_cast %7 : vector<32x2xf32> to vector<1x32x2xf32>
    %251 = vector.broadcast %249 : vector<1x1x2xf32> to vector<1x32x2xf32>
    %252 = arith.mulf %250, %251 : vector<1x32x2xf32>
    %cst_52 = arith.constant dense<0.000000e+00> : vector<1x32xf32>
    %253 = vector.multi_reduction <add>, %252, %cst_52 [2] : vector<1x32x2xf32> to vector<1x32xf32>
    %254 = vector.shape_cast %253 : vector<1x32xf32> to vector<1x32x1xf32>
    %255 = arith.addf %203, %254 : vector<1x32x1xf32>
    %256 = arith.negf %255 : vector<1x32x1xf32>
    %257 = math.exp %256 : vector<1x32x1xf32>
    %cst_53 = arith.constant 1.000000e+00 : f32
    %258 = vector.broadcast %cst_53 : f32 to vector<1x32x1xf32>
    %259 = arith.addf %258, %257 : vector<1x32x1xf32>
    %260 = arith.divf %258, %259 : vector<1x32x1xf32>
    %261 = arith.mulf %260, %144 : vector<1x32x1xf32>
    %262 = vector.shape_cast %8 : vector<32x2xf32> to vector<1x32x2xf32>
    %263 = vector.broadcast %261 : vector<1x32x1xf32> to vector<1x32x2xf32>
    %264 = arith.mulf %263, %262 : vector<1x32x2xf32>
    %cst_54 = arith.constant dense<0.000000e+00> : vector<1x2xf32>
    %265 = vector.multi_reduction <add>, %264, %cst_54 [1] : vector<1x32x2xf32> to vector<1x2xf32>
    %266 = vector.shape_cast %265 : vector<1x2xf32> to vector<1x1x2xf32>
    %cst_55 = arith.constant 5.000000e-01 : f32
    %267 = vector.broadcast %cst_55 : f32 to vector<1x1x2xf32>
    %268 = arith.mulf %267, %266 : vector<1x1x2xf32>
    %cst_56 = arith.constant 0.707106769 : f32
    %269 = vector.broadcast %cst_56 : f32 to vector<1x1x2xf32>
    %270 = arith.mulf %266, %269 : vector<1x1x2xf32>
    %cst_57 = arith.constant 0.000000e+00 : f32
    %271 = vector.broadcast %cst_57 : f32 to vector<1x1x2xf32>
    %272 = arith.cmpf oge, %270, %271 : vector<1x1x2xf32>
    %cst_58 = arith.constant 1.000000e+00 : f32
    %cst_59 = arith.constant -1.000000e+00 : f32
    %273 = vector.broadcast %cst_58 : f32 to vector<1x1x2xf32>
    %274 = vector.broadcast %cst_59 : f32 to vector<1x1x2xf32>
    %275 = arith.select %272, %273, %274 : vector<1x1x2xi1>, vector<1x1x2xf32>
    %276 = math.absf %270 : vector<1x1x2xf32>
    %cst_60 = arith.constant 0.327591091 : f32
    %277 = vector.broadcast %cst_60 : f32 to vector<1x1x2xf32>
    %278 = arith.mulf %277, %276 : vector<1x1x2xf32>
    %cst_61 = arith.constant 1.000000e+00 : f32
    %279 = vector.broadcast %cst_61 : f32 to vector<1x1x2xf32>
    %280 = arith.addf %279, %278 : vector<1x1x2xf32>
    %cst_62 = arith.constant 1.000000e+00 : f32
    %281 = vector.broadcast %cst_62 : f32 to vector<1x1x2xf32>
    %282 = arith.divf %281, %280 : vector<1x1x2xf32>
    %cst_63 = arith.constant 1.06140542 : f32
    %283 = vector.broadcast %cst_63 : f32 to vector<1x1x2xf32>
    %284 = arith.mulf %283, %282 : vector<1x1x2xf32>
    %cst_64 = arith.constant -1.45315206 : f32
    %285 = vector.broadcast %cst_64 : f32 to vector<1x1x2xf32>
    %286 = arith.addf %284, %285 : vector<1x1x2xf32>
    %287 = arith.mulf %286, %282 : vector<1x1x2xf32>
    %cst_65 = arith.constant 1.42141378 : f32
    %288 = vector.broadcast %cst_65 : f32 to vector<1x1x2xf32>
    %289 = arith.addf %287, %288 : vector<1x1x2xf32>
    %290 = arith.mulf %289, %282 : vector<1x1x2xf32>
    %cst_66 = arith.constant -0.284496725 : f32
    %291 = vector.broadcast %cst_66 : f32 to vector<1x1x2xf32>
    %292 = arith.addf %290, %291 : vector<1x1x2xf32>
    %293 = arith.mulf %292, %282 : vector<1x1x2xf32>
    %cst_67 = arith.constant 0.254829586 : f32
    %294 = vector.broadcast %cst_67 : f32 to vector<1x1x2xf32>
    %295 = arith.addf %293, %294 : vector<1x1x2xf32>
    %296 = arith.mulf %295, %282 : vector<1x1x2xf32>
    %cst_68 = arith.constant 0.000000e+00 : f32
    %297 = vector.broadcast %cst_68 : f32 to vector<1x1x2xf32>
    %298 = arith.subf %297, %276 : vector<1x1x2xf32>
    %299 = arith.mulf %298, %276 : vector<1x1x2xf32>
    %300 = math.exp %299 : vector<1x1x2xf32>
    %301 = arith.mulf %296, %300 : vector<1x1x2xf32>
    %cst_69 = arith.constant 1.000000e+00 : f32
    %302 = vector.broadcast %cst_69 : f32 to vector<1x1x2xf32>
    %303 = arith.subf %302, %301 : vector<1x1x2xf32>
    %304 = arith.mulf %275, %303 : vector<1x1x2xf32>
    %cst_70 = arith.constant 1.000000e+00 : f32
    %305 = vector.broadcast %cst_70 : f32 to vector<1x1x2xf32>
    %306 = arith.addf %305, %304 : vector<1x1x2xf32>
    %307 = arith.mulf %268, %306 : vector<1x1x2xf32>
    %308 = vector.shape_cast %9 : vector<32x2xf32> to vector<1x32x2xf32>
    %309 = vector.broadcast %307 : vector<1x1x2xf32> to vector<1x32x2xf32>
    %310 = arith.mulf %308, %309 : vector<1x32x2xf32>
    %cst_71 = arith.constant dense<0.000000e+00> : vector<1x32xf32>
    %311 = vector.multi_reduction <add>, %310, %cst_71 [2] : vector<1x32x2xf32> to vector<1x32xf32>
    %312 = vector.shape_cast %311 : vector<1x32xf32> to vector<1x32x1xf32>
    %313 = arith.mulf %260, %312 : vector<1x32x1xf32>
    %314 = vector.shape_cast %10 : vector<32x2xf32> to vector<1x32x2xf32>
    %315 = vector.broadcast %149 : vector<1x32x1xf32> to vector<1x32x2xf32>
    %316 = arith.mulf %315, %314 : vector<1x32x2xf32>
    %cst_72 = arith.constant dense<0.000000e+00> : vector<1x2xf32>
    %317 = vector.multi_reduction <add>, %316, %cst_72 [1] : vector<1x32x2xf32> to vector<1x2xf32>
    %318 = vector.shape_cast %317 : vector<1x2xf32> to vector<1x1x2xf32>
    %cst_73 = arith.constant 5.000000e-01 : f32
    %319 = vector.broadcast %cst_73 : f32 to vector<1x1x2xf32>
    %320 = arith.mulf %319, %318 : vector<1x1x2xf32>
    %cst_74 = arith.constant 0.707106769 : f32
    %321 = vector.broadcast %cst_74 : f32 to vector<1x1x2xf32>
    %322 = arith.mulf %318, %321 : vector<1x1x2xf32>
    %cst_75 = arith.constant 0.000000e+00 : f32
    %323 = vector.broadcast %cst_75 : f32 to vector<1x1x2xf32>
    %324 = arith.cmpf oge, %322, %323 : vector<1x1x2xf32>
    %cst_76 = arith.constant 1.000000e+00 : f32
    %cst_77 = arith.constant -1.000000e+00 : f32
    %325 = vector.broadcast %cst_76 : f32 to vector<1x1x2xf32>
    %326 = vector.broadcast %cst_77 : f32 to vector<1x1x2xf32>
    %327 = arith.select %324, %325, %326 : vector<1x1x2xi1>, vector<1x1x2xf32>
    %328 = math.absf %322 : vector<1x1x2xf32>
    %cst_78 = arith.constant 0.327591091 : f32
    %329 = vector.broadcast %cst_78 : f32 to vector<1x1x2xf32>
    %330 = arith.mulf %329, %328 : vector<1x1x2xf32>
    %cst_79 = arith.constant 1.000000e+00 : f32
    %331 = vector.broadcast %cst_79 : f32 to vector<1x1x2xf32>
    %332 = arith.addf %331, %330 : vector<1x1x2xf32>
    %cst_80 = arith.constant 1.000000e+00 : f32
    %333 = vector.broadcast %cst_80 : f32 to vector<1x1x2xf32>
    %334 = arith.divf %333, %332 : vector<1x1x2xf32>
    %cst_81 = arith.constant 1.06140542 : f32
    %335 = vector.broadcast %cst_81 : f32 to vector<1x1x2xf32>
    %336 = arith.mulf %335, %334 : vector<1x1x2xf32>
    %cst_82 = arith.constant -1.45315206 : f32
    %337 = vector.broadcast %cst_82 : f32 to vector<1x1x2xf32>
    %338 = arith.addf %336, %337 : vector<1x1x2xf32>
    %339 = arith.mulf %338, %334 : vector<1x1x2xf32>
    %cst_83 = arith.constant 1.42141378 : f32
    %340 = vector.broadcast %cst_83 : f32 to vector<1x1x2xf32>
    %341 = arith.addf %339, %340 : vector<1x1x2xf32>
    %342 = arith.mulf %341, %334 : vector<1x1x2xf32>
    %cst_84 = arith.constant -0.284496725 : f32
    %343 = vector.broadcast %cst_84 : f32 to vector<1x1x2xf32>
    %344 = arith.addf %342, %343 : vector<1x1x2xf32>
    %345 = arith.mulf %344, %334 : vector<1x1x2xf32>
    %cst_85 = arith.constant 0.254829586 : f32
    %346 = vector.broadcast %cst_85 : f32 to vector<1x1x2xf32>
    %347 = arith.addf %345, %346 : vector<1x1x2xf32>
    %348 = arith.mulf %347, %334 : vector<1x1x2xf32>
    %cst_86 = arith.constant 0.000000e+00 : f32
    %349 = vector.broadcast %cst_86 : f32 to vector<1x1x2xf32>
    %350 = arith.subf %349, %328 : vector<1x1x2xf32>
    %351 = arith.mulf %350, %328 : vector<1x1x2xf32>
    %352 = math.exp %351 : vector<1x1x2xf32>
    %353 = arith.mulf %348, %352 : vector<1x1x2xf32>
    %cst_87 = arith.constant 1.000000e+00 : f32
    %354 = vector.broadcast %cst_87 : f32 to vector<1x1x2xf32>
    %355 = arith.subf %354, %353 : vector<1x1x2xf32>
    %356 = arith.mulf %327, %355 : vector<1x1x2xf32>
    %cst_88 = arith.constant 1.000000e+00 : f32
    %357 = vector.broadcast %cst_88 : f32 to vector<1x1x2xf32>
    %358 = arith.addf %357, %356 : vector<1x1x2xf32>
    %359 = arith.mulf %320, %358 : vector<1x1x2xf32>
    %360 = vector.shape_cast %11 : vector<32x2xf32> to vector<1x32x2xf32>
    %361 = vector.broadcast %359 : vector<1x1x2xf32> to vector<1x32x2xf32>
    %362 = arith.mulf %360, %361 : vector<1x32x2xf32>
    %cst_89 = arith.constant dense<0.000000e+00> : vector<1x32xf32>
    %363 = vector.multi_reduction <add>, %362, %cst_89 [2] : vector<1x32x2xf32> to vector<1x32xf32>
    %364 = vector.shape_cast %363 : vector<1x32xf32> to vector<1x32x1xf32>
    %365 = vector.shape_cast %10 : vector<32x2xf32> to vector<1x32x2xf32>
    %366 = vector.broadcast %152 : vector<1x32x1xf32> to vector<1x32x2xf32>
    %367 = arith.mulf %366, %365 : vector<1x32x2xf32>
    %cst_90 = arith.constant dense<0.000000e+00> : vector<1x2xf32>
    %368 = vector.multi_reduction <add>, %367, %cst_90 [1] : vector<1x32x2xf32> to vector<1x2xf32>
    %369 = vector.shape_cast %368 : vector<1x2xf32> to vector<1x1x2xf32>
    %cst_91 = arith.constant 5.000000e-01 : f32
    %370 = vector.broadcast %cst_91 : f32 to vector<1x1x2xf32>
    %371 = arith.mulf %370, %369 : vector<1x1x2xf32>
    %cst_92 = arith.constant 0.707106769 : f32
    %372 = vector.broadcast %cst_92 : f32 to vector<1x1x2xf32>
    %373 = arith.mulf %369, %372 : vector<1x1x2xf32>
    %cst_93 = arith.constant 0.000000e+00 : f32
    %374 = vector.broadcast %cst_93 : f32 to vector<1x1x2xf32>
    %375 = arith.cmpf oge, %373, %374 : vector<1x1x2xf32>
    %cst_94 = arith.constant 1.000000e+00 : f32
    %cst_95 = arith.constant -1.000000e+00 : f32
    %376 = vector.broadcast %cst_94 : f32 to vector<1x1x2xf32>
    %377 = vector.broadcast %cst_95 : f32 to vector<1x1x2xf32>
    %378 = arith.select %375, %376, %377 : vector<1x1x2xi1>, vector<1x1x2xf32>
    %379 = math.absf %373 : vector<1x1x2xf32>
    %cst_96 = arith.constant 0.327591091 : f32
    %380 = vector.broadcast %cst_96 : f32 to vector<1x1x2xf32>
    %381 = arith.mulf %380, %379 : vector<1x1x2xf32>
    %cst_97 = arith.constant 1.000000e+00 : f32
    %382 = vector.broadcast %cst_97 : f32 to vector<1x1x2xf32>
    %383 = arith.addf %382, %381 : vector<1x1x2xf32>
    %cst_98 = arith.constant 1.000000e+00 : f32
    %384 = vector.broadcast %cst_98 : f32 to vector<1x1x2xf32>
    %385 = arith.divf %384, %383 : vector<1x1x2xf32>
    %cst_99 = arith.constant 1.06140542 : f32
    %386 = vector.broadcast %cst_99 : f32 to vector<1x1x2xf32>
    %387 = arith.mulf %386, %385 : vector<1x1x2xf32>
    %cst_100 = arith.constant -1.45315206 : f32
    %388 = vector.broadcast %cst_100 : f32 to vector<1x1x2xf32>
    %389 = arith.addf %387, %388 : vector<1x1x2xf32>
    %390 = arith.mulf %389, %385 : vector<1x1x2xf32>
    %cst_101 = arith.constant 1.42141378 : f32
    %391 = vector.broadcast %cst_101 : f32 to vector<1x1x2xf32>
    %392 = arith.addf %390, %391 : vector<1x1x2xf32>
    %393 = arith.mulf %392, %385 : vector<1x1x2xf32>
    %cst_102 = arith.constant -0.284496725 : f32
    %394 = vector.broadcast %cst_102 : f32 to vector<1x1x2xf32>
    %395 = arith.addf %393, %394 : vector<1x1x2xf32>
    %396 = arith.mulf %395, %385 : vector<1x1x2xf32>
    %cst_103 = arith.constant 0.254829586 : f32
    %397 = vector.broadcast %cst_103 : f32 to vector<1x1x2xf32>
    %398 = arith.addf %396, %397 : vector<1x1x2xf32>
    %399 = arith.mulf %398, %385 : vector<1x1x2xf32>
    %cst_104 = arith.constant 0.000000e+00 : f32
    %400 = vector.broadcast %cst_104 : f32 to vector<1x1x2xf32>
    %401 = arith.subf %400, %379 : vector<1x1x2xf32>
    %402 = arith.mulf %401, %379 : vector<1x1x2xf32>
    %403 = math.exp %402 : vector<1x1x2xf32>
    %404 = arith.mulf %399, %403 : vector<1x1x2xf32>
    %cst_105 = arith.constant 1.000000e+00 : f32
    %405 = vector.broadcast %cst_105 : f32 to vector<1x1x2xf32>
    %406 = arith.subf %405, %404 : vector<1x1x2xf32>
    %407 = arith.mulf %378, %406 : vector<1x1x2xf32>
    %cst_106 = arith.constant 1.000000e+00 : f32
    %408 = vector.broadcast %cst_106 : f32 to vector<1x1x2xf32>
    %409 = arith.addf %408, %407 : vector<1x1x2xf32>
    %410 = arith.mulf %371, %409 : vector<1x1x2xf32>
    %411 = vector.shape_cast %11 : vector<32x2xf32> to vector<1x32x2xf32>
    %412 = vector.broadcast %410 : vector<1x1x2xf32> to vector<1x32x2xf32>
    %413 = arith.mulf %411, %412 : vector<1x32x2xf32>
    %cst_107 = arith.constant dense<0.000000e+00> : vector<1x32xf32>
    %414 = vector.multi_reduction <add>, %413, %cst_107 [2] : vector<1x32x2xf32> to vector<1x32xf32>
    %415 = vector.shape_cast %414 : vector<1x32xf32> to vector<1x32x1xf32>
    %416 = arith.addf %364, %415 : vector<1x32x1xf32>
    %417 = arith.negf %416 : vector<1x32x1xf32>
    %418 = math.exp %417 : vector<1x32x1xf32>
    %cst_108 = arith.constant 1.000000e+00 : f32
    %419 = vector.broadcast %cst_108 : f32 to vector<1x32x1xf32>
    %420 = arith.addf %419, %418 : vector<1x32x1xf32>
    %421 = arith.divf %419, %420 : vector<1x32x1xf32>
    %422 = arith.mulf %421, %152 : vector<1x32x1xf32>
    %423 = vector.shape_cast %12 : vector<32x2xf32> to vector<1x32x2xf32>
    %424 = vector.broadcast %422 : vector<1x32x1xf32> to vector<1x32x2xf32>
    %425 = arith.mulf %424, %423 : vector<1x32x2xf32>
    %cst_109 = arith.constant dense<0.000000e+00> : vector<1x2xf32>
    %426 = vector.multi_reduction <add>, %425, %cst_109 [1] : vector<1x32x2xf32> to vector<1x2xf32>
    %427 = vector.shape_cast %426 : vector<1x2xf32> to vector<1x1x2xf32>
    %cst_110 = arith.constant 5.000000e-01 : f32
    %428 = vector.broadcast %cst_110 : f32 to vector<1x1x2xf32>
    %429 = arith.mulf %428, %427 : vector<1x1x2xf32>
    %cst_111 = arith.constant 0.707106769 : f32
    %430 = vector.broadcast %cst_111 : f32 to vector<1x1x2xf32>
    %431 = arith.mulf %427, %430 : vector<1x1x2xf32>
    %cst_112 = arith.constant 0.000000e+00 : f32
    %432 = vector.broadcast %cst_112 : f32 to vector<1x1x2xf32>
    %433 = arith.cmpf oge, %431, %432 : vector<1x1x2xf32>
    %cst_113 = arith.constant 1.000000e+00 : f32
    %cst_114 = arith.constant -1.000000e+00 : f32
    %434 = vector.broadcast %cst_113 : f32 to vector<1x1x2xf32>
    %435 = vector.broadcast %cst_114 : f32 to vector<1x1x2xf32>
    %436 = arith.select %433, %434, %435 : vector<1x1x2xi1>, vector<1x1x2xf32>
    %437 = math.absf %431 : vector<1x1x2xf32>
    %cst_115 = arith.constant 0.327591091 : f32
    %438 = vector.broadcast %cst_115 : f32 to vector<1x1x2xf32>
    %439 = arith.mulf %438, %437 : vector<1x1x2xf32>
    %cst_116 = arith.constant 1.000000e+00 : f32
    %440 = vector.broadcast %cst_116 : f32 to vector<1x1x2xf32>
    %441 = arith.addf %440, %439 : vector<1x1x2xf32>
    %cst_117 = arith.constant 1.000000e+00 : f32
    %442 = vector.broadcast %cst_117 : f32 to vector<1x1x2xf32>
    %443 = arith.divf %442, %441 : vector<1x1x2xf32>
    %cst_118 = arith.constant 1.06140542 : f32
    %444 = vector.broadcast %cst_118 : f32 to vector<1x1x2xf32>
    %445 = arith.mulf %444, %443 : vector<1x1x2xf32>
    %cst_119 = arith.constant -1.45315206 : f32
    %446 = vector.broadcast %cst_119 : f32 to vector<1x1x2xf32>
    %447 = arith.addf %445, %446 : vector<1x1x2xf32>
    %448 = arith.mulf %447, %443 : vector<1x1x2xf32>
    %cst_120 = arith.constant 1.42141378 : f32
    %449 = vector.broadcast %cst_120 : f32 to vector<1x1x2xf32>
    %450 = arith.addf %448, %449 : vector<1x1x2xf32>
    %451 = arith.mulf %450, %443 : vector<1x1x2xf32>
    %cst_121 = arith.constant -0.284496725 : f32
    %452 = vector.broadcast %cst_121 : f32 to vector<1x1x2xf32>
    %453 = arith.addf %451, %452 : vector<1x1x2xf32>
    %454 = arith.mulf %453, %443 : vector<1x1x2xf32>
    %cst_122 = arith.constant 0.254829586 : f32
    %455 = vector.broadcast %cst_122 : f32 to vector<1x1x2xf32>
    %456 = arith.addf %454, %455 : vector<1x1x2xf32>
    %457 = arith.mulf %456, %443 : vector<1x1x2xf32>
    %cst_123 = arith.constant 0.000000e+00 : f32
    %458 = vector.broadcast %cst_123 : f32 to vector<1x1x2xf32>
    %459 = arith.subf %458, %437 : vector<1x1x2xf32>
    %460 = arith.mulf %459, %437 : vector<1x1x2xf32>
    %461 = math.exp %460 : vector<1x1x2xf32>
    %462 = arith.mulf %457, %461 : vector<1x1x2xf32>
    %cst_124 = arith.constant 1.000000e+00 : f32
    %463 = vector.broadcast %cst_124 : f32 to vector<1x1x2xf32>
    %464 = arith.subf %463, %462 : vector<1x1x2xf32>
    %465 = arith.mulf %436, %464 : vector<1x1x2xf32>
    %cst_125 = arith.constant 1.000000e+00 : f32
    %466 = vector.broadcast %cst_125 : f32 to vector<1x1x2xf32>
    %467 = arith.addf %466, %465 : vector<1x1x2xf32>
    %468 = arith.mulf %429, %467 : vector<1x1x2xf32>
    %469 = vector.shape_cast %13 : vector<32x2xf32> to vector<1x32x2xf32>
    %470 = vector.broadcast %468 : vector<1x1x2xf32> to vector<1x32x2xf32>
    %471 = arith.mulf %469, %470 : vector<1x32x2xf32>
    %cst_126 = arith.constant dense<0.000000e+00> : vector<1x32xf32>
    %472 = vector.multi_reduction <add>, %471, %cst_126 [2] : vector<1x32x2xf32> to vector<1x32xf32>
    %473 = vector.shape_cast %472 : vector<1x32xf32> to vector<1x32x1xf32>
    %474 = arith.mulf %421, %473 : vector<1x32x1xf32>
    %475 = vector.shape_cast %14 : vector<32x8xf32> to vector<1x32x8xf32>
    %476 = vector.broadcast %25 : vector<1x32x1xf32> to vector<1x32x8xf32>
    %477 = arith.mulf %476, %475 : vector<1x32x8xf32>
    %cst_127 = arith.constant dense<0.000000e+00> : vector<1x8xf32>
    %478 = vector.multi_reduction <add>, %477, %cst_127 [1] : vector<1x32x8xf32> to vector<1x8xf32>
    %479 = vector.shape_cast %478 : vector<1x8xf32> to vector<1x1x8xf32>
    %480 = vector.shape_cast %18 : vector<1x8xf32> to vector<1x1x8xf32>
    %481 = arith.addf %479, %480 : vector<1x1x8xf32>
    %cst_128 = arith.constant 0.000000e+00 : f32
    %482 = vector.broadcast %cst_128 : f32 to vector<1x1x8xf32>
    %483 = arith.maximumf %481, %482 : vector<1x1x8xf32>
    %484 = vector.shape_cast %16 : vector<64x8xf32> to vector<1x64x8xf32>
    %485 = vector.broadcast %483 : vector<1x1x8xf32> to vector<1x64x8xf32>
    %486 = arith.mulf %484, %485 : vector<1x64x8xf32>
    %cst_129 = arith.constant dense<0.000000e+00> : vector<1x64xf32>
    %487 = vector.multi_reduction <add>, %486, %cst_129 [2] : vector<1x64x8xf32> to vector<1x64xf32>
    %488 = vector.shape_cast %487 : vector<1x64xf32> to vector<1x64x1xf32>
    %489 = vector.shape_cast %17 : vector<64x1xf32> to vector<1x64x1xf32>
    %490 = arith.addf %488, %489 : vector<1x64x1xf32>
    %491 = arith.negf %490 : vector<1x64x1xf32>
    %492 = math.exp %491 : vector<1x64x1xf32>
    %cst_130 = arith.constant 1.000000e+00 : f32
    %493 = vector.broadcast %cst_130 : f32 to vector<1x64x1xf32>
    %494 = arith.addf %493, %492 : vector<1x64x1xf32>
    %495 = arith.divf %493, %494 : vector<1x64x1xf32>
    %496 = vector.extract_strided_slice %495 {offsets = [0, 0, 0], sizes = [1, 32, 1], strides = [1, 1, 1]} : vector<1x64x1xf32> to vector<1x32x1xf32>
    %497 = arith.mulf %313, %496 : vector<1x32x1xf32>
    %498 = vector.shape_cast %497 : vector<1x32x1xf32> to vector<32x1xf32>
    %499 = vector.extract_strided_slice %495 {offsets = [0, 32, 0], sizes = [1, 32, 1], strides = [1, 1, 1]} : vector<1x64x1xf32> to vector<1x32x1xf32>
    %500 = arith.mulf %474, %499 : vector<1x32x1xf32>
    %501 = vector.shape_cast %500 : vector<1x32x1xf32> to vector<32x1xf32>
    %502 = vector.broadcast %498 : vector<32x1xf32> to vector<32x256xf32>
    %503 = arith.mulf %132, %502 : vector<32x256xf32>
    %504 = vector.broadcast %501 : vector<32x1xf32> to vector<32x256xf32>
    %505 = arith.mulf %136, %504 : vector<32x256xf32>
    %506 = arith.addf %503, %505 : vector<32x256xf32>
    %507 = vector.shape_cast %506 : vector<32x256xf32> to vector<1x32x256xf32>
    %c0_131 = arith.constant 0 : index
    %c0_132 = arith.constant 0 : index
    %c0_133 = arith.constant 0 : index
    %508 = vector.load %arg5[%c0_131, %c0_132, %c0_133] : memref<1x32x256xf32, #tpu.memory_space<vmem>>, vector<1x32x256xf32>
    tpu.vector_store %arg5[%c0_131, %c0_132, %c0_133], %507 {strides = array<i32>} : memref<1x32x256xf32, #tpu.memory_space<vmem>>, vector<1x32x256xf32>,
    return
  }
  func.func @transform_0(%arg0: i32) -> (i32, i32, i32) {
    %c0_i32 = arith.constant 0 : i32
    %c0_i32_0 = arith.constant 0 : i32
    %c0_i32_1 = arith.constant 0 : i32
    return %arg0, %c0_i32, %c0_i32_0 : i32, i32, i32
  }
  func.func @transform_1(%arg0: i32) -> (i32, i32) {
    %c0_i32 = arith.constant 0 : i32
    %c0_i32_0 = arith.constant 0 : i32
    %c0_i32_1 = arith.constant 0 : i32
    return %c0_i32, %c0_i32_0 : i32, i32
  }
  func.func @transform_2(%arg0: i32) -> (i32, i32) {
    %c0_i32 = arith.constant 0 : i32
    %c0_i32_0 = arith.constant 0 : i32
    %c0_i32_1 = arith.constant 0 : i32
    return %c0_i32, %c0_i32_0 : i32, i32
  }
  func.func @transform_3(%arg0: i32) -> (i32, i32) {
    %c0_i32 = arith.constant 0 : i32
    %c0_i32_0 = arith.constant 0 : i32
    %c0_i32_1 = arith.constant 0 : i32
    return %c0_i32, %c0_i32_0 : i32, i32
  }
  func.func @transform_4(%arg0: i32) -> (i32, i32, i32) {
    %c0_i32 = arith.constant 0 : i32
    %c0_i32_0 = arith.constant 0 : i32
    %c0_i32_1 = arith.constant 0 : i32
    return %arg0, %c0_i32, %c0_i32_0 : i32, i32, i32
  }
}

</mosaic_0001>

<bundles_post_ra>
// kernel: skm_forward.1
= control target key start
LH: loop header
LB: loop body
LE: loop exit
PB: predicated region body
PF: predicated region fallthrough
CT: control target
= control target key end

     0   :  { %s2346_s15 = smov 0   ;;  %s3901_s0 = inlined_call_operand.vmem [shape: f32[2,32,256], index: 0, kind: input, shape index: {}]   ;;  %s3902_s1 = inlined_call_operand.vmem [shape: f32[9,256], index: 1, kind: input, shape index: {}]   ;;  %s3903_s2 = inlined_call_operand.vmem [shape: f32[32,43], index: 2, kind: input, shape index: {}]   ;;  %s3904_s3 = inlined_call_operand.vmem [shape: f32[65,9], index: 3, kind: input, shape index: {}]   ;;  %s3905_s4 = inlined_call_operand.vmem [shape: f32[2,32,256], index: 4, kind: output, shape index: {}]  }
   0x1 LB: > { %s2043_s16 = sadd.s32 4294967295, %s2284_s15   ;;  %p2047_p0 = scmp.ge.s32.totalorder %s2284_s15, 1  ;;  %s2284_s15 = sphi %s2346_s15, %s14_s15  }
   0x2   : > { %p162_p1 = scmp.lt.s32.totalorder %s2284_s15, 3 }
   0x4   : > { %p163_p2 = pnand %p2047_p0, %p162_p1 }
   0x6   : > { %166 = sbr.rel (%p163_p2) target bundleno = 1792 (0x700), region = 36 }
   0xd   : > { %p188_p3 = scmp.lt.s32.totalorder %s2043_s16, 1  ;;  %v2286_v0 = vmov 0   ;;  %s2287_s21 = smov 17   ;;  %v2406_v13 = vld [vmem:[%s3903_s2] sm:$0xff]  ;;  %v2412_v14 = vld [vmem:[%s3903_s2 + $0x8] sm:$0xff]  ;;  %v2418_v15 = vld [vmem:[%s3903_s2 + $0x18] sm:$0xff]  ;;  %v260_v29 = vlaneseq }
   0xe   : > { %2117 = vset.pattern.permute.xlu0 %v2286_v0  ;;  %2118 = vset.pattern.permute.xlu1 %v2286_v0  ;;  %v2424_v16 = vld [vmem:[%s3903_s2 + $0x10] sm:$0xff]  ;;  %v2288_v17 = vmov 9   ;;  %v2289_v18 = vmov 10   ;;  %v2290_v19 = vmov 2   ;;  %v2291_v20 = vmov 1   ;;  %s2292_s30 = smov 16  }
   0xf   : > { %s4191_s16 = smov (!%p188_p3, %s2043_s16), 1  ;;  %v2293_v21 = vmov 12   ;;  %v2294_v22 = vmov 11   ;;  %s2295_s5 = smov 15   ;;  %v2296_v23 = vmov 4   ;;  %v2297_v24 = vmov 3  }
  0x10   : > { %s2072_s17 = sshll.u32 %s4191_s16, 6  ;;  %s2298_s6 = smov 1   ;;  %v3915_v25 = vmov 14   ;;  %v2300_v26 = vmov 13   ;;  %v2502_v32 = vshrl.u32 %v260_v29, 7  ;;  %v3913_v35 = vmov 6  }
  0x11   : > { %s2362_s20 = scalar_lea.vmem %s3901_s0, %s2072_s17  ;;  %v2508_v36 = vand.u32 127, %v260_v29  ;;  %v2518_v39 = vld [vmem:[%s3902_s1] sm:$0xff]  ;;  %v2523_v40 = vld [vmem:[%s3902_s1 + $0x8] sm:$0xff]  ;;  %s2302_s11 = smov 127   ;;  %v2303_v46 = vmov 5   ;;  %v3906_v63 = vmov 16  }
  0x12   : > { %v2365_v1 = vld [vmem:[%s2362_s20 + $0x20] sm:$0xff]  ;;  %v2368_v2 = vld [vmem:[%s2362_s20 + $0x28] sm:$0xff]  ;;  %v2379_v6 = vld [vmem:[%s2362_s20 + $0x30] sm:$0xff]  ;;  %v2511_v37 = vsub.s32 0, %v2502_v32  ;;  %s2306_s12 = smov 113   ;;  %s2308_s13 = smov 112  }
  0x13   : > { %v2371_v3 = vld [vmem:[%s2362_s20] sm:$0xff]  ;;  %v225_v4 = vadd.f32 %v2368_v2, %v2365_v1  ;;  %v2376_v5 = vld [vmem:[%s2362_s20 + $0x8] sm:$0xff]  ;;  %v2382_v7 = vld [vmem:[%s2362_s20 + $0x38] sm:$0xff]  ;;  %vm262_vm0 = vcmp.lt.s32.totalorder %v2508_v36, 17  ;;  %vm371_vm1 = vcmp.lt.s32.totalorder %v2508_v36, 16  ;;  %s2311_s14 = smov 111  }
  0x14   : > { %v219_v8 = vadd.f32 %v2376_v5, %v2371_v3  ;;  %v2387_v9 = vld [vmem:[%s2362_s20 + $0x10] sm:$0xff]  ;;  %v2390_v10 = vld [vmem:[%s2362_s20 + $0x18] sm:$0xff]  ;;  %v228_v11 = vadd.f32 %v2382_v7, %v2379_v6  ;;  %4012 = vst [vmem:[#allocation6_spill] sm:$0xff] %v2511_v37  ;;  %v2531_v42 = vrot.slane %v2518_v39, %v2511_v37  ;;  %v2535_v43 = vrot.slane %v2523_v40, %v2511_v37  ;;  %s2317_s9 = smov 35   ;;  %s2318_s10 = smov 93  }
  0x15   : > { %226 = vadd.xlane.f32.xlu1 %v225_v4  ;;  %v222_v12 = vadd.f32 %v2390_v10, %v2387_v9  ;;  %vm581_vm2 = vcmp.lt.s32.totalorder %v2508_v36, 1  ;;  %vm476_vm3 = vcmp.lt.s32.totalorder %v2508_v36, 15  ;;  %vm750_vm4 = vcmp.lt.s32.totalorder %v2508_v36, 127  ;;  %s2320_s19 = smov 95  }
  0x16   : > { %220 = vadd.xlane.f32.xlu0 %v219_v8  ;;  %v3912_v8 = vmov 15   ;;  %vm960_vm5 = vcmp.lt.s32.totalorder %v2508_v36, 112  ;;  %vm1065_vm6 = vcmp.lt.s32.totalorder %v2508_v36, 111  ;;  %vm855_vm7 = vcmp.lt.s32.totalorder %v2508_v36, 113 }
  0x17   : > { %vm1214_vm8 = vcmask 171160   ;;  %vm1493_vm9 = vcmask 236760   ;;  %vm1279_vm14 = vcmask 15360   ;;  %vm1408_vm15 = vcmask 203960  }
  0x19   : > { %229 = vadd.xlane.f32.xlu1 %v228_v11 }
  0x1a   : > { %223 = vadd.xlane.f32.xlu0 %v222_v12 }
  0x2a   : > { %246 = vrot.lane.b32.xlu1 %v2387_v9, %s2287_s21 }
  0x2e   : > { %248 = vrot.lane.b32.xlu1 %v2365_v1, %s2287_s21 }
  0x30   : > { %244 = vrot.lane.b32.xlu0 %v2371_v3, %s2287_s21 }
  0x32   : > { %250 = vrot.lane.b32.xlu1 %v2379_v6, %s2287_s21 }
  0x34   : > { %252 = vrot.lane.b32.xlu0 %v2376_v5, %s2287_s21 }
  0x36   : > { %254 = vrot.lane.b32.xlu1 %v2390_v10, %s2287_s21 }
  0x38   : > { %256 = vrot.lane.b32.xlu0 %v2368_v2, %s2287_s21 }
  0x3a   : > { %258 = vrot.lane.b32.xlu1 %v2382_v7, %s2287_s21 }
  0x3c   : > { %289 = vperm.xlu0 %2117, %v2406_v13  }
  0x3e   : > { %294 = vperm.xlu1 %2118, %v2412_v14  }
  0x40   : > { %304 = vperm.xlu0 %2117, %v2418_v15  }
  0x42   : > { %299 = vperm.xlu1 %2118, %v2424_v16  }
  0x44   : > { %2120 = vset.pattern.permute.xlu0 %v2288_v17 }
  0x45   : > { %328 = vperm.xlu0 %2120, %v2412_v14  }
  0x46   : > { %2119 = vset.pattern.permute.xlu1 %v2288_v17 }
  0x47   : > { %324 = vperm.xlu1 %2119, %v2406_v13  }
  0x49   : > { %2123 = vset.pattern.permute.xlu0 %v2289_v18 }
  0x4a   : > { %433 = vperm.xlu0 %2123, %v2412_v14  }
  0x4b   : > { %332 = vperm.xlu1 %2119, %v2424_v16  }
  0x4e   : > { %2126 = vset.pattern.permute.xlu0 %v2290_v19 }
  0x4f   : > { %502 = vperm.xlu0 %2126, %v2406_v13   ;;  %336 = vperm.xlu1 %2119, %v2418_v15  }
  0x53   : > { %2127 = vset.pattern.permute.xlu0 %v2291_v20  ;;  %2121 = vset.pattern.permute.xlu1 %v2291_v20 }
  0x54   : > { %397 = vperm.xlu0 %2127, %v2406_v13   ;;  %401 = vperm.xlu1 %2121, %v2412_v14  }
  0x58   : > { %363 = vrot.lane.b32.xlu0 %v2376_v5, %s2292_s30  ;;  %2122 = vset.pattern.permute.xlu1 %v2289_v18 }
  0x59   : > { %429 = vperm.xlu1 %2122, %v2406_v13  }
  0x5c   : > { %409 = vperm.xlu0 %2127, %v2418_v15  }
  0x5d   : > { %2124 = vset.pattern.permute.xlu1 %v2291_v20 }
  0x5e   : > { %405 = vperm.xlu1 %2124, %v2424_v16  }
  0x60   : > { %2133 = vset.pattern.permute.xlu0 %v2293_v21 }
  0x61   : > { %639 = vperm.xlu0 %2133, %v2406_v13  }
  0x62   : > { %2125 = vset.pattern.permute.xlu1 %v2289_v18 }
  0x63   : > { %437 = vperm.xlu1 %2125, %v2424_v16  }
  0x65   : > { %2134 = vset.pattern.permute.xlu0 %v2294_v22 }
  0x66   : > { %538 = vperm.xlu0 %2134, %v2412_v14  }
  0x67   : > { %2128 = vset.pattern.permute.xlu1 %v2290_v19 }
  0x68   : > { %506 = vperm.xlu1 %2128, %v2412_v14  }
  0x6a   : > { %542 = vperm.xlu0 %2134, %v2424_v16  }
  0x6c   : > { %2129 = vset.pattern.permute.xlu1 %v2294_v22 }
  0x6d   : > { %534 = vperm.xlu1 %2129, %v2406_v13  }
  0x6e   : > { %367 = vrot.lane.b32.xlu0 %v2368_v2, %s2292_s30 }
  0x71   : > { %355 = vrot.lane.b32.xlu1 %v2371_v3, %s2292_s30 }
  0x72   : > { %462 = vrot.lane.b32.xlu0 %v2387_v9, %s2295_s5  ;;  %2130 = vset.pattern.permute.xlu1 %v2289_v18 }
  0x75   : > { %357 = vrot.lane.b32.xlu1 %v2387_v9, %s2292_s30 }
  0x76   : > { %470 = vrot.lane.b32.xlu0 %v2390_v10, %s2295_s5 }
  0x79   : > { %365 = vrot.lane.b32.xlu1 %v2390_v10, %s2292_s30 }
  0x7a   : > { %546 = vperm.xlu0 %2134, %v2418_v15  }
  0x7d   : > { %441 = vperm.xlu1 %2130, %v2418_v15  }
  0x7e   : > { %2139 = vset.pattern.permute.xlu0 %v2296_v23 }
  0x7f   : > { %671 = vperm.xlu0 %2139, %v2406_v13  }
  0x81   : > { %2131 = vset.pattern.permute.xlu1 %v2290_v19 }
  0x82   : > { %510 = vperm.xlu1 %2131, %v2424_v16  }
  0x83   : > { %464 = vrot.lane.b32.xlu0 %v2365_v1, %s2295_s5 }
  0x84   : > { %2142 = vset.pattern.permute.xlu0 %v2297_v24 }
  0x86   : > { %2132 = vset.pattern.permute.xlu1 %v2297_v24 }
  0x87   : > { %565 = vrot.lane.b32.xlu0 %v2371_v3, %s2298_s6  ;;  %607 = vperm.xlu1 %2132, %v2406_v13  }
  0x8b   : > { %573 = vrot.lane.b32.xlu0 %v2376_v5, %s2298_s6  ;;  %611 = vperm.xlu1 %2132, %v2412_v14  }
  0x8f   : > { %619 = vperm.xlu0 %2142, %v2418_v15   ;;  %2135 = vset.pattern.permute.xlu1 %v2293_v21 }
  0x90   : > { %643 = vperm.xlu1 %2135, %v2412_v14  }
  0x93   : > { %2146 = vset.pattern.permute.xlu0 %v3915_v25 }
  0x94   : > { %808 = vperm.xlu0 %2146, %v2406_v13   ;;  %359 = vrot.lane.b32.xlu1 %v2365_v1, %s2292_s30 }
  0x95   : > { %2136 = vset.pattern.permute.xlu1 %v2290_v19 }
  0x98   : > { %2147 = vset.pattern.permute.xlu0 %v2300_v26  ;;  %460 = vrot.lane.b32.xlu1 %v2371_v3, %s2295_s5 }
  0x99   : > { %707 = vperm.xlu0 %2147, %v2412_v14  }
  0x9c   : > { %468 = vrot.lane.b32.xlu1 %v2376_v5, %s2295_s5 }
  0x9d   : > { %711 = vperm.xlu0 %2147, %v2424_v16  }
  0xa0   : > { %514 = vperm.xlu1 %2136, %v2418_v15  }
  0xa1   : > { %474 = vrot.lane.b32.xlu0 %v2382_v7, %s2295_s5 }
  0xa2   : > { %v2489_v27 = vpop.xlane.xlu1 %226 }
  0xa3   : > { %4008 = vst [vmem:[#allocation2_spill] sm:$0xff] %v2489_v27  ;;  %v2491_v28 = vpop.xlane.xlu0 %220 }
  0xa4   : > { %4009 = vst [vmem:[#allocation3_spill] sm:$0xff] %v2491_v28  ;;  %2137 = vset.pattern.permute.xlu1 %v2297_v24 }
  0xa5   : > { %577 = vrot.lane.b32.xlu0 %v2368_v2, %s2298_s6  ;;  %615 = vperm.xlu1 %2137, %v2424_v16  }
  0xa6   : > { %v2496_v30 = vpop.xlane.xlu1 %229 }
  0xa7   : > { %4010 = vst [vmem:[#allocation4_spill] sm:$0xff] %v2496_v30  ;;  %v2498_v31 = vpop.xlane.xlu0 %223 }
  0xa8   : > { %4011 = vst [vmem:[#allocation5_spill] sm:$0xff] %v2498_v31 }
  0xa9   : > { %715 = vperm.xlu0 %2147, %v2418_v15   ;;  %2138 = vset.pattern.permute.xlu1 %v2293_v21 }
  0xaa   : > { %v247_v33 = vpop.permute.xlu1 %246  ;;  %647 = vperm.xlu1 %2138, %v2424_v16  }
  0xab   : > { %v2505_v34 = vpop.permute.xlu0 %244 }
  0xad   : > { %2152 = vset.pattern.permute.xlu0 %v3913_v35 }
  0xae   : > { %881 = vperm.xlu0 %2152, %v2406_v13   ;;  %v249_v38 = vpop.permute.xlu1 %248  ;;  %2140 = vset.pattern.permute.xlu1 %v2296_v23 }
  0xaf   : > { %v2525_v41 = vpop.permute.xlu0 %252  ;;  %675 = vperm.xlu1 %2140, %v2412_v14  }
  0xb2   : > { %v251_v44 = vpop.permute.xlu1 %250  ;;  %734 = vrot.lane.b32.xlu0 %v2371_v3, %s2302_s11 }
  0xb3   : > { %v257_v45 = vpop.permute.xlu0 %256  ;;  %2141 = vset.pattern.permute.xlu1 %v2300_v26  ;;  %2155 = vset.pattern.permute.xlu0 %v2303_v46 }
  0xb4   : > { %v265_v47 = vsel %vm262_vm0, %v249_v38, %v257_v45  ;;  %v269_v48 = vsel %vm262_vm0, %v257_v45, %v249_v38  ;;  %703 = vperm.xlu1 %2141, %v2406_v13   ;;  %v3910_v38 = vmov 7  }
  0xb5   : > { %v2546_v49 = vmul.f32 %v2531_v42, %v269_v48  ;;  %v2549_v50 = vmul.f32 %v2535_v43, %v265_v47 }
  0xb6   : > { %v255_v51 = vpop.permute.xlu1 %254  ;;  %742 = vrot.lane.b32.xlu0 %v2376_v5, %s2302_s11 }
  0xb7   : > { %4013 = vst [vmem:[#allocation7_spill] sm:$0xff] %v2546_v49  ;;  %4014 = vst [vmem:[#allocation8_spill] sm:$0xff] %v2549_v50  ;;  %v264_v52 = vsel %vm262_vm0, %v247_v33, %v255_v51  ;;  %v268_v53 = vsel %vm262_vm0, %v255_v51, %v247_v33 }
  0xb8   : > { %v2558_v54 = vmul.f32 %v2531_v42, %v268_v53  ;;  %v2561_v55 = vmul.f32 %v2535_v43, %v264_v52  ;;  %361 = vrot.lane.b32.xlu1 %v2379_v6, %s2292_s30  ;;  %v382_v52 = vsub.s32 1, %v2502_v32 }
  0xb9   : > { %2143 = vset.pattern.permute.xlu1 %v2293_v21 }
  0xba   : > { %v259_v56 = vpop.permute.xlu1 %258  ;;  %788 = vperm.xlu0 %2155, %v2418_v15  }
  0xbb   : > { %v266_v57 = vsel %vm262_vm0, %v251_v44, %v259_v56  ;;  %v270_v58 = vsel %vm262_vm0, %v259_v56, %v251_v44  ;;  %v2571_v59 = vpop.permute.xlu0 %289  ;;  %v263_v56 = vsel %vm262_vm0, %v2505_v34, %v2525_v41 }
  0xbc   : > { %v2574_v60 = vmul.f32 %v2531_v42, %v270_v58  ;;  %v2577_v61 = vmul.f32 %v2535_v43, %v266_v57  ;;  %369 = vrot.lane.b32.xlu1 %v2382_v7, %s2292_s30  ;;  %v267_v57 = vsel %vm262_vm0, %v2525_v41, %v2505_v34  ;;  %s2313_s30 = smov 2   ;;  %vm1686_vm0 = vcmask 269560  }
  0xbe   : > { %4015 = vst [vmem:[#allocation9_spill] sm:$0xff] %v2577_v61  ;;  %v2581_v62 = vpop.permute.xlu1 %294  ;;  %2159 = vset.pattern.permute.xlu0 %v3906_v63  ;;  %v2674_v63 = vrot.slane %v2518_v39, %v382_v52  ;;  %v4048_v61 = vmov 16  }
  0xbf   : > { %v2584_v0 = vpop.permute.xlu0 %304  ;;  %1018 = vperm.xlu0 %2159, %v2406_v13  }
  0xc0   : > { %472 = vrot.lane.b32.xlu1 %v2368_v2, %s2295_s5 }
  0xc2   : > { %v2589_v4 = vpop.permute.xlu1 %299 }
  0xc3   : > { %4016 = vst [vmem:[#allocation10_spill] sm:$0xff] %v2589_v4  ;;  %2160 = vset.pattern.permute.xlu0 %v3912_v8  ;;  %v2684_v8 = vmul.f32 %v2535_v43, %v263_v56 }
  0xc4   : > { %567 = vrot.lane.b32.xlu1 %v2387_v9, %s2298_s6  ;;  %917 = vperm.xlu0 %2160, %v2412_v14   ;;  %v2595_v11 = vpop.permute.xlu0 %328 }
  0xc5   : > { %4017 = vst [vmem:[#allocation11_spill] sm:$0xff] %v2595_v11  ;;  %v4042_v11 = vmov 7  }
  0xc6   : > { %v2597_v12 = vpop.permute.xlu1 %324 }
  0xc8   : > { %575 = vrot.lane.b32.xlu1 %v2390_v10, %s2298_s6  ;;  %921 = vperm.xlu0 %2160, %v2424_v16  }
  0xc9   : > { %v2602_v17 = vpop.permute.xlu0 %433 }
  0xca   : > { %4018 = vst [vmem:[#allocation12_spill] sm:$0xff] %v2602_v17  ;;  %v2604_v18 = vpop.permute.xlu1 %332 }
  0xcb   : > { %4019 = vst [vmem:[#allocation13_spill] sm:$0xff] %v2604_v18 }
  0xcc   : > { %651 = vperm.xlu1 %2143, %v2418_v15   ;;  %746 = vrot.lane.b32.xlu0 %v2368_v2, %s2302_s11 }
  0xce   : > { %v2609_v19 = vpop.permute.xlu1 %336  ;;  %v2611_v20 = vpop.permute.xlu0 %502 }
  0xcf   : > { %4020 = vst [vmem:[#allocation14_spill] sm:$0xff] %v2609_v19 }
  0xd0   : > { %2144 = vset.pattern.permute.xlu1 %v2296_v23  ;;  %841 = vrot.lane.b32.xlu0 %v2387_v9, %s2306_s12 }
  0xd1   : > { %679 = vperm.xlu1 %2144, %v2424_v16  }
  0xd3   : > { %v2617_v21 = vpop.permute.xlu1 %401  ;;  %v2619_v22 = vpop.permute.xlu0 %397 }
  0xd4   : > { %4021 = vst [vmem:[#allocation15_spill] sm:$0xff] %v2617_v21  ;;  %849 = vrot.lane.b32.xlu0 %v2390_v10, %s2306_s12 }
  0xd5   : > { %2145 = vset.pattern.permute.xlu1 %v2303_v46 }
  0xd6   : > { %776 = vperm.xlu1 %2145, %v2406_v13  }
  0xd7   : > { %v364_v24 = vpop.permute.xlu0 %363 }
  0xd8   : > { %v430_v26 = vpop.permute.xlu1 %429  ;;  %925 = vperm.xlu0 %2160, %v2418_v15  }
  0xda   : > { %780 = vperm.xlu1 %2145, %v2412_v14  }
  0xdb   : > { %v2627_v29 = vpop.permute.xlu0 %409 }
  0xdc   : > { %4022 = vst [vmem:[#allocation16_spill] sm:$0xff] %v2627_v29  ;;  %843 = vrot.lane.b32.xlu0 %v2365_v1, %s2306_s12 }
  0xdd   : > { %v2631_v33 = vpop.permute.xlu1 %405  ;;  %2167 = vset.pattern.permute.xlu0 %v3910_v38  ;;  %v2681_v38 = vmul.f32 %v2531_v42, %v267_v57  ;;  %v4028_v57 = vmov 14  }
  0xde   : > { %4023 = vst [vmem:[#allocation17_spill] sm:$0xff] %v2631_v33  ;;  %2148 = vset.pattern.permute.xlu1 %v3915_v25 }
  0xdf   : > { %812 = vperm.xlu1 %2148, %v2412_v14   ;;  %v339_v43 = vmul.f32 %v2597_v12, %v2681_v38 }
  0xe0   : > { %v2636_v44 = vpop.permute.xlu0 %639  ;;  %944 = vrot.lane.b32.xlu0 %v2371_v3, %s2308_s13 }
  0xe2   : > { %v2640_v45 = vpop.permute.xlu1 %437 }
  0xe3   : > { %4024 = vst [vmem:[#allocation18_spill] sm:$0xff] %v2640_v45  ;;  %466 = vrot.lane.b32.xlu1 %v2379_v6, %s2295_s5  ;;  %s2314_s5 = smov 107  }
  0xe4   : > { %2149 = vset.pattern.permute.xlu1 %v2296_v23  ;;  %952 = vrot.lane.b32.xlu0 %v2376_v5, %s2308_s13  ;;  %v3908_v23 = vmov 17  }
  0xe5   : > { %v2647_v47 = vpop.permute.xlu0 %538 }
  0xe6   : > { %4025 = vst [vmem:[#allocation19_spill] sm:$0xff] %v2647_v47 }
  0xe7   : > { %v2649_v48 = vpop.permute.xlu1 %506  ;;  %569 = vrot.lane.b32.xlu1 %v2365_v1, %s2298_s6 }
  0xe8   : > { %4026 = vst [vmem:[#allocation20_spill] sm:$0xff] %v2649_v48  ;;  %998 = vperm.xlu0 %2167, %v2418_v15  }
  0xe9   : > { %v2654_v51 = vpop.permute.xlu0 %542 }
  0xea   : > { %4027 = vst [vmem:[#allocation21_spill] sm:$0xff] %v2654_v51 }
  0xeb   : > { %683 = vperm.xlu1 %2149, %v2418_v15  }
  0xec   : > { %v2658_v53 = vpop.permute.xlu1 %534  ;;  %2168 = vset.pattern.permute.xlu0 %v3908_v23  ;;  %v2677_v23 = vrot.slane %v2523_v40, %v382_v52  ;;  %v340_v52 = vmul.f32 %v2597_v12, %v2684_v8 }
  0xed   : > { %v2669_v58 = vpop.permute.xlu0 %367  ;;  %1127 = vperm.xlu0 %2168, %v2412_v14  }
  0xef   : > { %2150 = vset.pattern.permute.xlu1 %v2303_v46 }
  0xf0   : > { %784 = vperm.xlu1 %2150, %v2424_v16   ;;  %v356_v34 = vpop.permute.xlu1 %355 }
  0xf1   : > { %v372_v41 = vsel %vm371_vm1, %v356_v34, %v364_v24  ;;  %v376_v35 = vsel %vm371_vm1, %v364_v24, %v356_v34  ;;  %v2691_v25 = vpop.permute.xlu0 %462  ;;  %1131 = vperm.xlu0 %2168, %v2424_v16  }
  0xf2   : > { %v2695_v46 = vmul.f32 %v2674_v63, %v376_v35  ;;  %v2698_v42 = vmul.f32 %v2677_v23, %v372_v41  ;;  %v3918_v35 = vmov 8  }
  0xf4   : > { %v444_v56 = vmul.f32 %v430_v26, %v2695_v46  ;;  %v445_v24 = vmul.f32 %v430_v26, %v2698_v42  ;;  %2151 = vset.pattern.permute.xlu1 %v4028_v57  ;;  %v2707_v34 = vpop.permute.xlu1 %357  ;;  %v4029_v26 = vmov 6  }
  0xf5   : > { %v2709_v37 = vpop.permute.xlu0 %470  ;;  %816 = vperm.xlu1 %2151, %v2424_v16   ;;  %2171 = vset.pattern.permute.xlu0 %v3918_v35 }
  0xf6   : > { %v2713_v41 = vadd.f32 %v444_v56, %v339_v43  ;;  %v2715_v30 = vadd.f32 %v445_v24, %v340_v52  ;;  %1091 = vperm.xlu0 %2171, %v2406_v13   ;;  %v4032_v43 = vmov 15  }
  0xf8   : > { %v2718_v12 = vpop.permute.xlu1 %365 }
  0xf9   : > { %2153 = vset.pattern.permute.xlu1 %v4029_v26  ;;  %v2721_v31 = vpop.permute.xlu0 %546 }
  0xfa   : > { %4030 = vst [vmem:[#allocation22_spill] sm:$0xff] %v2721_v31  ;;  %885 = vperm.xlu1 %2153, %v2412_v14   ;;  %948 = vrot.lane.b32.xlu0 %v2365_v1, %s2308_s13 }
  0xfc   : > { %v2726_v27 = vpop.permute.xlu1 %441 }
  0xfd   : > { %4031 = vst [vmem:[#allocation23_spill] sm:$0xff] %v2726_v27 }
  0xfe   : > { %v2728_v35 = vpop.permute.xlu0 %671  ;;  %2154 = vset.pattern.permute.xlu1 %v4032_v43  ;;  %1049 = vrot.lane.b32.xlu0 %v2371_v3, %s2311_s14 }
  0xff   : > { %913 = vperm.xlu1 %2154, %v2406_v13  }
 0x101   : > { %v2734_v52 = vpop.permute.xlu1 %510 }
 0x102   : > { %4033 = vst [vmem:[#allocation24_spill] sm:$0xff] %v2734_v52  ;;  %v2736_v56 = vpop.permute.xlu0 %464  ;;  %1057 = vrot.lane.b32.xlu0 %v2376_v5, %s2311_s14 }
 0x103   : > { %4034 = vst [vmem:[#allocation25_spill] sm:$0xff] %v2736_v56  ;;  %571 = vrot.lane.b32.xlu1 %v2379_v6, %s2298_s6 }
 0x104   : > { %2156 = vset.pattern.permute.xlu1 %v4028_v57 }
 0x106   : > { %v566_v24 = vpop.permute.xlu0 %565  ;;  %v2743_v43 = vpop.permute.xlu1 %607  ;;  %1103 = vperm.xlu0 %2171, %v2418_v15  }
 0x107   : > { %579 = vrot.lane.b32.xlu1 %v2382_v7, %s2298_s6  ;;  %s2315_s6 = smov 99  }
 0x10a   : > { %v574_v28 = vpop.permute.xlu0 %573  ;;  %v2748_v31 = vpop.permute.xlu1 %611  ;;  %958 = vrot.lane.b32.xlu0 %v2382_v7, %s2308_s13 }
 0x10b   : > { %4035 = vst [vmem:[#allocation26_spill] sm:$0xff] %v2748_v31  ;;  %736 = vrot.lane.b32.xlu1 %v2387_v9, %s2302_s11  ;;  %v592_v31 = vsub.s32 3, %v2502_v32  ;;  %v582_v33 = vsel %vm581_vm2, %v566_v24, %v574_v28  ;;  %v586_v47 = vsel %vm581_vm2, %v574_v28, %v566_v24 }
 0x10d   : > { %v2777_v56 = vrot.slane %v2518_v39, %v592_v31  ;;  %v2780_v45 = vrot.slane %v2523_v40, %v592_v31 }
 0x10e   : > { %v2754_v57 = vpop.permute.xlu0 %619  ;;  %1061 = vrot.lane.b32.xlu0 %v2368_v2, %s2311_s14 }
 0x10f   : > { %4036 = vst [vmem:[#allocation27_spill] sm:$0xff] %v2754_v57  ;;  %744 = vrot.lane.b32.xlu1 %v2390_v10, %s2302_s11  ;;  %v2758_v51 = vpop.permute.xlu1 %643  ;;  %v487_v57 = vsub.s32 2, %v2502_v32  ;;  %4039 = vst [vmem:[#allocation30_spill] sm:$0xff] %v2777_v56  ;;  %v2801_v28 = vmul.f32 %v2777_v56, %v586_v47  ;;  %v2804_v24 = vmul.f32 %v2780_v45, %v582_v33 }
 0x110   : > { %4037 = vst [vmem:[#allocation28_spill] sm:$0xff] %v2758_v51  ;;  %4040 = vst [vmem:[#allocation31_spill] sm:$0xff] %v2780_v45 }
 0x111   : > { %v2788_v48 = vrot.slane %v2518_v39, %v487_v57  ;;  %v2791_v19 = vrot.slane %v2523_v40, %v487_v57 }
 0x112   : > { %1063 = vrot.lane.b32.xlu0 %v2382_v7, %s2311_s14 }
 0x113   : > { %820 = vperm.xlu1 %2156, %v2418_v15   ;;  %v2763_v52 = vpop.permute.xlu1 %359  ;;  %v2765_v27 = vpop.permute.xlu0 %808  ;;  %4041 = vst [vmem:[#allocation32_spill] sm:$0xff] %v2791_v19 }
 0x117   : > { %2157 = vset.pattern.permute.xlu1 %v4029_v26  ;;  %v461_v51 = vpop.permute.xlu1 %460 }
 0x118   : > { %889 = vperm.xlu1 %2157, %v2424_v16   ;;  %v2774_v29 = vpop.permute.xlu0 %707 }
 0x119   : > { %4038 = vst [vmem:[#allocation29_spill] sm:$0xff] %v2774_v29 }
 0x11b   : > { %v469_v29 = vpop.permute.xlu1 %468 }
 0x11c   : > { %v477_v18 = vsel %vm476_vm3, %v461_v51, %v469_v29  ;;  %v481_v31 = vsel %vm476_vm3, %v469_v29, %v461_v51  ;;  %2158 = vset.pattern.permute.xlu1 %v4042_v11  ;;  %v2798_v17 = vpop.permute.xlu0 %711  ;;  %v654_v29 = vmul.f32 %v2636_v44, %v2801_v28  ;;  %v655_v51 = vmul.f32 %v2636_v44, %v2804_v24 }
 0x11d   : > { %4043 = vst [vmem:[#allocation33_spill] sm:$0xff] %v2798_v17  ;;  %v2807_v57 = vmul.f32 %v2788_v48, %v481_v31  ;;  %v2810_v50 = vmul.f32 %v2791_v19, %v477_v18  ;;  %986 = vperm.xlu1 %2158, %v2406_v13  }
 0x11f   : > { %v549_v47 = vmul.f32 %v2658_v53, %v2807_v57  ;;  %v550_v33 = vmul.f32 %v2658_v53, %v2810_v50  ;;  %v2821_v17 = vpop.permute.xlu1 %514 }
 0x120   : > { %4044 = vst [vmem:[#allocation34_spill] sm:$0xff] %v2821_v17  ;;  %v2823_v31 = vpop.permute.xlu0 %474 }
 0x121   : > { %4045 = vst [vmem:[#allocation35_spill] sm:$0xff] %v2823_v31  ;;  %v557_v18 = vadd.f32 %v549_v47, %v2713_v41  ;;  %v558_v45 = vadd.f32 %v550_v33, %v2715_v30  ;;  %990 = vperm.xlu1 %2158, %v2412_v14   ;;  %v761_v41 = vsub.s32 5, %v2502_v32 }
 0x123   : > { %v662_v56 = vadd.f32 %v654_v29, %v557_v18  ;;  %v663_v4 = vadd.f32 %v655_v51, %v558_v45  ;;  %v2852_v47 = vrot.slane %v2518_v39, %v761_v41 }
 0x124   : > { %v2828_v49 = vpop.permute.xlu1 %615  ;;  %v2830_v44 = vpop.permute.xlu0 %577 }
 0x125   : > { %4046 = vst [vmem:[#allocation36_spill] sm:$0xff] %v2828_v49  ;;  %4047 = vst [vmem:[#allocation37_spill] sm:$0xff] %v2830_v44  ;;  %2161 = vset.pattern.permute.xlu1 %v4048_v61 }
 0x126   : > { %1022 = vperm.xlu1 %2161, %v2412_v14   ;;  %4052 = vst [vmem:[#allocation41_spill] sm:$0xff] %v2852_v47 }
 0x128   : > { %v2834_v53 = vpop.permute.xlu0 %715 }
 0x129   : > { %4049 = vst [vmem:[#allocation38_spill] sm:$0xff] %v2834_v53  ;;  %v2836_v17 = vpop.permute.xlu1 %647 }
 0x12a   : > { %4050 = vst [vmem:[#allocation39_spill] sm:$0xff] %v2836_v17  ;;  %738 = vrot.lane.b32.xlu1 %v2365_v1, %s2302_s11 }
 0x12b   : > { %2162 = vset.pattern.permute.xlu1 %v4029_v26  ;;  %v2855_v26 = vrot.slane %v2523_v40, %v761_v41 }
 0x12d   : > { %v2841_v30 = vpop.permute.xlu0 %881  ;;  %4053 = vst [vmem:[#allocation42_spill] sm:$0xff] %v2855_v26 }
 0x12e   : > { %839 = vrot.lane.b32.xlu1 %v2371_v3, %s2306_s12  ;;  %v2845_v45 = vpop.permute.xlu1 %675 }
 0x12f   : > { %4051 = vst [vmem:[#allocation40_spill] sm:$0xff] %v2845_v45 }
 0x131   : > { %v735_v29 = vpop.permute.xlu0 %734 }
 0x132   : > { %847 = vrot.lane.b32.xlu1 %v2376_v5, %s2306_s12 }
 0x133   : > { %v704_v51 = vpop.permute.xlu1 %703 }
 0x134   : > { %v718_v33 = vmul.f32 %v704_v51, %v2371_v3  ;;  %v719_v18 = vmul.f32 %v704_v51, %v2376_v5 }
 0x135   : > { %v743_v17 = vpop.permute.xlu0 %742 }
 0x136   : > { %v751_v49 = vsel %vm750_vm4, %v735_v29, %v743_v17  ;;  %v755_v44 = vsel %vm750_vm4, %v743_v17, %v735_v29  ;;  %893 = vperm.xlu1 %2162, %v2418_v15   ;;  %v726_v53 = vadd.f32 %v718_v33, %v662_v56  ;;  %v727_v21 = vadd.f32 %v719_v18, %v663_v4 }
 0x137   : > { %v2865_v31 = vmul.f32 %v2852_v47, %v751_v49  ;;  %v2868_v45 = vmul.f32 %v2855_v26, %v755_v44  ;;  %v2870_v41 = vpop.permute.xlu1 %361  ;;  %v4054_v44 = vmov 8  }
 0x139   : > { %v823_v51 = vmul.f32 %v2765_v27, %v2865_v31  ;;  %v824_v19 = vmul.f32 %v2765_v27, %v2868_v45 }
 0x13a   : > { %2163 = vset.pattern.permute.xlu1 %v4042_v11  ;;  %v2894_v11 = vpop.permute.xlu0 %788 }
 0x13b   : > { %v2877_v17 = vadd.f32 %v823_v51, %v726_v53  ;;  %v2879_v29 = vadd.f32 %v824_v19, %v727_v21  ;;  %994 = vperm.xlu1 %2163, %v2424_v16   ;;  %v2882_v49 = vpop.permute.xlu1 %369  ;;  %4055 = vst [vmem:[#allocation43_spill] sm:$0xff] %v2894_v11  ;;  %v4056_v19 = vmov 17  }
 0x13e   : > { %v2902_v53 = vpop.permute.xlu0 %1018 }
 0x13f   : > { %2164 = vset.pattern.permute.xlu1 %v4048_v61  ;;  %v2885_v56 = vpop.permute.xlu1 %472 }
 0x140   : > { %1026 = vperm.xlu1 %2164, %v2424_v16  }
 0x143   : > { %v2888_v4 = vpop.permute.xlu1 %567 }
 0x144   : > { %2165 = vset.pattern.permute.xlu1 %v4054_v44 }
 0x145   : > { %1095 = vperm.xlu1 %2165, %v2412_v14   ;;  %v2909_v14 = vpop.permute.xlu0 %917 }
 0x146   : > { %4059 = vst [vmem:[#allocation46_spill] sm:$0xff] %v2909_v14 }
 0x147   : > { %v2892_v27 = vpop.permute.xlu1 %575 }
 0x149   : > { %2166 = vset.pattern.permute.xlu1 %v4056_v19  ;;  %v2919_v51 = vpop.permute.xlu0 %921 }
 0x14a   : > { %1123 = vperm.xlu1 %2166, %v2406_v13   ;;  %4061 = vst [vmem:[#allocation48_spill] sm:$0xff] %v2919_v51 }
 0x14b   : > { %v2898_v21 = vpop.permute.xlu1 %651 }
 0x14c   : > { %4057 = vst [vmem:[#allocation44_spill] sm:$0xff] %v2898_v21 }
 0x14d   : > { %v2925_v11 = vpop.permute.xlu0 %746 }
 0x14e   : > { %740 = vrot.lane.b32.xlu1 %v2379_v6, %s2302_s11  ;;  %4063 = vst [vmem:[#allocation50_spill] sm:$0xff] %v2925_v11 }
 0x14f   : > { %2169 = vset.pattern.permute.xlu1 %v4048_v61 }
 0x150   : > { %v2905_v33 = vpop.permute.xlu1 %679 }
 0x151   : > { %4058 = vst [vmem:[#allocation45_spill] sm:$0xff] %v2905_v33 }
 0x152   : > { %748 = vrot.lane.b32.xlu1 %v2382_v7, %s2302_s11  ;;  %s2319_s11 = smov 103  }
 0x155   : > { %v2911_v18 = vpop.permute.xlu1 %776 }
 0x156   : > { %851 = vrot.lane.b32.xlu1 %v2368_v2, %s2306_s12 }
 0x159   : > { %v2915_v13 = vpop.permute.xlu1 %780 }
 0x15a   : > { %4060 = vst [vmem:[#allocation47_spill] sm:$0xff] %v2915_v13  ;;  %946 = vrot.lane.b32.xlu1 %v2387_v9, %s2308_s13  ;;  %v2933_v13 = vpop.permute.xlu0 %841 }
 0x15b   : > { %4064 = vst [vmem:[#allocation51_spill] sm:$0xff] %v2933_v13 }
 0x15e   : > { %954 = vrot.lane.b32.xlu1 %v2390_v10, %s2308_s13  ;;  %v2923_v61 = vpop.permute.xlu1 %812 }
 0x15f   : > { %4062 = vst [vmem:[#allocation49_spill] sm:$0xff] %v2923_v61  ;;  %v2940_v61 = vpop.permute.xlu0 %849 }
 0x162   : > { %1030 = vperm.xlu1 %2169, %v2418_v15   ;;  %v2928_v21 = vpop.permute.xlu1 %466 }
 0x166   : > { %2170 = vset.pattern.permute.xlu1 %v4054_v44  ;;  %v2931_v26 = vpop.permute.xlu1 %569  ;;  %v2947_v44 = vpop.permute.xlu0 %925 }
 0x167   : > { %1099 = vperm.xlu1 %2170, %v2424_v16   ;;  %4067 = vst [vmem:[#allocation54_spill] sm:$0xff] %v2947_v44 }
 0x16a   : > { %v2936_v51 = vpop.permute.xlu1 %683 }
 0x16b   : > { %4065 = vst [vmem:[#allocation52_spill] sm:$0xff] %v2936_v51  ;;  %845 = vrot.lane.b32.xlu1 %v2379_v6, %s2306_s12  ;;  %v2953_v51 = vpop.permute.xlu0 %843 }
 0x16c   : > { %2172 = vset.pattern.permute.xlu1 %v4056_v19  ;;  %4069 = vst [vmem:[#allocation56_spill] sm:$0xff] %v2953_v51 }
 0x16f   : > { %853 = vrot.lane.b32.xlu1 %v2382_v7, %s2306_s12  ;;  %v2945_v11 = vpop.permute.xlu1 %784  ;;  %v945_v7 = vpop.permute.xlu0 %944 }
 0x170   : > { %4066 = vst [vmem:[#allocation53_spill] sm:$0xff] %v2945_v11 }
 0x173   : > { %956 = vrot.lane.b32.xlu1 %v2368_v2, %s2308_s13  ;;  %v953_v2 = vpop.permute.xlu0 %952 }
 0x174   : > { %v2951_v16 = vpop.permute.xlu1 %816 }
 0x175   : > { %4068 = vst [vmem:[#allocation55_spill] sm:$0xff] %v2951_v16 }
 0x177   : > { %1051 = vrot.lane.b32.xlu1 %v2387_v9, %s2311_s14  ;;  %v2972_v9 = vpop.permute.xlu0 %998 }
 0x178   : > { %4073 = vst [vmem:[#allocation60_spill] sm:$0xff] %v2972_v9 }
 0x179   : > { %v2957_v47 = vpop.permute.xlu1 %885 }
 0x17a   : > { %4070 = vst [vmem:[#allocation57_spill] sm:$0xff] %v2957_v47 }
 0x17b   : > { %1059 = vrot.lane.b32.xlu1 %v2390_v10, %s2311_s14 }
 0x17e   : > { %v2961_v19 = vpop.permute.xlu1 %913 }
 0x17f   : > { %1135 = vperm.xlu1 %2172, %v2418_v15   ;;  %v2980_v15 = vpop.permute.xlu0 %1127 }
 0x180   : > { %4076 = vst [vmem:[#allocation63_spill] sm:$0xff] %v2980_v15  ;;  %v517_v15 = vmul.f32 %v2611_v20, %v2807_v57 }
 0x182   : > { %v2964_v44 = vpop.permute.xlu1 %571 }
 0x183   : > { %4071 = vst [vmem:[#allocation58_spill] sm:$0xff] %v2964_v44  ;;  %950 = vrot.lane.b32.xlu1 %v2379_v6, %s2308_s13  ;;  %v2984_v47 = vpop.permute.xlu0 %1131 }
 0x184   : > { %4078 = vst [vmem:[#allocation65_spill] sm:$0xff] %v2984_v47  ;;  %v413_v47 = vmul.f32 %v2619_v22, %v2698_v42  ;;  %v866_v42 = vsub.s32 6, %v2502_v32 }
 0x186   : > { %v2968_v51 = vpop.permute.xlu1 %579 }
 0x187   : > { %4072 = vst [vmem:[#allocation59_spill] sm:$0xff] %v2968_v51  ;;  %1053 = vrot.lane.b32.xlu1 %v2365_v1, %s2311_s14  ;;  %v2988_v44 = vpop.permute.xlu0 %1091 }
 0x18a   : > { %v2974_v16 = vpop.permute.xlu1 %736 }
 0x18b   : > { %4074 = vst [vmem:[#allocation61_spill] sm:$0xff] %v2974_v16  ;;  %1055 = vrot.lane.b32.xlu1 %v2379_v6, %s2311_s14  ;;  %v2992_v9 = vpop.permute.xlu0 %948  ;;  %v307_v6 = vmul.f32 %v2571_v59, %v2681_v38  ;;  %v308_v16 = vmul.f32 %v2571_v59, %v2684_v8  ;;  %v971_v59 = vsub.s32 7, %v2502_v32  ;;  %v3036_v32 = vld [vmem:[%s3902_s1 + $0x10] ss:$0 sm:$0xff]  ;;  %s3876_s14 = scalar_lea.vmem %s3905_s4, %s2072_s17 }
 0x18c   : > { %4081 = vst [vmem:[#allocation68_spill] sm:$0xff] %v2992_v9  ;;  %4083 = vst [vmem:[#allocation70_spill] sm:$0xff] %v3036_v32 }
 0x18d   : > { %v421_v38 = vadd.f32 %v413_v47, %v308_v16  ;;  %v792_v16 = vmul.f32 %v2911_v18, %v2868_v45 }
 0x18e   : > { %v2978_v10 = vpop.permute.xlu1 %744 }
 0x18f   : > { %4075 = vst [vmem:[#allocation62_spill] sm:$0xff] %v2978_v10  ;;  %v1050_v9 = vpop.permute.xlu0 %1049 }
 0x192   : > { %v2982_v11 = vpop.permute.xlu1 %820 }
 0x193   : > { %4077 = vst [vmem:[#allocation64_spill] sm:$0xff] %v2982_v11  ;;  %v412_v11 = vmul.f32 %v2619_v22, %v2695_v46  ;;  %v622_v22 = vmul.f32 %v2743_v43, %v2801_v28  ;;  %v623_v46 = vmul.f32 %v2743_v43, %v2804_v24  ;;  %v1058_v57 = vpop.permute.xlu0 %1057  ;;  %v3023_v28 = vrot.slane %v2518_v39, %v971_v59 }
 0x194   : > { %v3026_v43 = vrot.slane %v2523_v40, %v971_v59 }
 0x195   : > { %v420_v10 = vadd.f32 %v412_v11, %v307_v6 }
 0x197   : > { %v2986_v14 = vpop.permute.xlu1 %889  ;;  %v525_v33 = vadd.f32 %v517_v15, %v420_v10 }
 0x198   : > { %4079 = vst [vmem:[#allocation66_spill] sm:$0xff] %v2986_v14  ;;  %v518_v14 = vmul.f32 %v2611_v20, %v2810_v50  ;;  %v686_v50 = vmul.f32 %v2728_v35, %v2371_v3  ;;  %v687_v20 = vmul.f32 %v2728_v35, %v2376_v5  ;;  %v961_v3 = vsel %vm960_vm5, %v945_v7, %v953_v2  ;;  %v3041_v35 = vld [vmem:[%s3902_s1 + $0x18] ss:$0 sm:$0xff] }
 0x199   : > { %v630_v47 = vadd.f32 %v622_v22, %v525_v33  ;;  %v965_v5 = vsel %vm960_vm5, %v953_v2, %v945_v7  ;;  %4084 = vst [vmem:[#allocation71_spill] sm:$0xff] %v3041_v35  ;;  %v1066_v33 = vsel %vm1065_vm6, %v1050_v9, %v1058_v57  ;;  %v3052_v7 = vrot.slane %v2518_v39, %v866_v42 }
 0x19a   : > { %v526_v13 = vadd.f32 %v518_v14, %v421_v38  ;;  %v1070_v14 = vsel %vm1065_vm6, %v1058_v57, %v1050_v9  ;;  %v3055_v2 = vrot.slane %v2523_v40, %v866_v42  ;;  %v977_v6 = vmul.f32 %v3023_v28, %v961_v3 }
 0x19b   : > { %v694_v10 = vadd.f32 %v686_v50, %v630_v47  ;;  %v978_v38 = vmul.f32 %v3026_v43, %v965_v5  ;;  %v3064_v45 = vmul.f32 %v3036_v32, %v1066_v33  ;;  %v3067_v39 = vmul.f32 %v3041_v35, %v1070_v14  ;;  %v4123_v35 = vld [vmem:[#allocation28_spill] sm:$0xff] }
 0x19c   : > { %v987_v1 = vpop.permute.xlu1 %986  ;;  %v631_v11 = vadd.f32 %v623_v46, %v526_v13  ;;  %v791_v13 = vmul.f32 %v2911_v18, %v2865_v31  ;;  %v1033_v50 = vmul.f32 %v2902_v53, %v977_v6 }
 0x19d   : > { %4085 = vst [vmem:[#allocation72_spill] sm:$0xff] %v3067_v39  ;;  %v1001_v3 = vmul.f32 %v987_v1, %v977_v6  ;;  %v1002_v5 = vmul.f32 %v987_v1, %v978_v38  ;;  %v1106_v33 = vmul.f32 %v2988_v44, %v3064_v45  ;;  %v1107_v14 = vmul.f32 %v2988_v44, %v3067_v39 }
 0x19e   : > { %v695_v15 = vadd.f32 %v687_v20, %v631_v11  ;;  %v799_v22 = vadd.f32 %v791_v13, %v694_v10  ;;  %v1034_v20 = vmul.f32 %v2902_v53, %v978_v38 }
 0x1a0   : > { %v2990_v51 = vpop.permute.xlu1 %990  ;;  %v800_v46 = vadd.f32 %v792_v16, %v695_v15 }
 0x1a1   : > { %4080 = vst [vmem:[#allocation67_spill] sm:$0xff] %v2990_v51 }
 0x1a5   : > { %v3006_v51 = vpop.permute.xlu1 %1022 }
 0x1a6   : > { %4082 = vst [vmem:[#allocation69_spill] sm:$0xff] %v3006_v51 }
 0x1a9   : > { %v3009_v8 = vpop.permute.xlu1 %738 }
 0x1ad   : > { %v840_v24 = vpop.permute.xlu1 %839 }
 0x1b1   : > { %v848_v59 = vpop.permute.xlu1 %847 }
 0x1b2   : > { %v856_v9 = vsel %vm855_vm7, %v840_v24, %v848_v59  ;;  %v860_v31 = vsel %vm855_vm7, %v848_v59, %v840_v24 }
 0x1b3   : > { %v872_v40 = vmul.f32 %v3052_v7, %v856_v9  ;;  %v873_v18 = vmul.f32 %v3055_v2, %v860_v31  ;;  %v377_v31 = vsel %vm371_vm1, %v2718_v12, %v2707_v34 }
 0x1b5   : > { %v896_v42 = vmul.f32 %v2841_v30, %v872_v40  ;;  %v897_v57 = vmul.f32 %v2841_v30, %v873_v18  ;;  %v928_v47 = vmul.f32 %v2961_v19, %v872_v40  ;;  %v929_v11 = vmul.f32 %v2961_v19, %v873_v18  ;;  %v3077_v24 = vpop.permute.xlu1 %893 }
 0x1b6   : > { %4086 = vst [vmem:[#allocation73_spill] sm:$0xff] %v3077_v24  ;;  %v390_v18 = vmul.f32 %v2674_v63, %v377_v31 }
 0x1b7   : > { %v904_v13 = vadd.f32 %v896_v42, %v799_v22  ;;  %v905_v53 = vadd.f32 %v897_v57, %v800_v46  ;;  %v936_v16 = vadd.f32 %v928_v47, %v2877_v17  ;;  %v937_v30 = vadd.f32 %v929_v11, %v2879_v29  ;;  %v4095_v47 = vld [vmem:[#allocation32_spill] sm:$0xff] }
 0x1b8   : > { %v373_v29 = vsel %vm371_vm1, %v2707_v34, %v2718_v12  ;;  %v478_v46 = vsel %vm476_vm3, %v2691_v25, %v2709_v37  ;;  %v309_v34 = vmul.f32 %v2581_v62, %v2558_v54  ;;  %v310_v12 = vmul.f32 %v2581_v62, %v2561_v55 }
 0x1b9   : > { %v1009_v10 = vadd.f32 %v1001_v3, %v904_v13  ;;  %v1010_v15 = vadd.f32 %v1002_v5, %v905_v53  ;;  %v3085_v59 = vadd.f32 %v1033_v50, %v936_v16  ;;  %v3087_v19 = vadd.f32 %v1034_v20, %v937_v30  ;;  %v4096_v3 = vld [vmem:[#allocation15_spill] sm:$0xff]  ;;  %v4099_v53 = vld [vmem:[#allocation10_spill] sm:$0xff]  ;;  %v4100_v30 = vld [vmem:[#allocation8_spill] sm:$0xff] }
 0x1ba   : > { %v3089_v6 = vpop.permute.xlu1 %994  ;;  %v391_v22 = vmul.f32 %v2677_v23, %v373_v29  ;;  %v482_v50 = vsel %vm476_vm3, %v2709_v37, %v2691_v25  ;;  %v3129_v42 = vmul.f32 %v2584_v0, %v2574_v60  ;;  %v374_v57 = vsel %vm371_vm1, %v2763_v52, %v2669_v58  ;;  %v4098_v13 = vld [vmem:[#allocation7_spill] sm:$0xff] }
 0x1bb   : > { %4087 = vst [vmem:[#allocation74_spill] sm:$0xff] %v3085_v59  ;;  %4088 = vst [vmem:[#allocation75_spill] sm:$0xff] %v3087_v19  ;;  %v3091_v1 = vadd.f32 %v1106_v33, %v1009_v10  ;;  %v3093_v38 = vadd.f32 %v1107_v14, %v1010_v15  ;;  %v378_v25 = vsel %vm371_vm1, %v2669_v58, %v2763_v52  ;;  %v4097_v33 = vld [vmem:[#allocation9_spill] sm:$0xff]  ;;  %v4101_v15 = vld [vmem:[#allocation12_spill] sm:$0xff] }
 0x1bc   : > { %4089 = vst [vmem:[#allocation76_spill] sm:$0xff] %v3089_v6  ;;  %v495_v37 = vmul.f32 %v2788_v48, %v482_v50  ;;  %v496_v11 = vmul.f32 %v4095_v47, %v478_v46  ;;  %v414_v62 = vmul.f32 %v4096_v3, %v390_v18  ;;  %v415_v5 = vmul.f32 %v4096_v3, %v391_v22  ;;  %v4104_v3 = vld [vmem:[#allocation13_spill] sm:$0xff]  ;;  %v4122_v59 = vld [vmem:[#allocation23_spill] sm:$0xff] }
 0x1bd   : > { %4090 = vst [vmem:[#allocation77_spill] sm:$0xff] %v3091_v1  ;;  %4091 = vst [vmem:[#allocation78_spill] sm:$0xff] %v3093_v38  ;;  %v1154_v44 = vadd.f32 %v3093_v38, %v3091_v1  ;;  %v3145_v14 = vmul.f32 %v2584_v0, %v4097_v33  ;;  %v311_v16 = vmul.f32 %v4099_v53, %v4098_v13 }
 0x1be   : > { %v312_v10 = vmul.f32 %v4099_v53, %v4100_v30  ;;  %v446_v58 = vmul.f32 %v4101_v15, %v390_v18  ;;  %v447_v31 = vmul.f32 %v4101_v15, %v391_v22  ;;  %v392_v46 = vmul.f32 %v2674_v63, %v378_v25  ;;  %v4105_v53 = vld [vmem:[#allocation14_spill] sm:$0xff] }
 0x1bf   : > { %v3097_v9 = vpop.permute.xlu1 %1026  ;;  %1155 = vadd.xlane.f32.xlu1 %v1154_v44  ;;  %v4103_v44 = vld [vmem:[#allocation11_spill] sm:$0xff]  ;;  %v393_v0 = vmul.f32 %v2677_v23, %v374_v57  ;;  %v343_v1 = vmul.f32 %v4104_v3, %v4098_v13  ;;  %v344_v18 = vmul.f32 %v4104_v3, %v4100_v30  ;;  %v3167_v38 = vmul.f32 %v4105_v53, %v2574_v60  ;;  %v4109_v3 = vld [vmem:[#allocation17_spill] sm:$0xff] }
 0x1c0   : > { %4092 = vst [vmem:[#allocation79_spill] sm:$0xff] %v3097_v9  ;;  %v341_v29 = vmul.f32 %v4103_v44, %v2558_v54  ;;  %v342_v50 = vmul.f32 %v4103_v44, %v2561_v55  ;;  %v4106_v54 = vld [vmem:[#allocation20_spill] sm:$0xff]  ;;  %v422_v25 = vadd.f32 %v414_v62, %v309_v34  ;;  %v423_v15 = vadd.f32 %v415_v5, %v310_v12  ;;  %v4107_v57 = vld [vmem:[#allocation19_spill] sm:$0xff]  ;;  %v4110_v12 = vld [vmem:[#allocation18_spill] sm:$0xff] }
 0x1c1   : > { %v519_v24 = vmul.f32 %v4106_v54, %v495_v37  ;;  %v520_v22 = vmul.f32 %v4106_v54, %v496_v11  ;;  %v551_v9 = vmul.f32 %v4107_v57, %v495_v37  ;;  %v552_v55 = vmul.f32 %v4107_v57, %v496_v11  ;;  %v2265_v57 = vld [vmem:[%s2362_s20 + $0x10] sm:$0xff] }
 0x1c2   : > { %v454_v44 = vadd.f32 %v446_v58, %v341_v29  ;;  %v379_v13 = vsel %vm371_vm1, %v2882_v49, %v2870_v41  ;;  %v455_v60 = vadd.f32 %v447_v31, %v342_v50  ;;  %v416_v6 = vmul.f32 %v4109_v3, %v392_v46  ;;  %v4112_v50 = vld [vmem:[#allocation30_spill] sm:$0xff] }
 0x1c3   : > { %v417_v51 = vmul.f32 %v4109_v3, %v393_v0  ;;  %v375_v34 = vsel %vm371_vm1, %v2870_v41, %v2882_v49  ;;  %v448_v37 = vmul.f32 %v4110_v12, %v392_v46  ;;  %v449_v11 = vmul.f32 %v4110_v12, %v393_v0  ;;  %v4111_v46 = vld [vmem:[#allocation25_spill] sm:$0xff] }
 0x1c4   : > { %v3099_v17 = vpop.permute.xlu1 %1095  ;;  %v583_v62 = vsel %vm581_vm2, %v2888_v4, %v2892_v27  ;;  %v587_v5 = vsel %vm581_vm2, %v2892_v27, %v2888_v4  ;;  %v346_v58 = vmul.f32 %v4105_v53, %v4097_v33  ;;  %v394_v41 = vmul.f32 %v2674_v63, %v379_v13  ;;  %v4114_v13 = vld [vmem:[#allocation29_spill] sm:$0xff] }
 0x1c5   : > { %4093 = vst [vmem:[#allocation80_spill] sm:$0xff] %v3099_v17  ;;  %v527_v49 = vadd.f32 %v519_v24, %v422_v25  ;;  %v528_v29 = vadd.f32 %v520_v22, %v423_v15  ;;  %v395_v31 = vmul.f32 %v2677_v23, %v375_v34  ;;  %v479_v0 = vsel %vm476_vm3, %v4111_v46, %v2885_v56  ;;  %v4113_v23 = vld [vmem:[#allocation31_spill] sm:$0xff] }
 0x1c6   : > { %v483_v4 = vsel %vm476_vm3, %v2885_v56, %v4111_v46  ;;  %v559_v27 = vadd.f32 %v551_v9, %v454_v44  ;;  %v424_v63 = vadd.f32 %v416_v6, %v311_v16  ;;  %v560_v24 = vadd.f32 %v552_v55, %v455_v60  ;;  %v2266_v56 = vld [vmem:[%s2362_s20 + $0x18] sm:$0xff]  ;;  %v4115_v44 = vld [vmem:[#allocation16_spill] sm:$0xff]  ;;  %v2267_v55 = vld [vmem:[%s2362_s20 + $0x20] sm:$0xff] }
 0x1c7   : > { %v600_v53 = vmul.f32 %v4112_v50, %v587_v5  ;;  %v601_v54 = vmul.f32 %v4113_v23, %v583_v62  ;;  %v425_v22 = vadd.f32 %v417_v51, %v312_v10  ;;  %v456_v25 = vadd.f32 %v448_v37, %v343_v1  ;;  %v4116_v60 = vld [vmem:[#allocation33_spill] sm:$0xff]  ;;  %v2268_v51 = vld [vmem:[%s2362_s20 + $0x28] sm:$0xff]  ;;  %v3227_v10 = vld [vmem:[%s2362_s20 + $0x30] sm:$0xff] }
 0x1c8   : > { %v457_v15 = vadd.f32 %v449_v11, %v344_v18  ;;  %v720_v3 = vmul.f32 %v2265_v57, %v4114_v13  ;;  %v721_v9 = vmul.f32 %v2266_v56, %v4114_v13  ;;  %v418_v34 = vmul.f32 %v4115_v44, %v394_v41  ;;  %v4117_v18 = vld [vmem:[#allocation38_spill] sm:$0xff]  ;;  %v3237_v5 = vld [vmem:[%s2362_s20 + $0x38] sm:$0xff] }
 0x1c9   : > { %v3109_v40 = vpop.permute.xlu1 %1123  ;;  %v497_v6 = vmul.f32 %v2788_v48, %v483_v4  ;;  %v498_v16 = vmul.f32 %v4095_v47, %v479_v0  ;;  %v3220_v12 = vmul.f32 %v2267_v55, %v4116_v60  ;;  %v3224_v1 = vmul.f32 %v2268_v51, %v4116_v60  ;;  %v4120_v0 = vld [vmem:[#allocation40_spill] sm:$0xff]  ;;  %v4121_v13 = vld [vmem:[#allocation26_spill] sm:$0xff] }
 0x1ca   : > { %v3231_v37 = vmul.f32 %v3227_v10, %v4117_v18  ;;  %v419_v11 = vmul.f32 %v4115_v44, %v395_v31  ;;  %v3241_v46 = vmul.f32 %v3237_v5, %v4117_v18  ;;  %v688_v4 = vmul.f32 %v2265_v57, %v4120_v0  ;;  %v4124_v18 = vld [vmem:[#allocation24_spill] sm:$0xff] }
 0x1cb   : > { %v624_v60 = vmul.f32 %v4121_v13, %v600_v53  ;;  %v625_v19 = vmul.f32 %v4121_v13, %v601_v54  ;;  %v689_v17 = vmul.f32 %v2266_v56, %v4120_v0  ;;  %v656_v44 = vmul.f32 %v4123_v35, %v600_v53 }
 0x1cc   : > { %4118 = vst [vmem:[#allocation9_spill] sm:$0xff] %v3231_v37  ;;  %4119 = vst [vmem:[#allocation7_spill] sm:$0xff] %v3241_v46  ;;  %v450_v37 = vmul.f32 %v4122_v59, %v394_v41  ;;  %v657_v32 = vmul.f32 %v4123_v35, %v601_v54  ;;  %v521_v46 = vmul.f32 %v4124_v18, %v497_v6  ;;  %v4126_v41 = vld [vmem:[#allocation35_spill] sm:$0xff]  ;;  %vm1791_vm1 = vcmask 351512  }
 0x1cd   : > { %v3121_v20 = vpop.permute.xlu1 %740  ;;  %v522_v57 = vmul.f32 %v4124_v18, %v498_v16  ;;  %v427_v39 = vadd.f32 %v419_v11, %v3145_v14  ;;  %v484_v53 = vsel %vm476_vm3, %v4126_v41, %v2928_v21  ;;  %v633_v54 = vadd.f32 %v625_v19, %v528_v29  ;;  %v4128_v14 = vld [vmem:[#allocation37_spill] sm:$0xff]  ;;  %v4129_v18 = vld [vmem:[#allocation51_spill] sm:$0xff] }
 0x1ce   : > { %4094 = vst [vmem:[#allocation81_spill] sm:$0xff] %v3121_v20  ;;  %v426_v20 = vadd.f32 %v418_v34, %v3129_v42  ;;  %v632_v42 = vadd.f32 %v624_v60, %v527_v49  ;;  %v664_v34 = vadd.f32 %v656_v44, %v559_v27  ;;  %v584_v49 = vsel %vm581_vm2, %v2931_v26, %v4128_v14  ;;  %v4134_v44 = vld [vmem:[#allocation58_spill] sm:$0xff] }
 0x1cf   : > { %v529_v29 = vadd.f32 %v521_v46, %v424_v63  ;;  %v499_v11 = vmul.f32 %v2788_v48, %v484_v53  ;;  %v603_v27 = vmul.f32 %v4113_v23, %v584_v49  ;;  %v861_v48 = vsel %vm855_vm7, %v2940_v61, %v4129_v18 }
 0x1d1   : > { %v3152_v52 = vpop.permute.xlu1 %748 }
 0x1d2   : > { %4102 = vst [vmem:[#allocation32_spill] sm:$0xff] %v3152_v52  ;;  %v451_v52 = vmul.f32 %v4122_v59, %v395_v31  ;;  %v480_v59 = vsel %vm476_vm3, %v2928_v21, %v4126_v41  ;;  %v588_v31 = vsel %vm581_vm2, %v4128_v14, %v2931_v26  ;;  %v697_v26 = vadd.f32 %v689_v17, %v633_v54  ;;  %v4138_v41 = vld [vmem:[#allocation22_spill] sm:$0xff] }
 0x1d3   : > { %v500_v0 = vmul.f32 %v4095_v47, %v480_v59  ;;  %v602_v60 = vmul.f32 %v4112_v50, %v588_v31  ;;  %v728_v47 = vadd.f32 %v720_v3, %v664_v34  ;;  %v4136_v3 = vld [vmem:[#allocation62_spill] sm:$0xff]  ;;  %v555_v53 = vmul.f32 %v4138_v41, %v499_v11 }
 0x1d4   : > { %v459_v19 = vadd.f32 %v451_v52, %v346_v58  ;;  %v4131_v58 = vld [vmem:[#allocation45_spill] sm:$0xff]  ;;  %v875_v59 = vmul.f32 %v3055_v2, %v861_v48  ;;  %v4139_v34 = vld [vmem:[#allocation46_spill] sm:$0xff]  ;;  %v4142_v48 = vld [vmem:[#allocation39_spill] sm:$0xff] }
 0x1d5   : > { %v3177_v30 = vpop.permute.xlu1 %851  ;;  %v690_v63 = vmul.f32 %v2267_v55, %v4131_v58  ;;  %v691_v31 = vmul.f32 %v2268_v51, %v4131_v58 }
 0x1d6   : > { %4108 = vst [vmem:[#allocation15_spill] sm:$0xff] %v3177_v30  ;;  %v4125_v30 = vld [vmem:[#allocation21_spill] sm:$0xff] }
 0x1d7   : > { %v553_v13 = vmul.f32 %v4125_v30, %v497_v6  ;;  %v554_v56 = vmul.f32 %v4125_v30, %v498_v16  ;;  %v458_v30 = vadd.f32 %v450_v37, %v3167_v38  ;;  %v665_v6 = vadd.f32 %v657_v32, %v560_v24 }
 0x1d8   : > { %v530_v16 = vadd.f32 %v522_v57, %v425_v22  ;;  %v857_v32 = vsel %vm855_vm7, %v4129_v18, %v2940_v61  ;;  %v696_v24 = vadd.f32 %v688_v4, %v632_v42  ;;  %v4135_v57 = vld [vmem:[#allocation36_spill] sm:$0xff]  ;;  %v556_v42 = vmul.f32 %v4138_v41, %v500_v0 }
 0x1d9   : > { %v3207_v33 = vpop.permute.xlu1 %946  ;;  %v561_v21 = vadd.f32 %v553_v13, %v456_v25  ;;  %v562_v38 = vadd.f32 %v554_v56, %v457_v15  ;;  %v729_v22 = vadd.f32 %v721_v9, %v665_v6  ;;  %v4132_v25 = vld [vmem:[#allocation34_spill] sm:$0xff]  ;;  %v874_v46 = vmul.f32 %v3052_v7, %v857_v32  ;;  %v4133_v15 = vld [vmem:[#allocation59_spill] sm:$0xff]  ;;  %v4137_v9 = vld [vmem:[#allocation61_spill] sm:$0xff] }
 0x1da   : > { %v523_v37 = vmul.f32 %v4132_v25, %v499_v11  ;;  %v585_v17 = vsel %vm581_vm2, %v4134_v44, %v4133_v15  ;;  %v589_v55 = vsel %vm581_vm2, %v4133_v15, %v4134_v44  ;;  %v524_v4 = vmul.f32 %v4132_v25, %v500_v0  ;;  %v4140_v11 = vld [vmem:[#allocation41_spill] sm:$0xff]  ;;  %v4141_v0 = vld [vmem:[#allocation42_spill] sm:$0xff] }
 0x1db   : > { %v626_v61 = vmul.f32 %v4135_v57, %v602_v60  ;;  %v752_v13 = vsel %vm750_vm4, %v4137_v9, %v4136_v3  ;;  %v756_v56 = vsel %vm750_vm4, %v4136_v3, %v4137_v9  ;;  %v627_v54 = vmul.f32 %v4135_v57, %v603_v27 }
 0x1dc   : > { %v930_v6 = vmul.f32 %v4139_v34, %v874_v46  ;;  %v604_v49 = vmul.f32 %v4112_v50, %v589_v55  ;;  %v605_v18 = vmul.f32 %v4113_v23, %v585_v17  ;;  %v531_v32 = vadd.f32 %v523_v37, %v426_v20  ;;  %v4144_v37 = vld [vmem:[#allocation27_spill] sm:$0xff] }
 0x1dd   : > { %v3234_v62 = vpop.permute.xlu1 %954  ;;  %v931_v25 = vmul.f32 %v4139_v34, %v875_v59  ;;  %v769_v15 = vmul.f32 %v4140_v11, %v752_v13  ;;  %v770_v44 = vmul.f32 %v4141_v0, %v756_v56  ;;  %v532_v57 = vadd.f32 %v524_v4, %v427_v39  ;;  %v4148_v13 = vld [vmem:[#allocation44_spill] sm:$0xff] }
 0x1de   : > { %v634_v3 = vadd.f32 %v626_v61, %v529_v29  ;;  %v658_v9 = vmul.f32 %v4142_v48, %v602_v60  ;;  %v659_v41 = vmul.f32 %v4142_v48, %v603_v27  ;;  %v563_v51 = vadd.f32 %v555_v53, %v458_v30  ;;  %v4145_v29 = vld [vmem:[#allocation50_spill] sm:$0xff]  ;;  %v4146_v30 = vld [vmem:[#allocation47_spill] sm:$0xff]  ;;  %v4147_v27 = vld [vmem:[#allocation49_spill] sm:$0xff] }
 0x1df   : > { %v564_v58 = vadd.f32 %v556_v42, %v459_v19  ;;  %v628_v17 = vmul.f32 %v4144_v37, %v604_v49  ;;  %v629_v39 = vmul.f32 %v4144_v37, %v605_v18  ;;  %v753_v60 = vsel %vm750_vm4, %v3009_v8, %v4145_v29  ;;  %v4150_v37 = vld [vmem:[#allocation53_spill] sm:$0xff] }
 0x1e0   : > { %v793_v19 = vmul.f32 %v4146_v30, %v769_v15  ;;  %v667_v55 = vadd.f32 %v659_v41, %v562_v38  ;;  %v826_v4 = vmul.f32 %v4147_v27, %v770_v44  ;;  %v698_v61 = vadd.f32 %v690_v63, %v634_v3 }
 0x1e1   : > { %v3261_v35 = vpop.permute.xlu1 %1030  ;;  %v660_v56 = vmul.f32 %v4148_v13, %v604_v49  ;;  %v771_v42 = vmul.f32 %v4140_v11, %v753_v60  ;;  %v661_v48 = vmul.f32 %v4148_v13, %v605_v18  ;;  %v637_v38 = vadd.f32 %v629_v39, %v532_v57  ;;  %v4151_v57 = vld [vmem:[#allocation55_spill] sm:$0xff] }
 0x1e2   : > { %4127 = vst [vmem:[#allocation10_spill] sm:$0xff] %v3261_v35  ;;  %v635_v35 = vadd.f32 %v627_v54, %v530_v16  ;;  %v794_v16 = vmul.f32 %v4146_v30, %v770_v44  ;;  %v962_v54 = vsel %vm960_vm5, %v3207_v33, %v3234_v62  ;;  %v834_v49 = vadd.f32 %v826_v4, %v729_v22  ;;  %v4152_v30 = vld [vmem:[#allocation67_spill] sm:$0xff]  ;;  %v4156_v4 = vld [vmem:[#allocation32_spill] sm:$0xff] }
 0x1e3   : > { %v731_v3 = vadd.f32 %v3224_v1, %v667_v55  ;;  %v1138_v39 = vmul.f32 %v3109_v40, %v3064_v45 }
 0x1e4   : > { %v699_v53 = vadd.f32 %v691_v31, %v635_v35  ;;  %v801_v35 = vadd.f32 %v793_v19, %v696_v24  ;;  %v802_v63 = vadd.f32 %v794_v16, %v697_v26  ;;  %v3367_v24 = vadd.f32 %v661_v48, %v564_v58  ;;  %v3378_v19 = vpop.permute.xlu0 %1103 }
 0x1e5   : > { %v939_v60 = vadd.f32 %v931_v25, %v834_v49 }
 0x1e6   : > { %v3284_v52 = vpop.permute.xlu1 %1099 }
 0x1e7   : > { %4130 = vst [vmem:[#allocation8_spill] sm:$0xff] %v3284_v52  ;;  %v4143_v52 = vld [vmem:[#allocation52_spill] sm:$0xff] }
 0x1e8   : > { %v692_v50 = vmul.f32 %v3227_v10, %v4143_v52  ;;  %v693_v20 = vmul.f32 %v3237_v5, %v4143_v52  ;;  %v825_v10 = vmul.f32 %v4147_v27, %v769_v15  ;;  %v757_v5 = vsel %vm750_vm4, %v4145_v29, %v3009_v8  ;;  %v4154_v27 = vld [vmem:[#allocation56_spill] sm:$0xff] }
 0x1e9   : > { %v666_v52 = vadd.f32 %v658_v9, %v561_v21  ;;  %v636_v15 = vadd.f32 %v628_v17, %v531_v32  ;;  %v772_v8 = vmul.f32 %v4141_v0, %v757_v5  ;;  %v966_v21 = vsel %vm960_vm5, %v3234_v62, %v3207_v33  ;;  %v4149_v9 = vld [vmem:[#allocation57_spill] sm:$0xff] }
 0x1ea   : > { %v3315_v14 = vpop.permute.xlu1 %845  ;;  %v833_v31 = vadd.f32 %v825_v10, %v728_v47  ;;  %v979_v32 = vmul.f32 %v3023_v28, %v962_v54  ;;  %v898_v18 = vmul.f32 %v4149_v9, %v874_v46  ;;  %v899_v41 = vmul.f32 %v4149_v9, %v875_v59  ;;  %v4159_v54 = vld [vmem:[#allocation71_spill] sm:$0xff]  ;;  %v4162_v9 = vld [vmem:[#allocation80_spill] sm:$0xff] }
 0x1eb   : > { %v730_v44 = vadd.f32 %v3220_v12, %v666_v52  ;;  %v795_v17 = vmul.f32 %v4150_v37, %v771_v42  ;;  %v980_v29 = vmul.f32 %v3026_v43, %v966_v21  ;;  %v3365_v62 = vadd.f32 %v660_v56, %v563_v51  ;;  %v4155_v52 = vld [vmem:[#allocation72_spill] sm:$0xff] }
 0x1ec   : > { %v796_v26 = vmul.f32 %v4150_v37, %v772_v8  ;;  %v3370_v12 = vadd.f32 %v692_v50, %v636_v15  ;;  %v3372_v1 = vadd.f32 %v693_v20, %v637_v38  ;;  %v906_v47 = vadd.f32 %v898_v18, %v801_v35  ;;  %v4153_v50 = vld [vmem:[#allocation15_spill] sm:$0xff]  ;;  %v4160_v15 = vld [vmem:[#allocation74_spill] sm:$0xff]  ;;  %v959_v35 = vpop.permute.xlu0 %958 }
 0x1ed   : > { %v907_v22 = vadd.f32 %v899_v41, %v802_v63  ;;  %v938_v46 = vadd.f32 %v930_v6, %v833_v31  ;;  %v827_v59 = vmul.f32 %v4151_v57, %v771_v42  ;;  %v1003_v51 = vmul.f32 %v4152_v30, %v979_v32  ;;  %v4161_v31 = vld [vmem:[#allocation68_spill] sm:$0xff] }
 0x1ee   : > { %v3328_v23 = vpop.permute.xlu1 %853  ;;  %v803_v58 = vadd.f32 %v795_v17, %v698_v61  ;;  %v828_v16 = vmul.f32 %v4151_v57, %v772_v8  ;;  %v858_v20 = vsel %vm855_vm7, %v4154_v27, %v4153_v50  ;;  %v1004_v6 = vmul.f32 %v4152_v30, %v980_v29  ;;  %v4157_v61 = vld [vmem:[#allocation81_spill] sm:$0xff]  ;;  %v4163_v17 = vld [vmem:[#allocation75_spill] sm:$0xff] }
 0x1ef   : > { %v804_v5 = vadd.f32 %v796_v26, %v699_v53  ;;  %v1139_v45 = vmul.f32 %v3109_v40, %v4155_v52  ;;  %v754_v13 = vsel %vm750_vm4, %v4157_v61, %v4156_v4  ;;  %v862_v56 = vsel %vm855_vm7, %v4153_v50, %v4154_v27  ;;  %v4158_v53 = vld [vmem:[#allocation70_spill] sm:$0xff]  ;;  %v4164_v57 = vld [vmem:[#allocation69_spill] sm:$0xff] }
 0x1f0   : > { %v3403_v48 = vadd.f32 %v1138_v39, %v4160_v15  ;;  %v758_v8 = vsel %vm750_vm4, %v4156_v4, %v4157_v61  ;;  %v876_v21 = vmul.f32 %v3052_v7, %v858_v20  ;;  %v1011_v38 = vadd.f32 %v1003_v51, %v906_v47  ;;  %v1062_v4 = vpop.permute.xlu0 %1061 }
 0x1f1   : > { %v1012_v63 = vadd.f32 %v1004_v6, %v907_v22  ;;  %v3421_v26 = vmul.f32 %v4140_v11, %v754_v13  ;;  %v877_v47 = vmul.f32 %v3055_v2, %v862_v56  ;;  %v1035_v39 = vmul.f32 %v4164_v57, %v979_v32  ;;  %v4165_v11 = vld [vmem:[#allocation66_spill] sm:$0xff]  ;;  %v4168_v13 = vld [vmem:[#allocation43_spill] sm:$0xff] }
 0x1f2   : > { %v957_v34 = vpop.permute.xlu1 %956  ;;  %v1036_v30 = vmul.f32 %v4164_v57, %v980_v29  ;;  %v835_v27 = vadd.f32 %v827_v59, %v730_v44  ;;  %v3434_v20 = vmul.f32 %v4141_v0, %v758_v8  ;;  %v900_v6 = vmul.f32 %v4165_v11, %v876_v21  ;;  %v4167_v59 = vld [vmem:[#allocation48_spill] sm:$0xff] }
 0x1f3   : > { %v963_v49 = vsel %vm960_vm5, %v4161_v31, %v957_v34  ;;  %v967_v22 = vsel %vm960_vm5, %v957_v34, %v4161_v31  ;;  %v901_v44 = vmul.f32 %v4165_v11, %v877_v47  ;;  %v932_v0 = vmul.f32 %v4167_v59, %v876_v21  ;;  %v4169_v21 = vld [vmem:[#allocation76_spill] sm:$0xff] }
 0x1f4   : > { %v982_v52 = vmul.f32 %v3026_v43, %v967_v22  ;;  %v797_v56 = vmul.f32 %v4168_v13, %v3421_v26  ;;  %v1043_v15 = vadd.f32 %v1035_v39, %v938_v46  ;;  %v798_v8 = vmul.f32 %v4168_v13, %v3434_v20  ;;  %v4170_v22 = vld [vmem:[#allocation79_spill] sm:$0xff] }
 0x1f5   : > { %vm1827_vm4 = vcmask 64512  }
 0x1f6   : > { %v1052_v33 = vpop.permute.xlu1 %1051  ;;  %v1006_v46 = vmul.f32 %v4169_v21, %v982_v52 }
 0x1fa   : > { %v1060_v10 = vpop.permute.xlu1 %1059 }
 0x1fb   : > { %v1067_v25 = vsel %vm1065_vm6, %v1052_v33, %v1060_v10  ;;  %v1071_v55 = vsel %vm1065_vm6, %v1060_v10, %v1052_v33  ;;  %v3418_v33 = vadd.f32 %v1139_v45, %v4163_v17  ;;  %v981_v10 = vmul.f32 %v3023_v28, %v963_v49  ;;  %v4166_v45 = vld [vmem:[#allocation63_spill] sm:$0xff] }
 0x1fc   : > { %v1084_v42 = vmul.f32 %v4158_v53, %v1067_v25  ;;  %v1085_v40 = vmul.f32 %v4159_v54, %v1071_v55  ;;  %v836_v55 = vadd.f32 %v828_v16, %v731_v3  ;;  %v908_v3 = vadd.f32 %v900_v6, %v803_v58 }
 0x1fd   : > { %v1182_v61 = vadd.f32 %v3418_v33, %v3403_v48  ;;  %v859_v16 = vsel %vm855_vm7, %v3315_v14, %v3328_v23  ;;  %v909_v58 = vadd.f32 %v901_v44, %v804_v5 }
 0x1fe   : > { %v1108_v18 = vmul.f32 %v4162_v9, %v1084_v42  ;;  %v1109_v41 = vmul.f32 %v4162_v9, %v1085_v40  ;;  %v3415_v37 = vpop.permute.xlu1 %1135  ;;  %v1140_v34 = vmul.f32 %v4166_v45, %v1084_v42  ;;  %v1141_v32 = vmul.f32 %v4166_v45, %v1085_v40 }
 0x1ff   : > { %v933_v42 = vmul.f32 %v4167_v59, %v877_v47  ;;  %v1044_v40 = vadd.f32 %v1036_v30, %v939_v60  ;;  %v940_v9 = vadd.f32 %v932_v0, %v835_v27  ;;  %v878_v47 = vmul.f32 %v3052_v7, %v859_v16  ;;  %v1064_v27 = vpop.permute.xlu0 %1063  ;;  %v4174_v16 = vld [vmem:[#allocation78_spill] sm:$0xff] }
 0x200   : > { %v3429_v51 = vadd.f32 %v1108_v18, %v1011_v38  ;;  %v3431_v50 = vadd.f32 %v1109_v41, %v1012_v63  ;;  %v1005_v38 = vmul.f32 %v4169_v21, %v981_v10  ;;  %v863_v63 = vsel %vm855_vm7, %v3328_v23, %v3315_v14  ;;  %v4175_v21 = vld [vmem:[#allocation77_spill] sm:$0xff] }
 0x201   : > { %v3462_v31 = vadd.f32 %v1140_v34, %v1043_v15  ;;  %v3464_v49 = vadd.f32 %v1141_v32, %v1044_v40  ;;  %v941_v17 = vadd.f32 %v933_v42, %v836_v55  ;;  %v1037_v14 = vmul.f32 %v4170_v22, %v981_v10  ;;  %v4172_v32 = vld [vmem:[#allocation65_spill] sm:$0xff] }
 0x202   : > { %v951_v25 = vpop.permute.xlu1 %950  ;;  %v1157_v29 = vadd.f32 %v3431_v50, %v3429_v51  ;;  %v1038_v23 = vmul.f32 %v4170_v22, %v982_v52  ;;  %v879_v57 = vmul.f32 %v3055_v2, %v863_v63  ;;  %v1013_v39 = vadd.f32 %v1005_v38, %v908_v3  ;;  %v4171_v52 = vld [vmem:[#allocation8_spill] sm:$0xff]  ;;  %v4173_v42 = vld [vmem:[#allocation73_spill] sm:$0xff] }
 0x203   : > { %v1014_v11 = vadd.f32 %v1006_v46, %v909_v58  ;;  %v964_v6 = vsel %vm960_vm5, %v951_v25, %v959_v35  ;;  %v968_v7 = vsel %vm960_vm5, %v959_v35, %v951_v25  ;;  %v1185_v10 = vadd.f32 %v3464_v49, %v3462_v31  ;;  %v4176_v46 = vld [vmem:[#allocation9_spill] sm:$0xff]  ;;  %v4179_v22 = vld [vmem:[#allocation60_spill] sm:$0xff] }
 0x204   : > { %1158 = vadd.xlane.f32.xlu0 %v1157_v29  ;;  %v1045_v44 = vadd.f32 %v1037_v14, %v940_v9  ;;  %v1046_v59 = vadd.f32 %v1038_v23, %v941_v17  ;;  %v983_v25 = vmul.f32 %v3023_v28, %v964_v6  ;;  %v902_v15 = vmul.f32 %v4173_v42, %v878_v47  ;;  %v4177_v9 = vld [vmem:[#allocation64_spill] sm:$0xff]  ;;  %v4178_v17 = vld [vmem:[#allocation7_spill] sm:$0xff]  ;;  %v4181_v6 = vld [vmem:[#allocation10_spill] sm:$0xff] }
 0x205   : > { %v1170_v38 = vmax.f32 %v4175_v21, %v4174_v16  ;;  %v903_v36 = vmul.f32 %v4173_v42, %v879_v57  ;;  %v805_v58 = vadd.f32 %v797_v56, %v3370_v12 }
 0x206   : > { %v1054_v60 = vpop.permute.xlu1 %1053  ;;  %v1007_v14 = vmul.f32 %v4179_v22, %v983_v25 }
 0x207   : > { %v1068_v18 = vsel %vm1065_vm6, %v1054_v60, %v1062_v4  ;;  %v1072_v41 = vsel %vm1065_vm6, %v1062_v4, %v1054_v60  ;;  %v984_v4 = vmul.f32 %v3026_v43, %v968_v7  ;;  %v732_v60 = vadd.f32 %v4176_v46, %v3365_v62 }
 0x208   : > { %1183 = vadd.xlane.f32.xlu0 %v1182_v61  ;;  %v1086_v5 = vmul.f32 %v4158_v53, %v1068_v18  ;;  %v1087_v30 = vmul.f32 %v4159_v54, %v1072_v41  ;;  %v829_v18 = vmul.f32 %v4177_v9, %v3421_v26  ;;  %v830_v41 = vmul.f32 %v4177_v9, %v3434_v20 }
 0x209   : > { %v1008_v23 = vmul.f32 %v4179_v22, %v984_v4  ;;  %v910_v62 = vadd.f32 %v902_v15, %v805_v58 }
 0x20a   : > { %v1056_v45 = vpop.permute.xlu1 %1055  ;;  %v1110_v34 = vmul.f32 %v4171_v52, %v1086_v5  ;;  %v1111_v2 = vmul.f32 %v4171_v52, %v1087_v30  ;;  %v1142_v29 = vmul.f32 %v4172_v32, %v1086_v5  ;;  %v1143_v55 = vmul.f32 %v4172_v32, %v1087_v30 }
 0x20b   : > { %v1069_v0 = vsel %vm1065_vm6, %v1056_v45, %v1064_v27  ;;  %v1073_v35 = vsel %vm1065_vm6, %v1064_v27, %v1056_v45  ;;  %v1015_v27 = vadd.f32 %v1007_v14, %v910_v62  ;;  %v3571_v14 = vld [vmem:[%s3903_s2] sm:$0xff] }
 0x20c   : > { %1186 = vadd.xlane.f32.xlu0 %v1185_v10  ;;  %v3492_v61 = vadd.f32 %v1110_v34, %v1013_v39  ;;  %v3494_v13 = vadd.f32 %v1111_v2, %v1014_v11  ;;  %v3497_v40 = vadd.f32 %v1142_v29, %v1045_v44  ;;  %v3499_v3 = vadd.f32 %v1143_v55, %v1046_v59  ;;  %v4180_v39 = vld [vmem:[#allocation54_spill] sm:$0xff] }
 0x20d   : > { %v1088_v63 = vmul.f32 %v4158_v53, %v1069_v0  ;;  %v1089_v28 = vmul.f32 %v4159_v54, %v1073_v35  ;;  %v733_v53 = vadd.f32 %v4178_v17, %v3367_v24  ;;  %v806_v54 = vadd.f32 %v798_v8, %v3372_v1  ;;  %v3563_v17 = vld [vmem:[%s3903_s2 + $0x8] sm:$0xff] }
 0x20e   : > { %v1160_v43 = vadd.f32 %v3494_v13, %v3492_v61  ;;  %v934_v12 = vmul.f32 %v4180_v39, %v878_v47  ;;  %v935_v56 = vmul.f32 %v4180_v39, %v879_v57  ;;  %v1188_v26 = vadd.f32 %v3499_v3, %v3497_v40  ;;  %v3579_v39 = vld [vmem:[%s3903_s2 + $0x10] sm:$0xff] }
 0x20f   : > { %v911_v20 = vadd.f32 %v903_v36, %v806_v54  ;;  %v1112_v5 = vmul.f32 %v3378_v19, %v1088_v63  ;;  %v1113_v24 = vmul.f32 %v3378_v19, %v1089_v28  ;;  %v1173_v1 = vmax.f32 %v3429_v51, %v3431_v50 }
 0x210   : > { %1171 = vmax.xlane.f32.xlu0 %v1170_v38  ;;  %1161 = vadd.xlane.f32.xlu1 %v1160_v43  ;;  %v837_v8 = vadd.f32 %v829_v18, %v732_v60  ;;  %v838_v30 = vadd.f32 %v830_v41, %v733_v53  ;;  %v1039_v47 = vmul.f32 %v4181_v6, %v983_v25 }
 0x211   : > { %v1016_v11 = vadd.f32 %v1008_v23, %v911_v20  ;;  %v1040_v57 = vmul.f32 %v4181_v6, %v984_v4  ;;  %v1201_v10 = vmax.f32 %v3462_v31, %v3464_v49  ;;  %v1198_v19 = vmax.f32 %v3403_v48, %v3418_v33 }
 0x212   : > { %v942_v7 = vadd.f32 %v934_v12, %v837_v8  ;;  %v943_v45 = vadd.f32 %v935_v56, %v838_v30  ;;  %v3534_v52 = vadd.f32 %v1112_v5, %v1015_v27  ;;  %v1144_v2 = vmul.f32 %v3415_v37, %v1088_v63 }
 0x213   : > { %v3536_v34 = vadd.f32 %v1113_v24, %v1016_v11  ;;  %v1145_v32 = vmul.f32 %v3415_v37, %v1089_v28  ;;  %v1176_v44 = vmax.f32 %v3492_v61, %v3494_v13  ;;  %v1204_v25 = vmax.f32 %v3497_v40, %v3499_v3 }
 0x214   : > { %1189 = vadd.xlane.f32.xlu0 %v1188_v26  ;;  %1174 = vmax.xlane.f32.xlu1 %v1173_v1  ;;  %v1047_v29 = vadd.f32 %v1039_v47, %v942_v7  ;;  %v1048_v55 = vadd.f32 %v1040_v57, %v943_v45 }
 0x215   : > { %v1163_v35 = vadd.f32 %v3536_v34, %v3534_v52  ;;  %v1179_v42 = vmax.f32 %v3534_v52, %v3536_v34 }
 0x216   : > { %v3542_v59 = vadd.f32 %v1144_v2, %v1047_v29  ;;  %v3544_v0 = vadd.f32 %v1145_v32, %v1048_v55  ;;  %v3603_v2 = vld [vmem:[%s3903_s2 + $0x18] sm:$0xff] }
 0x218   : > { %1202 = vmax.xlane.f32.xlu0 %v1201_v10  ;;  %1199 = vmax.xlane.f32.xlu1 %v1198_v19  ;;  %4182 = vst [vmem:[#allocation12_spill] sm:$0xff] %v3544_v0  ;;  %v1191_v37 = vadd.f32 %v3544_v0, %v3542_v59  ;;  %v1207_v4 = vmax.f32 %v3542_v59, %v3544_v0 }
 0x21c   : > { %1177 = vmax.xlane.f32.xlu0 %v1176_v44  ;;  %1164 = vadd.xlane.f32.xlu1 %v1163_v35 }
 0x220   : > { %1205 = vmax.xlane.f32.xlu0 %v1204_v25  ;;  %1192 = vadd.xlane.f32.xlu1 %v1191_v37 }
 0x224   : > { %1208 = vmax.xlane.f32.xlu0 %v1207_v4  ;;  %1180 = vmax.xlane.f32.xlu1 %v1179_v42 }
 0x24c   : > { %v1156_v63 = vpop.xlane.xlu1 %1155 }
 0x24d   : > { %v1166_v58 = vmul.f32 0.00390625, %v1156_v63 }
 0x24f   : > { %v1210_v23 = vmul.f32 %v3571_v14, %v1166_v58 }
 0x251   : > { %v1215_v1 = vsel %vm1214_vm8, %v1210_v23, 0.0 }
 0x291   : > { %v1159_v15 = vpop.xlane.xlu0 %1158 }
 0x292   : > { %v1167_v46 = vmul.f32 0.00390625, %v1159_v15 }
 0x294   : > { %v1211_v53 = vmul.f32 %v3563_v17, %v1167_v46 }
 0x295   : > { %v1184_v38 = vpop.xlane.xlu0 %1183 }
 0x296   : > { %v1194_v41 = vmul.f32 0.00390625, %v1184_v38  ;;  %v1216_v20 = vsel %vm1214_vm8, %v1211_v53, 0.0 }
 0x297   : > { %v1217_v7 = vadd.f32 %v1216_v20, %v1215_v1 }
 0x298   : > { %v1489_v26 = vmul.f32 %v3571_v14, %v1194_v41 }
 0x299   : > { %v1187_v36 = vpop.xlane.xlu0 %1186 }
 0x29a   : > { %v1195_v54 = vmul.f32 0.00390625, %v1187_v36  ;;  %v1494_v45 = vsel %vm1493_vm9, %v1489_v26, 0.0 }
 0x29c   : > { %v1490_v5 = vmul.f32 %v3563_v17, %v1195_v54 }
 0x29d   : > { %v3556_v28 = vpop.xlane.xlu0 %1171  ;;  %v1162_v43 = vpop.xlane.xlu1 %1161 }
 0x29e   : > { %v1168_v18 = vmul.f32 0.00390625, %v1162_v43  ;;  %v1495_v10 = vsel %vm1493_vm9, %v1490_v5, 0.0  ;;  %v1292_v19 = vmul.f32 %v3571_v14, %v3556_v28 }
 0x29f   : > { %v1496_v63 = vadd.f32 %v1495_v10, %v1494_v45 }
 0x2a0   : > { %v1212_v12 = vmul.f32 %v3579_v39, %v1168_v18 }
 0x2a1   : > { %v1190_v60 = vpop.xlane.xlu0 %1189  ;;  %v3558_v9 = vpop.xlane.xlu1 %1174 }
 0x2a2   : > { %v1196_v56 = vmul.f32 0.00390625, %v1190_v60  ;;  %v1218_v11 = vsel %vm1214_vm8, %v1212_v12, 0.0  ;;  %v1293_v6 = vmul.f32 %v3563_v17, %v3558_v9  ;;  %v1296_v60 = vsel %vm1214_vm8, %v1292_v19, 0.0 }
 0x2a3   : > { %v1219_v44 = vadd.f32 %v1218_v11, %v1217_v7 }
 0x2a4   : > { %v1491_v47 = vmul.f32 %v3579_v39, %v1196_v56  ;;  %v1297_v42 = vsel %vm1214_vm8, %v1293_v6, 0.0 }
 0x2a5   : > { %v3566_v22 = vpop.xlane.xlu0 %1202  ;;  %v3574_v62 = vpop.xlane.xlu1 %1199  ;;  %v1298_v54 = vadd.f32 %v1297_v42, %v1296_v60 }
 0x2a6   : > { %v1570_v8 = vmul.f32 %v3571_v14, %v3574_v62  ;;  %v1571_v30 = vmul.f32 %v3563_v17, %v3566_v22  ;;  %v1497_v15 = vsel %vm1493_vm9, %v1491_v47, 0.0 }
 0x2a7   : > { %v1498_v23 = vadd.f32 %v1497_v15, %v1496_v63 }
 0x2a8   : > { %v1574_v35 = vsel %vm1493_vm9, %v1570_v8, 0.0  ;;  %v1575_v25 = vsel %vm1493_vm9, %v1571_v30, 0.0 }
 0x2a9   : > { %v3585_v24 = vpop.xlane.xlu0 %1177  ;;  %v1165_v27 = vpop.xlane.xlu1 %1164  ;;  %v1576_v58 = vadd.f32 %v1575_v25, %v1574_v35 }
 0x2aa   : > { %v1169_v57 = vmul.f32 0.00390625, %v1165_v27  ;;  %v1294_v29 = vmul.f32 %v3579_v39, %v3585_v24 }
 0x2ac   : > { %v1213_v32 = vmul.f32 %v3603_v2, %v1169_v57  ;;  %v1299_v18 = vsel %vm1214_vm8, %v1294_v29, 0.0 }
 0x2ad   : > { %v3608_v55 = vpop.xlane.xlu0 %1205  ;;  %v1193_v37 = vpop.xlane.xlu1 %1192  ;;  %v1300_v30 = vadd.f32 %v1299_v18, %v1298_v54 }
 0x2ae   : > { %v1572_v4 = vmul.f32 %v3579_v39, %v3608_v55  ;;  %v1220_v38 = vsel %vm1214_vm8, %v1213_v32, 0.0  ;;  %v1197_v36 = vmul.f32 0.00390625, %v1193_v37 }
 0x2af   : > { %v1221_v43 = vadd.f32 %v1220_v38, %v1219_v44 }
 0x2b0   : > { %v1577_v46 = vsel %vm1493_vm9, %v1572_v4, 0.0  ;;  %v1492_v41 = vmul.f32 %v3603_v2, %v1197_v36 }
 0x2b1   : > { %v3621_v53 = vpop.xlane.xlu0 %1208  ;;  %v1222_v12 = vrot.slane %v1221_v43, 4  ;;  %v3623_v56 = vpop.xlane.xlu1 %1180  ;;  %v1578_v5 = vadd.f32 %v1577_v46, %v1576_v58 }
 0x2b2   : > { %v1573_v26 = vmul.f32 %v3603_v2, %v3621_v53  ;;  %v1499_v20 = vsel %vm1493_vm9, %v1492_v41, 0.0  ;;  %v1295_v1 = vmul.f32 %v3603_v2, %v3623_v56 }
 0x2b3   : > { %v1223_v8 = vadd.f32 %v1222_v12, %v1221_v43  ;;  %v1500_v27 = vadd.f32 %v1499_v20, %v1498_v23 }
 0x2b4   : > { %v1579_v11 = vsel %vm1493_vm9, %v1573_v26, 0.0  ;;  %v1301_v6 = vsel %vm1214_vm8, %v1295_v1, 0.0 }
 0x2b5   : > { %v1580_v47 = vadd.f32 %v1579_v11, %v1578_v5  ;;  %v1224_v57 = vrot.slane %v1223_v8, 2  ;;  %v1501_v7 = vrot.slane %v1500_v27, 4  ;;  %v1302_v45 = vadd.f32 %v1301_v6, %v1300_v30 }
 0x2b7   : > { %v1581_v10 = vrot.slane %v1580_v47, 4  ;;  %v1225_v19 = vadd.f32 %v1224_v57, %v1223_v8  ;;  %v1502_v32 = vadd.f32 %v1501_v7, %v1500_v27  ;;  %v1303_v29 = vrot.slane %v1302_v45, 4 }
 0x2b9   : > { %v1582_v44 = vadd.f32 %v1581_v10, %v1580_v47  ;;  %v1226_v35 = vrot.slane %v1225_v19, 1  ;;  %v1503_v25 = vrot.slane %v1502_v32, 2  ;;  %v1304_v37 = vadd.f32 %v1303_v29, %v1302_v45 }
 0x2bb   : > { %v1583_v4 = vrot.slane %v1582_v44, 2  ;;  %v1504_v42 = vadd.f32 %v1503_v25, %v1502_v32  ;;  %v1305_v15 = vrot.slane %v1304_v37, 2  ;;  %v3632_v38 = vadd.f32 %v1226_v35, %v1225_v19 }
 0x2bd   : > { %v1584_v36 = vadd.f32 %v1583_v4, %v1582_v44  ;;  %v1505_v63 = vrot.slane %v1504_v42, 1  ;;  %v1306_v43 = vadd.f32 %v1305_v15, %v1304_v37  ;;  %v3635_v46 = vmul.f32 0.70710677, %v3632_v38 }
 0x2bf   : > { %v1585_v60 = vrot.slane %v1584_v36, 1  ;;  %v1307_v58 = vrot.slane %v1306_v43, 1  ;;  %v1232_v18 = vand.u32 2147483647, %v3635_v46  ;;  %v3638_v41 = vadd.f32 %v1505_v63, %v1504_v42 }
 0x2c0   : > { %vm1230_vm10 = vcmp.ge.f32.partialorder %v3635_v46, 0.0 }
 0x2c1   : > { %v3640_v54 = vadd.f32 %v1585_v60, %v1584_v36  ;;  %v3642_v23 = vadd.f32 %v1307_v58, %v1306_v43  ;;  %v1233_v12 = vmul.f32 0.3275911, %v1232_v18  ;;  %v3648_v20 = vmul.f32 0.70710677, %v3638_v41 }
 0x2c2   : > { %v1246_v10 = vsub.f32 0.0, %v1232_v18 }
 0x2c3   : > { %v3645_v26 = vmul.f32 0.70710677, %v3640_v54  ;;  %v3651_v5 = vmul.f32 0.70710677, %v3642_v23  ;;  %v1234_v1 = vadd.f32 1.0, %v1233_v12  ;;  %vm1509_vm12 = vcmp.ge.f32.partialorder %v3648_v20, 0.0 }
 0x2c4   : > { %v1511_v30 = vand.u32 2147483647, %v3648_v20  ;;  %v1247_v32 = vmul.f32 %v1246_v10, %v1232_v18 }
 0x2c5   : > { %v1591_v8 = vand.u32 2147483647, %v3645_v26  ;;  %v1313_v27 = vand.u32 2147483647, %v3651_v5  ;;  %2177 = vrcp.f32 %v1234_v1  ;;  %vm1311_vm11 = vcmp.ge.f32.partialorder %v3651_v5, 0.0 }
 0x2c6   : > { %v1512_v6 = vmul.f32 0.3275911, %v1511_v30  ;;  %v1248_v37 = vmul.f32 1.442695, %v1247_v32  ;;  %v1525_v36 = vsub.f32 0.0, %v1511_v30  ;;  %vm1589_vm13 = vcmp.ge.f32.partialorder %v3645_v26, 0.0 }
 0x2c7   : > { %v1592_v11 = vmul.f32 0.3275911, %v1591_v8  ;;  %v1314_v47 = vmul.f32 0.3275911, %v1313_v27  ;;  %v1605_v29 = vsub.f32 0.0, %v1591_v8  ;;  %v1327_v35 = vsub.f32 0.0, %v1313_v27 }
 0x2c8   : > { %v1513_v45 = vadd.f32 1.0, %v1512_v6  ;;  %v1526_v18 = vmul.f32 %v1525_v36, %v1511_v30 }
 0x2c9   : > { %v1593_v57 = vadd.f32 1.0, %v1592_v11  ;;  %v1315_v7 = vadd.f32 1.0, %v1314_v47  ;;  %v1606_v42 = vmul.f32 %v1605_v29, %v1591_v8  ;;  %v1328_v43 = vmul.f32 %v1327_v35, %v1313_v27 }
 0x2ca   : > { %v1527_v27 = vmul.f32 1.442695, %v1526_v18 }
 0x2cb   : > { %2179 = vrcp.f32 %v1593_v57  ;;  %v1607_v6 = vmul.f32 1.442695, %v1606_v42 }
 0x2cc   : > { %2181 = vrcp.f32 %v1315_v7  ;;  %v1329_v7 = vmul.f32 1.442695, %v1328_v43 }
 0x2cd   : > { %2183 = vrcp.f32 %v1513_v45 }
 0x2ce   : > { %2185 = vpow2.f32 %v1248_v37 }
 0x2cf   : > { %v2178_v19 = vpop.eup %2177  ;;  %2187 = vpow2.f32 %v1607_v6 }
 0x2d0   : > { %v1237_v44 = vmul.f32 1.0614054, %v2178_v19  ;;  %2189 = vpow2.f32 %v1329_v7 }
 0x2d1   : > { %2191 = vpow2.f32 %v1527_v27 }
 0x2d2   : > { %v1238_v25 = vadd.f32 -1.4531521, %v1237_v44 }
 0x2d4   : > { %v1239_v15 = vmul.f32 %v2178_v19, %v1238_v25 }
 0x2d5   : > { %v2180_v4 = vpop.eup %2179 }
 0x2d6   : > { %v2182_v63 = vpop.eup %2181  ;;  %v1596_v60 = vmul.f32 1.0614054, %v2180_v4  ;;  %v1240_v58 = vadd.f32 1.4214138, %v1239_v15 }
 0x2d7   : > { %v1318_v12 = vmul.f32 1.0614054, %v2182_v63  ;;  %v2184_v11 = vpop.eup %2183 }
 0x2d8   : > { %v1597_v1 = vadd.f32 -1.4531521, %v1596_v60  ;;  %v1241_v47 = vmul.f32 %v2178_v19, %v1240_v58  ;;  %v1516_v45 = vmul.f32 1.0614054, %v2184_v11  ;;  %v2186_v43 = vpop.eup %2185 }
 0x2d9   : > { %v1319_v57 = vadd.f32 -1.4531521, %v1318_v12 }
 0x2da   : > { %v1598_v10 = vmul.f32 %v2180_v4, %v1597_v1  ;;  %v1242_v32 = vadd.f32 -0.28449672, %v1241_v47  ;;  %v1517_v8 = vadd.f32 -1.4531521, %v1516_v45 }
 0x2db   : > { %v1320_v44 = vmul.f32 %v2182_v63, %v1319_v57 }
 0x2dc   : > { %v1599_v29 = vadd.f32 1.4214138, %v1598_v10  ;;  %v1243_v25 = vmul.f32 %v2178_v19, %v1242_v32  ;;  %v1518_v15 = vmul.f32 %v2184_v11, %v1517_v8  ;;  %v2312_v10 = vmov -1.0  }
 0x2dd   : > { %v1321_v35 = vadd.f32 1.4214138, %v1320_v44  ;;  %v1231_v32 = vsel %vm1230_vm10, 1.0, %v2312_v10  ;;  %v1510_v5 = vsel %vm1509_vm12, 1.0, %v2312_v10 }
 0x2de   : > { %v1600_v37 = vmul.f32 %v2180_v4, %v1599_v29  ;;  %v1244_v60 = vadd.f32 0.2548296, %v1243_v25  ;;  %v1519_v42 = vadd.f32 1.4214138, %v1518_v15  ;;  %v2188_v29 = vpop.eup %2187  ;;  %v1228_v15 = vmul.f32 0.5, %v3632_v38 }
 0x2df   : > { %v1322_v0 = vmul.f32 %v2182_v63, %v1321_v35 }
 0x2e0   : > { %v1601_v58 = vadd.f32 -0.28449672, %v1600_v37  ;;  %v1245_v30 = vmul.f32 %v2178_v19, %v1244_v60  ;;  %v1520_v12 = vmul.f32 %v2184_v11, %v1519_v42 }
 0x2e1   : > { %v1323_v36 = vadd.f32 -0.28449672, %v1322_v0  ;;  %v2190_v0 = vpop.eup %2189 }
 0x2e2   : > { %v1602_v1 = vmul.f32 %v2180_v4, %v1601_v58  ;;  %v1250_v47 = vmul.f32 %v2186_v43, %v1245_v30  ;;  %v1521_v57 = vadd.f32 -0.28449672, %v1520_v12  ;;  %v2192_v42 = vpop.eup %2191 }
 0x2e3   : > { %v1324_v6 = vmul.f32 %v2182_v63, %v1323_v36 }
 0x2e4   : > { %v1603_v18 = vadd.f32 0.2548296, %v1602_v1  ;;  %v1251_v45 = vsub.f32 1.0, %v1250_v47  ;;  %v1522_v44 = vmul.f32 %v2184_v11, %v1521_v57  ;;  %v1590_v1 = vsel %vm1589_vm13, 1.0, %v2312_v10 }
 0x2e5   : > { %v1325_v7 = vadd.f32 0.2548296, %v1324_v6  ;;  %v1507_v57 = vmul.f32 0.5, %v3638_v41 }
 0x2e6   : > { %v1604_v8 = vmul.f32 %v2180_v4, %v1603_v18  ;;  %v1252_v19 = vmul.f32 %v1251_v45, %v1231_v32  ;;  %v1523_v27 = vadd.f32 0.2548296, %v1522_v44  ;;  %v1312_v4 = vsel %vm1311_vm11, 1.0, %v2312_v10 }
 0x2e7   : > { %v1326_v25 = vmul.f32 %v2182_v63, %v1325_v7  ;;  %v1587_v7 = vmul.f32 0.5, %v3640_v54 }
 0x2e8   : > { %v1609_v35 = vmul.f32 %v2188_v29, %v1604_v8  ;;  %v1253_v46 = vadd.f32 1.0, %v1252_v19  ;;  %v1524_v60 = vmul.f32 %v2184_v11, %v1523_v27  ;;  %v1309_v11 = vmul.f32 0.5, %v3642_v23 }
 0x2e9   : > { %v1331_v37 = vmul.f32 %v2190_v0, %v1326_v25 }
 0x2ea   : > { %v1254_v58 = vmul.f32 %v1253_v46, %v1228_v15  ;;  %v1529_v36 = vmul.f32 %v2192_v42, %v1524_v60  ;;  %v1610_v63 = vsub.f32 1.0, %v1609_v35 }
 0x2eb   : > { %v1332_v30 = vsub.f32 1.0, %v1331_v37 }
 0x2ec   : > { %1256 = vrot.lane.b32.xlu1 %v1254_v58, %s2313_s30  ;;  %v1530_v43 = vsub.f32 1.0, %v1529_v36  ;;  %v1611_v47 = vmul.f32 %v1610_v63, %v1590_v1  ;;  %v2316_v58 = vmov 18  }
 0x2ed   : > { %v1333_v38 = vmul.f32 %v1332_v30, %v1312_v4  ;;  %2173 = vset.pattern.permute.xlu1 %v2316_v58  ;;  %2174 = vset.pattern.permute.xlu0 %v2316_v58 }
 0x2ee   : > { %v1531_v20 = vmul.f32 %v1530_v43, %v1510_v5  ;;  %v1612_v45 = vadd.f32 1.0, %v1611_v47 }
 0x2ef   : > { %v1334_v12 = vadd.f32 1.0, %v1333_v38 }
 0x2f0   : > { %v1532_v18 = vadd.f32 1.0, %v1531_v20  ;;  %v1613_v32 = vmul.f32 %v1612_v45, %v1587_v7 }
 0x2f1   : > { %v1335_v6 = vmul.f32 %v1334_v12, %v1309_v11 }
 0x2f2   : > { %v1533_v26 = vmul.f32 %v1532_v18, %v1507_v57 }
 0x2f3   : > { %1337 = vrot.lane.b32.xlu0 %v1335_v6, %s2313_s30 }
 0x2f4   : > { %1535 = vrot.lane.b32.xlu1 %v1533_v26, %s2313_s30 }
 0x2f8   : > { %1615 = vrot.lane.b32.xlu1 %v1613_v32, %s2313_s30 }
 0x35e   : > { %v1257_v23 = vpop.permute.xlu1 %1256 }
 0x35f   : > { %v1259_v0 = vmul.f32 %v3571_v14, %v1257_v23  ;;  %v1261_v46 = vmul.f32 %v3579_v39, %v1257_v23  ;;  %v1260_v60 = vmul.f32 %v3563_v17, %v1257_v23  ;;  %v1262_v30 = vmul.f32 %v3603_v2, %v1257_v23 }
 0x365   : > { %v1338_v44 = vpop.permute.xlu0 %1337 }
 0x366   : > { %v1340_v8 = vmul.f32 %v3571_v14, %v1338_v44  ;;  %v1341_v29 = vmul.f32 %v3563_v17, %v1338_v44  ;;  %v1536_v19 = vpop.permute.xlu1 %1535  ;;  %v1342_v27 = vmul.f32 %v3579_v39, %v1338_v44  ;;  %v1343_v37 = vmul.f32 %v3603_v2, %v1338_v44 }
 0x367   : > { %v1538_v35 = vmul.f32 %v3571_v14, %v1536_v19  ;;  %v1540_v42 = vmul.f32 %v3579_v39, %v1536_v19  ;;  %v1539_v36 = vmul.f32 %v3563_v17, %v1536_v19  ;;  %v1541_v4 = vmul.f32 %v3603_v2, %v1536_v19 }
 0x368   : > { %1350 = vrot.lane.b32.xlu0 %v1341_v29, %s2314_s5  ;;  %1348 = vrot.lane.b32.xlu1 %v1340_v8, %s2314_s5 }
 0x36a   : > { %v1616_v41 = vpop.permute.xlu1 %1615 }
 0x36b   : > { %v1618_v25 = vmul.f32 %v3571_v14, %v1616_v41  ;;  %v1619_v54 = vmul.f32 %v3563_v17, %v1616_v41  ;;  %v1620_v15 = vmul.f32 %v3579_v39, %v1616_v41  ;;  %v1621_v63 = vmul.f32 %v3603_v2, %v1616_v41 }
 0x36d   : > { %1628 = vrot.lane.b32.xlu0 %v1619_v54, %s2315_s6  ;;  %1626 = vrot.lane.b32.xlu1 %v1618_v25, %s2315_s6 }
 0x371   : > { %1352 = vrot.lane.b32.xlu0 %v1342_v27, %s2314_s5  ;;  %1267 = vrot.lane.b32.xlu1 %v1259_v0, %s2314_s5 }
 0x375   : > { %1630 = vrot.lane.b32.xlu0 %v1620_v15, %s2315_s6  ;;  %1546 = vrot.lane.b32.xlu1 %v1538_v35, %s2315_s6 }
 0x379   : > { %1354 = vrot.lane.b32.xlu0 %v1343_v37, %s2314_s5  ;;  %1271 = vrot.lane.b32.xlu1 %v1261_v46, %s2314_s5 }
 0x37d   : > { %1269 = vrot.lane.b32.xlu0 %v1260_v60, %s2314_s5  ;;  %1550 = vrot.lane.b32.xlu1 %v1540_v42, %s2315_s6 }
 0x381   : > { %1548 = vrot.lane.b32.xlu0 %v1539_v36, %s2315_s6  ;;  %1273 = vrot.lane.b32.xlu1 %v1262_v30, %s2314_s5  ;;  %v4183_v30 = vld [vmem:[#allocation3_spill] sm:$0xff] }
 0x382   : > { %v232_v36 = vmul.f32 0.00390625, %v4183_v30 }
 0x385   : > { %1632 = vrot.lane.b32.xlu0 %v1621_v63, %s2315_s6  ;;  %1552 = vrot.lane.b32.xlu1 %v1541_v4, %s2315_s6  ;;  %v4184_v4 = vld [vmem:[#allocation2_spill] sm:$0xff] }
 0x386   : > { %v234_v63 = vmul.f32 0.00390625, %v4184_v4 }
 0x3da   : > { %v1349_v38 = vpop.permute.xlu1 %1348  ;;  %v1351_v43 = vpop.permute.xlu0 %1350 }
 0x3db   : > { %v1360_v5 = vsel %vm1279_vm14, %v1349_v38, 0.0  ;;  %v1363_v11 = vsel %vm1279_vm14, %v1351_v43, 0.0  ;;  %v236_v38 = vmul.f32 %v3571_v14, %v232_v36  ;;  %v4185_v43 = vld [vmem:[#allocation5_spill] sm:$0xff] }
 0x3dc   : > { %1361 = vadd.xlane.f32.xlu0 %v1360_v5  ;;  %v233_v5 = vmul.f32 0.00390625, %v4185_v43 }
 0x3df   : > { %v1629_v12 = vpop.permute.xlu0 %1628  ;;  %v1627_v1 = vpop.permute.xlu1 %1626 }
 0x3e0   : > { %1364 = vadd.xlane.f32.xlu0 %v1363_v11  ;;  %v1638_v20 = vsel %vm1279_vm14, %v1627_v1, 0.0  ;;  %v1641_v47 = vsel %vm1279_vm14, %v1629_v12, 0.0  ;;  %v238_v11 = vmul.f32 %v3579_v39, %v234_v63  ;;  %v4186_v12 = vld [vmem:[#allocation4_spill] sm:$0xff] }
 0x3e1   : > { %1639 = vadd.xlane.f32.xlu1 %v1638_v20  ;;  %v235_v1 = vmul.f32 0.00390625, %v4186_v12  ;;  %v237_v20 = vmul.f32 %v3563_v17, %v233_v5 }
 0x3e3   : > { %v1353_v6 = vpop.permute.xlu0 %1352  ;;  %v1268_v57 = vpop.permute.xlu1 %1267 }
 0x3e4   : > { %1642 = vadd.xlane.f32.xlu0 %v1641_v47  ;;  %v1280_v18 = vsel %vm1279_vm14, %v1268_v57, 0.0  ;;  %v1366_v26 = vsel %vm1279_vm14, %v1353_v6, 0.0  ;;  %v239_v47 = vmul.f32 %v3603_v2, %v235_v1  ;;  %v218_v6 = vld [vmem:[%s3904_s3 + $0x40] sm:$0x1]  ;;  %v4187_v57 = vmov 8  }
 0x3e5   : > { %1281 = vadd.xlane.f32.xlu1 %v1280_v18 }
 0x3e7   : > { %v1631_v45 = vpop.permute.xlu0 %1630  ;;  %v1547_v7 = vpop.permute.xlu1 %1546 }
 0x3e8   : > { %1367 = vadd.xlane.f32.xlu0 %v1366_v26  ;;  %v1558_v32 = vsel %vm1279_vm14, %v1547_v7, 0.0  ;;  %v1644_v23 = vsel %vm1279_vm14, %v1631_v45, 0.0 }
 0x3e9   : > { %1559 = vadd.xlane.f32.xlu1 %v1558_v32 }
 0x3eb   : > { %v1355_v44 = vpop.permute.xlu0 %1354  ;;  %v1272_v8 = vpop.permute.xlu1 %1271 }
 0x3ec   : > { %1645 = vadd.xlane.f32.xlu0 %v1644_v23  ;;  %v1286_v29 = vsel %vm1279_vm14, %v1272_v8, 0.0  ;;  %v1369_v19 = vsel %vm1279_vm14, %v1355_v44, 0.0 }
 0x3ed   : > { %1287 = vadd.xlane.f32.xlu1 %v1286_v29 }
 0x3ef   : > { %v1270_v41 = vpop.permute.xlu0 %1269  ;;  %v1551_v25 = vpop.permute.xlu1 %1550 }
 0x3f0   : > { %1370 = vadd.xlane.f32.xlu0 %v1369_v19  ;;  %v1564_v54 = vsel %vm1279_vm14, %v1551_v25, 0.0  ;;  %v1283_v0 = vsel %vm1279_vm14, %v1270_v41, 0.0 }
 0x3f1   : > { %1565 = vadd.xlane.f32.xlu1 %v1564_v54 }
 0x3f3   : > { %v1549_v27 = vpop.permute.xlu0 %1548  ;;  %v1274_v35 = vpop.permute.xlu1 %1273 }
 0x3f4   : > { %1284 = vadd.xlane.f32.xlu0 %v1283_v0  ;;  %v1289_v15 = vsel %vm1279_vm14, %v1274_v35, 0.0  ;;  %v1561_v46 = vsel %vm1279_vm14, %v1549_v27, 0.0 }
 0x3f5   : > { %1290 = vadd.xlane.f32.xlu1 %v1289_v15 }
 0x3f7   : > { %v1633_v37 = vpop.permute.xlu0 %1632  ;;  %v1553_v60 = vpop.permute.xlu1 %1552 }
 0x3f8   : > { %1562 = vadd.xlane.f32.xlu0 %v1561_v46  ;;  %v1567_v42 = vsel %vm1279_vm14, %v1553_v60, 0.0  ;;  %v1647_v58 = vsel %vm1279_vm14, %v1633_v37, 0.0 }
 0x3f9   : > { %1568 = vadd.xlane.f32.xlu1 %v1567_v42 }
 0x3fc   : > { %1648 = vadd.xlane.f32.xlu0 %v1647_v58 }
 0x40a   : > { %1769 = vperm.xlu1 %2173, %v236_v38  }
 0x40e   : > { %1779 = vperm.xlu1 %2173, %v238_v11  }
 0x412   : > { %1774 = vperm.xlu0 %2174, %v237_v20   ;;  %1784 = vperm.xlu1 %2173, %v239_v47  }
 0x416   : > { %2176 = vset.pattern.permute.xlu0 %v4187_v57  ;;  %1806 = vrot.lane.b32.xlu1 %v218_v6, %s2317_s9 }
 0x417   : > { %2175 = vset.pattern.permute.xlu1 %v4187_v57 }
 0x469   : > { %v1362_v18 = vpop.xlane.xlu0 %1361 }
 0x46d   : > { %v1365_v26 = vpop.xlane.xlu0 %1364 }
 0x46e   : > { %v1640_v45 = vpop.xlane.xlu1 %1639 }
 0x471   : > { %v1643_v7 = vpop.xlane.xlu0 %1642 }
 0x472   : > { %v1282_v32 = vpop.xlane.xlu1 %1281 }
 0x473   : > { %v1372_v23 = vadd.f32 %v1362_v18, %v1282_v32 }
 0x475   : > { %v1368_v44 = vpop.xlane.xlu0 %1367  ;;  %v2054_v8 = vmul.f32 -1.442695, %v1372_v23 }
 0x476   : > { %v1560_v29 = vpop.xlane.xlu1 %1559 }
 0x477   : > { %v1650_v19 = vadd.f32 %v1640_v45, %v1560_v29  ;;  %2193 = vpow2.f32 %v2054_v8 }
 0x479   : > { %v1646_v41 = vpop.xlane.xlu0 %1645  ;;  %v2058_v25 = vmul.f32 -1.442695, %v1650_v19 }
 0x47a   : > { %v1288_v54 = vpop.xlane.xlu1 %1287 }
 0x47b   : > { %v1374_v0 = vadd.f32 %v1368_v44, %v1288_v54  ;;  %2195 = vpow2.f32 %v2058_v25 }
 0x47d   : > { %v1371_v27 = vpop.xlane.xlu0 %1370  ;;  %v2056_v35 = vmul.f32 -1.442695, %v1374_v0 }
 0x47e   : > { %v1566_v15 = vpop.xlane.xlu1 %1565 }
 0x47f   : > { %2197 = vpow2.f32 %v2056_v35  ;;  %v1652_v46 = vadd.f32 %v1646_v41, %v1566_v15 }
 0x481   : > { %v1285_v37 = vpop.xlane.xlu0 %1284  ;;  %v2060_v42 = vmul.f32 -1.442695, %v1652_v46  ;;  %v2194_v63 = vpop.eup %2193 }
 0x482   : > { %v1373_v60 = vadd.f32 %v1365_v26, %v1285_v37  ;;  %v1291_v30 = vpop.xlane.xlu1 %1290  ;;  %v1388_v11 = vadd.f32 1.0, %v2194_v63 }
 0x483   : > { %2199 = vpow2.f32 %v2060_v42  ;;  %v1375_v36 = vadd.f32 %v1371_v27, %v1291_v30 }
 0x484   : > { %v2055_v58 = vmul.f32 -1.442695, %v1373_v60 }
 0x485   : > { %v1563_v4 = vpop.xlane.xlu0 %1562  ;;  %v2057_v43 = vmul.f32 -1.442695, %v1375_v36  ;;  %v2196_v20 = vpop.eup %2195 }
 0x486   : > { %v1651_v38 = vadd.f32 %v1643_v7, %v1563_v4  ;;  %2201 = vpow2.f32 %v2055_v58  ;;  %v1569_v12 = vpop.xlane.xlu1 %1568  ;;  %v1666_v26 = vadd.f32 1.0, %v2196_v20 }
 0x487   : > { %2203 = vpow2.f32 %v2057_v43 }
 0x488   : > { %v2059_v5 = vmul.f32 -1.442695, %v1651_v38 }
 0x489   : > { %v1649_v1 = vpop.xlane.xlu0 %1648  ;;  %v2198_v6 = vpop.eup %2197 }
 0x48a   : > { %v1653_v47 = vadd.f32 %v1649_v1, %v1569_v12  ;;  %2205 = vpow2.f32 %v2059_v5  ;;  %v1390_v57 = vadd.f32 1.0, %v2198_v6 }
 0x48b   : > { %2207 = vrcp.f32 %v1388_v11 }
 0x48c   : > { %v2061_v18 = vmul.f32 -1.442695, %v1653_v47 }
 0x48d   : > { %v2200_v45 = vpop.eup %2199 }
 0x48e   : > { %2209 = vpow2.f32 %v2061_v18  ;;  %v1668_v32 = vadd.f32 1.0, %v2200_v45 }
 0x48f   : > { %2211 = vrcp.f32 %v1390_v57 }
 0x490   : > { %v2202_v7 = vpop.eup %2201  ;;  %2213 = vrcp.f32 %v1666_v26 }
 0x491   : > { %v1389_v23 = vadd.f32 1.0, %v2202_v7  ;;  %v2204_v44 = vpop.eup %2203  ;;  %2215 = vrcp.f32 %v1668_v32 }
 0x492   : > { %v1391_v8 = vadd.f32 1.0, %v2204_v44 }
 0x493   : > { %2217 = vrcp.f32 %v1389_v23 }
 0x494   : > { %v2206_v29 = vpop.eup %2205  ;;  %2219 = vrcp.f32 %v1391_v8 }
 0x495   : > { %v1667_v19 = vadd.f32 1.0, %v2206_v29  ;;  %v3725_v41 = vpop.eup %2207 }
 0x496   : > { %v1400_v0 = vmul.f32 %v3725_v41, %v3556_v28 }
 0x497   : > { %2221 = vrcp.f32 %v1667_v19 }
 0x498   : > { %v2210_v25 = vpop.eup %2209  ;;  %v1404_v60 = vmul.f32 %v3571_v14, %v1400_v0 }
 0x499   : > { %v3727_v54 = vpop.eup %2211  ;;  %v1669_v27 = vadd.f32 1.0, %v2210_v25 }
 0x49a   : > { %v3731_v35 = vpop.eup %2213  ;;  %v1402_v46 = vmul.f32 %v3727_v54, %v3585_v24  ;;  %v1409_v38 = vsel %vm1408_vm15, %v1404_v60, 0.0  ;;  %v1770_v60 = vpop.permute.xlu1 %1769 }
 0x49b   : > { %2223 = vrcp.f32 %v1669_v27  ;;  %v3733_v15 = vpop.eup %2215  ;;  %v1678_v42 = vmul.f32 %v3731_v35, %v3574_v62 }
 0x49c   : > { %v1406_v30 = vmul.f32 %v3579_v39, %v1402_v46  ;;  %v1680_v36 = vmul.f32 %v3733_v15, %v3608_v55 }
 0x49d   : > { %v3737_v37 = vpop.eup %2217  ;;  %v1682_v62 = vmul.f32 %v3571_v14, %v1678_v42 }
 0x49e   : > { %v1401_v28 = vmul.f32 %v3737_v37, %v3558_v9  ;;  %v3744_v58 = vpop.eup %2219  ;;  %v1412_v11 = vsel %vm1408_vm15, %v1406_v30, 0.0  ;;  %v1684_v12 = vmul.f32 %v3579_v39, %v1680_v36  ;;  %v1775_v30 = vpop.permute.xlu0 %1774 }
 0x49f   : > { %v1403_v4 = vmul.f32 %v3744_v58, %v3623_v56  ;;  %v1687_v47 = vsel %vm1686_vm0, %v1682_v62, 0.0 }
 0x4a0   : > { %v1405_v24 = vmul.f32 %v3563_v17, %v1401_v28  ;;  %v1690_v45 = vsel %vm1686_vm0, %v1684_v12, 0.0 }
 0x4a1   : > { %v3752_v63 = vpop.eup %2221  ;;  %v1407_v43 = vmul.f32 %v3603_v2, %v1403_v4  ;;  %v1788_v4 = vmul.f32 %v3563_v17, %v1775_v30 }
 0x4a2   : > { %v1410_v9 = vsel %vm1408_vm15, %v1405_v24, 0.0  ;;  %v1679_v5 = vmul.f32 %v3752_v63, %v3566_v22 }
 0x4a3   : > { %v1411_v55 = vadd.f32 %v1410_v9, %v1409_v38  ;;  %v1414_v22 = vsel %vm1408_vm15, %v1407_v43, 0.0  ;;  %v1780_v9 = vpop.permute.xlu1 %1779  ;;  %v1787_v43 = vmul.f32 %v3571_v14, %v1770_v60 }
 0x4a4   : > { %v1683_v56 = vmul.f32 %v3563_v17, %v1679_v5  ;;  %v1789_v17 = vmul.f32 %v3579_v39, %v1780_v9 }
 0x4a5   : > { %v3763_v1 = vpop.eup %2223  ;;  %v1413_v20 = vadd.f32 %v1412_v11, %v1411_v55  ;;  %v1793_v11 = vsel %vm1791_vm1, %v1788_v4, 0.0 }
 0x4a6   : > { %v1688_v6 = vsel %vm1686_vm0, %v1683_v56, 0.0  ;;  %v1681_v57 = vmul.f32 %v3763_v1, %v3621_v53 }
 0x4a7   : > { %v1689_v18 = vadd.f32 %v1688_v6, %v1687_v47  ;;  %v1415_v26 = vadd.f32 %v1414_v22, %v1413_v20  ;;  %v1792_v20 = vsel %vm1791_vm1, %v1787_v43, 0.0 }
 0x4a8   : > { %v1685_v32 = vmul.f32 %v3603_v2, %v1681_v57  ;;  %v1794_v6 = vadd.f32 %v1793_v11, %v1792_v20  ;;  %v1785_v57 = vpop.permute.xlu1 %1784 }
 0x4a9   : > { %v1416_v7 = vrot.slane %v1415_v26, 4  ;;  %v1691_v23 = vadd.f32 %v1690_v45, %v1689_v18  ;;  %v1795_v18 = vsel %vm1791_vm1, %v1789_v17, 0.0 }
 0x4aa   : > { %v1692_v44 = vsel %vm1686_vm0, %v1685_v32, 0.0  ;;  %v1796_v45 = vadd.f32 %v1795_v18, %v1794_v6 }
 0x4ab   : > { %v1417_v8 = vadd.f32 %v1416_v7, %v1415_v26  ;;  %v1693_v29 = vadd.f32 %v1692_v44, %v1691_v23  ;;  %v1790_v26 = vmul.f32 %v3603_v2, %v1785_v57 }
 0x4ad   : > { %v1418_v19 = vrot.slane %v1417_v8, 2  ;;  %v1694_v25 = vrot.slane %v1693_v29, 4  ;;  %v1797_v7 = vsel %vm1791_vm1, %v1790_v26, 0.0 }
 0x4ae   : > { %v1798_v23 = vadd.f32 %v1797_v7, %v1796_v45 }
 0x4af   : > { %v1419_v0 = vadd.f32 %v1418_v19, %v1417_v8  ;;  %v1695_v27 = vadd.f32 %v1694_v25, %v1693_v29 }
 0x4b0   : > { %v1799_v25 = vrot.slane %v1798_v23, 4 }
 0x4b1   : > { %v1420_v46 = vrot.slane %v1419_v0, 1  ;;  %v1696_v53 = vrot.slane %v1695_v27, 2 }
 0x4b2   : > { %v1800_v30 = vadd.f32 %v1799_v25, %v1798_v23 }
 0x4b3   : > { %v3773_v42 = vadd.f32 %v1420_v46, %v1419_v0  ;;  %v1697_v28 = vadd.f32 %v1696_v53, %v1695_v27 }
 0x4b4   : > { %v1801_v11 = vrot.slane %v1800_v30, 2 }
 0x4b5   : > { %v3776_v36 = vmul.f32 0.70710677, %v3773_v42  ;;  %v1698_v24 = vrot.slane %v1697_v28, 1 }
 0x4b7   : > { %v1426_v38 = vand.u32 2147483647, %v3776_v36  ;;  %v3780_v62 = vadd.f32 %v1698_v24, %v1697_v28  ;;  %vm1424_vm2 = vcmp.ge.f32.partialorder %v3776_v36, 0.0 }
 0x4b9   : > { %v1427_v5 = vmul.f32 0.3275911, %v1426_v38  ;;  %v3784_v55 = vmul.f32 0.70710677, %v3780_v62  ;;  %v1440_v32 = vsub.f32 0.0, %v1426_v38 }
 0x4bb   : > { %v1428_v12 = vadd.f32 1.0, %v1427_v5  ;;  %v1704_v56 = vand.u32 2147483647, %v3784_v55  ;;  %v1441_v8 = vmul.f32 %v1440_v32, %v1426_v38  ;;  %vm1702_vm3 = vcmp.ge.f32.partialorder %v3784_v55, 0.0  ;;  %v4188_v55 = vld [vmem:[#allocation6_spill] sm:$0xff] }
 0x4bd   : > { %2225 = vrcp.f32 %v1428_v12  ;;  %v1705_v47 = vmul.f32 0.3275911, %v1704_v56  ;;  %v1718_v29 = vsub.f32 0.0, %v1704_v56  ;;  %v1442_v46 = vmul.f32 1.442695, %v1441_v8 }
 0x4bf   : > { %v1706_v22 = vadd.f32 1.0, %v1705_v47  ;;  %v1719_v53 = vmul.f32 %v1718_v29, %v1704_v56  ;;  %v1802_v47 = vadd.f32 %v1801_v11, %v1800_v30  ;;  %v1425_v29 = vsel %vm1424_vm2, 1.0, %v2312_v10 }
 0x4c1   : > { %2227 = vrcp.f32 %v1706_v22  ;;  %v1720_v9 = vmul.f32 1.442695, %v1719_v53  ;;  %v1803_v26 = vrot.slane %v1802_v47, 1 }
 0x4c2   : > { %2229 = vpow2.f32 %v1442_v46  ;;  %v1807_v46 = vpop.permute.xlu1 %1806 }
 0x4c3   : > { %2231 = vpow2.f32 %v1720_v9 }
 0x4c7   : > { %v2226_v44 = vpop.eup %2225 }
 0x4c8   : > { %v1431_v19 = vmul.f32 1.0614054, %v2226_v44 }
 0x4ca   : > { %v1432_v0 = vadd.f32 -1.4531521, %v1431_v19  ;;  %v1804_v19 = vadd.f32 %v1803_v26, %v1802_v47  ;;  %v2277_v47 = vld [vmem:[%s3903_s2 + $0x10] sm:$0xff]  ;;  %v211_v26 = vld [vmem:[%s3904_s3 + $0x8] sm:$0xff] }
 0x4cb   : > { %v2228_v27 = vpop.eup %2227 }
 0x4cc   : > { %v1433_v60 = vmul.f32 %v2226_v44, %v1432_v0  ;;  %v1709_v28 = vmul.f32 1.0614054, %v2228_v27  ;;  %v2230_v18 = vpop.eup %2229  ;;  %v1809_v36 = vadd.f32 %v1807_v46, %v1804_v19 }
 0x4cd   : > { %v2232_v8 = vpop.eup %2231 }
 0x4ce   : > { %v1434_v24 = vadd.f32 1.4214138, %v1433_v60  ;;  %v1710_v4 = vadd.f32 -1.4531521, %v1709_v28  ;;  %v1703_v28 = vsel %vm1702_vm3, 1.0, %v2312_v10  ;;  %v1810_v9 = vmax.f32 %v1809_v36, 0.0 }
 0x4d0   : > { %v1435_v43 = vmul.f32 %v2226_v44, %v1434_v24  ;;  %v1711_v5 = vmul.f32 %v2228_v27, %v1710_v4 }
 0x4d2   : > { %v1436_v12 = vadd.f32 -0.28449672, %v1435_v43  ;;  %v1712_v20 = vadd.f32 1.4214138, %v1711_v5  ;;  %v1814_v5 = vrot.slane %v1810_v9, %v4188_v55 }
 0x4d4   : > { %v1437_v38 = vmul.f32 %v2226_v44, %v1436_v12  ;;  %v1713_v17 = vmul.f32 %v2228_v27, %v1712_v20 }
 0x4d6   : > { %v1438_v6 = vadd.f32 0.2548296, %v1437_v38  ;;  %v1714_v57 = vadd.f32 -0.28449672, %v1713_v17  ;;  %v2276_v17 = vld [vmem:[%s3903_s2] sm:$0xff] }
 0x4d8   : > { %v1439_v22 = vmul.f32 %v2226_v44, %v1438_v6  ;;  %v1715_v56 = vmul.f32 %v2228_v27, %v1714_v57  ;;  %v1422_v44 = vmul.f32 0.5, %v3773_v42 }
 0x4da   : > { %v1444_v45 = vmul.f32 %v2230_v18, %v1439_v22  ;;  %v1716_v32 = vadd.f32 0.2548296, %v1715_v56  ;;  %v210_v56 = vld [vmem:[%s3904_s3] sm:$0xff] }
 0x4dc   : > { %v1445_v7 = vsub.f32 1.0, %v1444_v45  ;;  %v1717_v23 = vmul.f32 %v2228_v27, %v1716_v32  ;;  %v1700_v27 = vmul.f32 0.5, %v3780_v62  ;;  %v2275_v62 = vld [vmem:[%s3903_s2 + $0x8] sm:$0xff] }
 0x4de   : > { %v1446_v25 = vmul.f32 %v1445_v7, %v1425_v29  ;;  %v1722_v0 = vmul.f32 %v2232_v8, %v1717_v23  ;;  %v213_v8 = vld [vmem:[%s3904_s3 + $0x18] sm:$0xff] }
 0x4e0   : > { %v1447_v53 = vadd.f32 1.0, %v1446_v25  ;;  %v1723_v60 = vsub.f32 1.0, %v1722_v0  ;;  %v214_v25 = vld [vmem:[%s3904_s3 + $0x20] sm:$0xff] }
 0x4e2   : > { %v1448_v30 = vmul.f32 %v1447_v53, %v1422_v44  ;;  %v1724_v24 = vmul.f32 %v1723_v60, %v1703_v28  ;;  %v215_v44 = vld [vmem:[%s3904_s3 + $0x28] sm:$0xff]  ;;  %v3841_v28 = vld [vmem:[%s3904_s3 + $0x38] sm:$0xff] }
 0x4e4   : > { %1450 = vrot.lane.b32.xlu1 %v1448_v30, %s2313_s30  ;;  %v1725_v4 = vadd.f32 1.0, %v1724_v24  ;;  %v216_v24 = vld [vmem:[%s3904_s3 + $0x30] sm:$0xff] }
 0x4e6   : > { %v1726_v43 = vmul.f32 %v1725_v4, %v1700_v27 }
 0x4e8   : > { %1728 = vrot.lane.b32.xlu1 %v1726_v43, %s2313_s30 }
 0x4ec   : > { %1816 = vrot.lane.b32.xlu1 %v1814_v5, %s2318_s10 }
 0x556   : > { %v1451_v42 = vpop.permute.xlu1 %1450 }
 0x557   : > { %v1453_v11 = vmul.f32 %v3571_v14, %v1451_v42  ;;  %v1455_v10 = vmul.f32 %v3579_v39, %v1451_v42  ;;  %v1454_v12 = vmul.f32 %v2275_v62, %v1451_v42  ;;  %v1456_v20 = vmul.f32 %v3603_v2, %v1451_v42 }
 0x559   : > { %1465 = vrot.lane.b32.xlu0 %v1455_v10, %s2319_s11  ;;  %1461 = vrot.lane.b32.xlu1 %v1453_v11, %s2319_s11 }
 0x55a   : > { %v1729_v38 = vpop.permute.xlu1 %1728 }
 0x55b   : > { %v1731_v14 = vmul.f32 %v2276_v17, %v1729_v38  ;;  %v1732_v39 = vmul.f32 %v2275_v62, %v1729_v38  ;;  %v1733_v6 = vmul.f32 %v2277_v47, %v1729_v38  ;;  %v1734_v57 = vmul.f32 %v3603_v2, %v1729_v38  ;;  %v212_v2 = vld [vmem:[%s3904_s3 + $0x10] sm:$0xff] }
 0x55d   : > { %1463 = vrot.lane.b32.xlu1 %v1454_v12, %s2319_s11 }
 0x55e   : > { %v1817_v22 = vpop.permute.xlu1 %1816 }
 0x55f   : > { %v1819_v18 = vmul.f32 %v1817_v22, %v210_v56  ;;  %v1820_v32 = vmul.f32 %v1817_v22, %v211_v26  ;;  %v1821_v23 = vmul.f32 %v1817_v22, %v212_v2  ;;  %v1822_v19 = vmul.f32 %v1817_v22, %v213_v8 }
 0x560   : > { %v1823_v46 = vmul.f32 %v1817_v22, %v214_v25  ;;  %v1824_v60 = vmul.f32 %v1817_v22, %v215_v44  ;;  %v1826_v30 = vmul.f32 %v1817_v22, %v3841_v28  ;;  %v1825_v4 = vmul.f32 %v1817_v22, %v216_v24 }
 0x561   : > { %1467 = vrot.lane.b32.xlu1 %v1456_v20, %s2319_s11  ;;  %v1828_v45 = vsel %vm1827_vm4, %v1819_v18, 0.0  ;;  %v1831_v7 = vsel %vm1827_vm4, %v1820_v32, 0.0  ;;  %v1834_v29 = vsel %vm1827_vm4, %v1821_v23, 0.0  ;;  %v1837_v0 = vsel %vm1827_vm4, %v1822_v19, 0.0 }
 0x562   : > { %v1840_v53 = vsel %vm1827_vm4, %v1823_v46, 0.0  ;;  %v1843_v36 = vsel %vm1827_vm4, %v1824_v60, 0.0  ;;  %v1849_v27 = vsel %vm1827_vm4, %v1826_v30, 0.0  ;;  %v1846_v9 = vsel %vm1827_vm4, %v1825_v4, 0.0 }
 0x565   : > { %1739 = vrot.lane.b32.xlu1 %v1731_v14, %s2320_s19 }
 0x569   : > { %1741 = vrot.lane.b32.xlu1 %v1732_v39, %s2320_s19 }
 0x56d   : > { %1743 = vrot.lane.b32.xlu1 %v1733_v6, %s2320_s19 }
 0x571   : > { %1745 = vrot.lane.b32.xlu1 %v1734_v57, %s2320_s19 }
 0x578   : > { %1829 = vadd.xlane.f32.xlu0 %v1828_v45 }
 0x57c   : > { %1832 = vadd.xlane.f32.xlu0 %v1831_v7 }
 0x580   : > { %1835 = vadd.xlane.f32.xlu0 %v1834_v29 }
 0x584   : > { %1838 = vadd.xlane.f32.xlu0 %v1837_v0 }
 0x588   : > { %1841 = vadd.xlane.f32.xlu0 %v1840_v53 }
 0x58c   : > { %1844 = vadd.xlane.f32.xlu0 %v1843_v36 }
 0x590   : > { %1850 = vadd.xlane.f32.xlu0 %v1849_v27 }
 0x595   : > { %1847 = vadd.xlane.f32.xlu1 %v1846_v9 }
 0x5cb   : > { %v1462_v43 = vpop.permute.xlu1 %1461  ;;  %v1466_v11 = vpop.permute.xlu0 %1465 }
 0x5cc   : > { %v1473_v55 = vsel %vm1279_vm14, %v1462_v43, 0.0  ;;  %v1479_v62 = vsel %vm1279_vm14, %v1466_v11, 0.0 }
 0x5cd   : > { %1474 = vadd.xlane.f32.xlu0 %v1473_v55 }
 0x5cf   : > { %v1464_v5 = vpop.permute.xlu1 %1463 }
 0x5d0   : > { %v1476_v42 = vsel %vm1279_vm14, %v1464_v5, 0.0 }
 0x5d1   : > { %1477 = vadd.xlane.f32.xlu1 %v1476_v42 }
 0x5d3   : > { %v1468_v10 = vpop.permute.xlu1 %1467 }
 0x5d4   : > { %v1482_v12 = vsel %vm1279_vm14, %v1468_v10, 0.0 }
 0x5d5   : > { %1480 = vadd.xlane.f32.xlu1 %v1479_v62  ;;  %1483 = vadd.xlane.f32.xlu0 %v1482_v12 }
 0x5d7   : > { %v1740_v20 = vpop.permute.xlu1 %1739 }
 0x5d8   : > { %v1751_v38 = vsel %vm1279_vm14, %v1740_v20, 0.0 }
 0x5d9   : > { %1752 = vadd.xlane.f32.xlu1 %v1751_v38 }
 0x5db   : > { %v1742_v17 = vpop.permute.xlu1 %1741 }
 0x5dc   : > { %v1754_v14 = vsel %vm1279_vm14, %v1742_v17, 0.0 }
 0x5dd   : > { %1755 = vadd.xlane.f32.xlu0 %v1754_v14 }
 0x5df   : > { %v1744_v39 = vpop.permute.xlu1 %1743 }
 0x5e0   : > { %v1757_v47 = vsel %vm1279_vm14, %v1744_v39, 0.0 }
 0x5e1   : > { %1758 = vadd.xlane.f32.xlu1 %v1757_v47 }
 0x5e3   : > { %v1746_v6 = vpop.permute.xlu1 %1745 }
 0x5e4   : > { %v1760_v57 = vsel %vm1279_vm14, %v1746_v6, 0.0 }
 0x5e5   : > { %1761 = vadd.xlane.f32.xlu0 %v1760_v57 }
 0x605   : > { %v1830_v22 = vpop.xlane.xlu0 %1829 }
 0x606   : > { %v1852_v32 = vadd.f32 %v1830_v22, %v210_v56 }
 0x608   : > { %v2062_v7 = vmul.f32 -1.442695, %v1852_v32 }
 0x609   : > { %v1833_v18 = vpop.xlane.xlu0 %1832 }
 0x60a   : > { %v1853_v23 = vadd.f32 %v1833_v18, %v211_v26  ;;  %2233 = vpow2.f32 %v2062_v7 }
 0x60c   : > { %v2063_v19 = vmul.f32 -1.442695, %v1853_v23 }
 0x60d   : > { %v1836_v45 = vpop.xlane.xlu0 %1835 }
 0x60e   : > { %v1854_v0 = vadd.f32 %v1836_v45, %v212_v2  ;;  %2235 = vpow2.f32 %v2063_v19 }
 0x610   : > { %v2064_v53 = vmul.f32 -1.442695, %v1854_v0 }
 0x611   : > { %v1839_v29 = vpop.xlane.xlu0 %1838 }
 0x612   : > { %v1855_v60 = vadd.f32 %v1839_v29, %v213_v8  ;;  %2237 = vpow2.f32 %v2064_v53 }
 0x614   : > { %v2065_v36 = vmul.f32 -1.442695, %v1855_v60  ;;  %v2234_v4 = vpop.eup %2233 }
 0x615   : > { %v1842_v46 = vpop.xlane.xlu0 %1841  ;;  %v1884_v55 = vadd.f32 1.0, %v2234_v4 }
 0x616   : > { %v1856_v30 = vadd.f32 %v1842_v46, %v214_v25  ;;  %2239 = vpow2.f32 %v2065_v36 }
 0x618   : > { %v2066_v9 = vmul.f32 -1.442695, %v1856_v30  ;;  %v2236_v5 = vpop.eup %2235 }
 0x619   : > { %v1845_v27 = vpop.xlane.xlu0 %1844  ;;  %v1885_v2 = vadd.f32 1.0, %v2236_v5 }
 0x61a   : > { %v1857_v43 = vadd.f32 %v1845_v27, %v215_v44  ;;  %2241 = vpow2.f32 %v2066_v9 }
 0x61b   : > { %2243 = vrcp.f32 %v1884_v55 }
 0x61c   : > { %v2067_v26 = vmul.f32 -1.442695, %v1857_v43  ;;  %v2238_v10 = vpop.eup %2237 }
 0x61d   : > { %v1851_v11 = vpop.xlane.xlu0 %1850  ;;  %v1886_v25 = vadd.f32 1.0, %v2238_v10 }
 0x61e   : > { %2245 = vpow2.f32 %v2067_v26  ;;  %v1859_v8 = vadd.f32 %v1851_v11, %v3841_v28 }
 0x61f   : > { %2247 = vrcp.f32 %v1885_v2 }
 0x620   : > { %v2240_v12 = vpop.eup %2239  ;;  %v2069_v20 = vmul.f32 -1.442695, %v1859_v8 }
 0x621   : > { %v1887_v44 = vadd.f32 1.0, %v2240_v12 }
 0x622   : > { %v1848_v56 = vpop.xlane.xlu1 %1847 }
 0x623   : > { %v1858_v42 = vadd.f32 %v1848_v56, %v216_v24 }
 0x624   : > { %v2242_v17 = vpop.eup %2241 }
 0x625   : > { %v2068_v62 = vmul.f32 -1.442695, %v1858_v42  ;;  %v2244_v24 = vpop.eup %2243  ;;  %v1888_v47 = vadd.f32 1.0, %v2242_v17 }
 0x627   : > { %2249 = vpow2.f32 %v2068_v62 }
 0x628   : > { %2251 = vrcp.f32 %v1886_v25  ;;  %v2246_v57 = vpop.eup %2245 }
 0x629   : > { %2253 = vpow2.f32 %v2069_v20  ;;  %v2248_v22 = vpop.eup %2247  ;;  %v1889_v45 = vadd.f32 1.0, %v2246_v57 }
 0x62a   : > { %2255 = vrcp.f32 %v1887_v44 }
 0x62b   : > { %2257 = vrcp.f32 %v1888_v47 }
 0x62c   : > { %2259 = vrcp.f32 %v1889_v45 }
 0x631   : > { %v2250_v23 = vpop.eup %2249 }
 0x632   : > { %v1890_v46 = vadd.f32 1.0, %v2250_v23 }
 0x634   : > { %2261 = vrcp.f32 %v1890_v46 }
 0x65a   : > { %v1475_v38 = vpop.xlane.xlu0 %1474 }
 0x65b   : > { %v1485_v14 = vmul.f32 %v3725_v41, %v1475_v38  ;;  %v2252_v41 = vpop.eup %2251 }
 0x65c   : > { %v2254_v60 = vpop.eup %2253 }
 0x65d   : > { %v1908_v39 = vmul.f32 %v2244_v24, %v1485_v14  ;;  %v1891_v27 = vadd.f32 1.0, %v2254_v60 }
 0x65e   : > { %v1478_v6 = vpop.xlane.xlu1 %1477 }
 0x65f   : > { %v1486_v28 = vmul.f32 %v3737_v37, %v1478_v6  ;;  %1918 = vperm.xlu1 %2175, %v1908_v39   ;;  %v2256_v37 = vpop.eup %2255  ;;  %2263 = vrcp.f32 %v1891_v27 }
 0x660   : > { %v2258_v9 = vpop.eup %2257 }
 0x661   : > { %v1909_v18 = vmul.f32 %v2248_v22, %v1486_v28  ;;  %v2260_v55 = vpop.eup %2259 }
 0x662   : > { %v1484_v32 = vpop.xlane.xlu0 %1483  ;;  %v1481_v7 = vpop.xlane.xlu1 %1480 }
 0x663   : > { %v1487_v29 = vmul.f32 %v3727_v54, %v1481_v7  ;;  %1923 = vperm.xlu0 %2176, %v1909_v18   ;;  %v1488_v19 = vmul.f32 %v3744_v58, %v1484_v32  ;;  %v2262_v42 = vpop.eup %2261 }
 0x665   : > { %v1910_v0 = vmul.f32 %v2252_v41, %v1487_v29  ;;  %v1911_v36 = vmul.f32 %v2256_v37, %v1488_v19 }
 0x666   : > { %v1753_v53 = vpop.xlane.xlu1 %1752 }
 0x667   : > { %1928 = vperm.xlu1 %2175, %v1910_v0   ;;  %v1763_v30 = vmul.f32 %v3731_v35, %v1753_v53 }
 0x669   : > { %v1912_v54 = vmul.f32 %v2258_v9, %v1763_v30  ;;  %v2264_v11 = vpop.eup %2263 }
 0x66a   : > { %v1756_v4 = vpop.xlane.xlu0 %1755 }
 0x66b   : > { %1933 = vperm.xlu1 %2175, %v1911_v36   ;;  %v1764_v43 = vmul.f32 %v3752_v63, %v1756_v4 }
 0x66d   : > { %v1913_v56 = vmul.f32 %v2260_v55, %v1764_v43 }
 0x66e   : > { %v1759_v58 = vpop.xlane.xlu1 %1758 }
 0x66f   : > { %1946 = vperm.xlu1 %2175, %v1912_v54   ;;  %v1765_v5 = vmul.f32 %v3733_v15, %v1759_v58 }
 0x671   : > { %v1914_v35 = vmul.f32 %v2262_v42, %v1765_v5 }
 0x672   : > { %v1762_v26 = vpop.xlane.xlu0 %1761 }
 0x673   : > { %1951 = vperm.xlu1 %2175, %v1913_v56   ;;  %v1766_v2 = vmul.f32 %v3763_v1, %v1762_v26 }
 0x675   : > { %v1915_v10 = vmul.f32 %v2264_v11, %v1766_v2 }
 0x677   : > { %1956 = vperm.xlu1 %2175, %v1914_v35  }
 0x67b   : > { %1961 = vperm.xlu1 %2175, %v1915_v10  }
 0x6de   : > { %v1919_v8 = vpop.permute.xlu1 %1918 }
 0x6df   : > { %v1936_v12 = vmul.f32 %v1919_v8, %v4175_v21  ;;  %v1937_v20 = vmul.f32 %v1919_v8, %v4174_v16 }
 0x6e2   : > { %v1924_v38 = vpop.permute.xlu0 %1923 }
 0x6e3   : > { %v1938_v16 = vmul.f32 %v1924_v38, %v3429_v51 }
 0x6e6   : > { %v1929_v63 = vpop.permute.xlu1 %1928 }
 0x6e7   : > { %v1940_v6 = vmul.f32 %v1929_v63, %v3492_v61  ;;  %v1941_v57 = vmul.f32 %v1929_v63, %v3494_v13  ;;  %v4189_v13 = vld [vmem:[#allocation12_spill] sm:$0xff] }
 0x6ea   : > { %v1934_v62 = vpop.permute.xlu1 %1933 }
 0x6eb   : > { %v1943_v18 = vmul.f32 %v1934_v62, %v3536_v34 }
 0x6ee   : > { %v1947_v25 = vpop.permute.xlu1 %1946 }
 0x6ef   : > { %v1964_v15 = vmul.f32 %v1947_v25, %v3403_v48  ;;  %v1965_v44 = vmul.f32 %v1947_v25, %v3418_v33  ;;  %v1939_v48 = vmul.f32 %v1924_v38, %v3431_v50 }
 0x6f1   : > { %v1972_v1 = vadd.f32 %v1964_v15, %v1936_v12  ;;  %v1973_v17 = vadd.f32 %v1965_v44, %v1937_v20 }
 0x6f2   : > { %v1952_v21 = vpop.permute.xlu1 %1951 }
 0x6f3   : > { %1980 = vst [vmem:[%s3876_s14] sm:$0xff] %v1972_v1  ;;  %1981 = vst [vmem:[%s3876_s14 + $0x8] sm:$0xff] %v1973_v17  ;;  %v1966_v33 = vmul.f32 %v1952_v21, %v3462_v31  ;;  %v1967_v14 = vmul.f32 %v1952_v21, %v3464_v49  ;;  %v1942_v49 = vmul.f32 %v1934_v62, %v3534_v52 }
 0x6f5   : > { %v1974_v24 = vadd.f32 %v1966_v33, %v1938_v16  ;;  %v1975_v39 = vadd.f32 %v1967_v14, %v1939_v48 }
 0x6f6   : > { %v1957_v47 = vpop.permute.xlu1 %1956 }
 0x6f7   : > { %1982 = vst [vmem:[%s3876_s14 + $0x10] sm:$0xff] %v1974_v24  ;;  %1983 = vst [vmem:[%s3876_s14 + $0x18] sm:$0xff] %v1975_v39  ;;  %v1968_v51 = vmul.f32 %v1957_v47, %v3497_v40  ;;  %v1969_v50 = vmul.f32 %v1957_v47, %v3499_v3 }
 0x6f9   : > { %v1976_v31 = vadd.f32 %v1968_v51, %v1940_v6  ;;  %v1977_v28 = vadd.f32 %v1969_v50, %v1941_v57 }
 0x6fa   : > { %v1962_v22 = vpop.permute.xlu1 %1961 }
 0x6fb   : > { %1984 = vst [vmem:[%s3876_s14 + $0x20] sm:$0xff] %v1976_v31  ;;  %1985 = vst [vmem:[%s3876_s14 + $0x28] sm:$0xff] %v1977_v28  ;;  %v1970_v61 = vmul.f32 %v1962_v22, %v3542_v59  ;;  %v1971_v45 = vmul.f32 %v1962_v22, %v4189_v13 }
 0x6fd   : > { %v1978_v32 = vadd.f32 %v1970_v61, %v1942_v49  ;;  %v1979_v7 = vadd.f32 %v1971_v45, %v1943_v18 }
 0x6ff   : > { %1986 = vst [vmem:[%s3876_s14 + $0x30] sm:$0xff] %v1978_v32  ;;  %1987 = vst [vmem:[%s3876_s14 + $0x38] sm:$0xff] %v1979_v7 }
 0x700 PF: > { %s14_s15 = sadd.s32 1, %s2284_s15  }
 0x701   : > { %p11_p4 = scmp.ge.s32.totalorder %s14_s15, 4  }
 0x703   :  { %13 = sbr.rel (!%p11_p4) target bundleno = 1 (0x1), region = 66 }

</bundles_post_ra>
